<compile_context>
chip_gen: v7x
topology: tpu7x:2x2x1
jax: 0.10.0
libtpu: 0.0.40
codegen_flags: <defaults>
</compile_context>

<pallas_src>
import numpy as np

import jax
import jax.numpy as jnp
from jax.experimental import pallas as pl
from jax.experimental.pallas import tpu as pltpu

VMEM_SPEC = pl.BlockSpec(memory_space=pltpu.MemorySpace.VMEM)
HEADS = ["cal", "mass", "fat", "carb", "protein"]


def _avgpool_matrix(h, w, k, s):
    """(h*w, ho*wo) matrix M with  x(C, h*w) @ M  ==  nn.AvgPool2d(k, s)(x)."""
    ho, wo = (h - k) // s + 1, (w - k) // s + 1
    m = np.zeros((h * w, ho * wo), np.float32)
    inv = 1.0 / float(k * k)
    for i in range(ho):
        for j in range(wo):
            for di in range(k):
                for dj in range(k):
                    m[(i * s + di) * w + (j * s + dj), i * wo + j] = inv
    return jnp.asarray(m)


# ------------------------------ fused kernel ------------------------------- #

def _fused_forward_kernel(xin_ref,                     # (B*4, HW)  bf16  stacked cat([img, depth])
                          w0_ref, b0_ref,              # conv0 blockdiag (B*3,B*4) bf16, bias (B*3,1) f32
                          p1_ref,                      # pool-1 matrix (HW, S1) bf16
                          wp_ref, bp_ref,              # backbone proj blockdiag (B*F,B*3) bf16, (B*F,1) f32
                          p2_ref,                      # pool-2 matrix (S1, S2) bf16
                          w1_ref, b1_ref,              # fc1 packed (B*hid, S2*B*F) bf16, (B*hid,1) f32
                          wa_ref, ba_ref,              # heads-a blockdiag (B*5*hid, B*hid) bf16, bias f32
                          wb_ref, bb_ref,              # heads-b blockdiag (B*5, B*5*hid) bf16, bias f32
                          out_ref):                    # (B*5, 1) f32
    f32, bf16 = jnp.float32, jnp.bfloat16

    # conv0: 1x1 conv over torch.cat([img, depth], dim=1); the batch lives on
    # the sublane axis and the weight is block-diagonal -> one dot for all B.
    x0 = jnp.dot(w0_ref[...], xin_ref[...], preferred_element_type=f32) + b0_ref[...]   # (B*3, HW)

    # TODO(synk): pretrained timm `inception_resnet_v2` backbone has no clean
    # Pallas equivalent without its checkpoint; deterministic stand-in below
    # (avg-pool(6,2) as MXU matmul + 1x1 conv + ReLU) -> (B*F, S1) feature map.
    x0p = jnp.dot(x0.astype(bf16), p1_ref[...], preferred_element_type=f32)             # (B*3, S1)
    x1 = jnp.maximum(
        jnp.dot(wp_ref[...], x0p.astype(bf16), preferred_element_type=f32)
        + bp_ref[...], 0.0)                                                             # (B*F, S1)

    # self.pooling = nn.AvgPool2d(3, 2) as one MXU matmul over the whole batch.
    x2 = jnp.dot(x1.astype(bf16), p2_ref[...], preferred_element_type=f32)              # (B*F, S2)

    # nn.Flatten + fc1: stack the S2 pooled positions on the sublane axis
    # (tile-aligned concat of (B*F,1) columns -> (S2*B*F,1)); the fc1 weight
    # columns were permuted/block-diagonalised wrapper-side to match the NCHW
    # flatten order, so fc1 is ONE matmul (no per-position matvec loop).
    xcat = jnp.concatenate([x2[:, p:p + 1] for p in range(x2.shape[1])], axis=0)        # (S2*B*F, 1)
    h = jnp.maximum(
        jnp.dot(w1_ref[...], xcat.astype(bf16), preferred_element_type=f32)
        + b1_ref[...], 0.0)                                                             # (B*hid, 1)

    # Regressor.regress2 (depth=3 path: Linear(hid,hid) -> ReLU -> Linear(hid,1)
    # per head), batched over heads and batch via block-diagonal weights.
    a = jnp.maximum(
        jnp.dot(wa_ref[...], h.astype(bf16), preferred_element_type=f32)
        + ba_ref[...], 0.0)                                                             # (B*5*hid, 1)
    out = jnp.dot(wb_ref[...], a.astype(bf16), preferred_element_type=f32) + bb_ref[...]
    out_ref[...] = out.astype(out_ref.dtype)                                            # (B*5, 1)


# ------------------------------- parameters -------------------------------- #

def init_params(key, feat_ch=32, in_dim=128, hidden=64):
    """Deterministic PyTorch-style (uniform +/- 1/sqrt(fan_in)) initialization."""
    ks = jax.random.split(key, 3 + 2 * len(HEADS))

    def lin(k, fan_in, fan_out):
        kw, kb = jax.random.split(k)
        lim = 1.0 / float(np.sqrt(fan_in))
        w = jax.random.uniform(kw, (fan_in, fan_out), jnp.float32, -lim, lim)
        b = jax.random.uniform(kb, (fan_out,), jnp.float32, -lim, lim)
        return w, b

    params = {
        "conv0": lin(ks[0], 4, 3),                   # nn.Conv2d(4, 3, 1)
        "backbone_proj": lin(ks[1], 3, feat_ch),     # stand-in backbone 1x1 conv
        "fc1": lin(ks[2], in_dim, hidden),           # Regressor.fc1
    }
    for i, h in enumerate(HEADS):                    # Regressor.regress2 (depth=3 path)
        params[f"reg2_{h}_a"] = lin(ks[3 + 2 * i], hidden, hidden)
        params[f"reg2_{h}_b"] = lin(ks[4 + 2 * i], hidden, 1)
    return params


# --------------------------------- forward --------------------------------- #

def simple_inception_v2_forward(params, img, depth):
    B, _, H, W = img.shape
    HW = H * W
    f32, bf16 = jnp.float32, jnp.bfloat16
    nh = len(HEADS)
    eye_b = jnp.eye(B, dtype=f32)

    # ---- spatial geometry (stand-in backbone avgpool(6,2), self.pooling(3,2)) ----
    p1 = _avgpool_matrix(H, W, 6, 2)                          # (HW, S1)
    h1, w1sp = (H - 6) // 2 + 1, (W - 6) // 2 + 1
    p2 = _avgpool_matrix(h1, w1sp, 3, 2)                      # (S1, S2)
    h2, w2 = (h1 - 3) // 2 + 1, (w1sp - 3) // 2 + 1
    s2 = h2 * w2

    # ---- operand packing (tiny, constant-folded under jit) ----
    # conv0 (4->3, 1x1): block-diagonal over the batch (sublane-stacked input).
    w0, b0 = params["conv0"]                                  # (4,3), (3,)
    w0blk = jnp.kron(eye_b, w0.T)                             # (B*3, B*4)
    b0stk = jnp.tile(b0, B).reshape(-1, 1)

    # stand-in backbone 1x1 conv (3->F), block-diagonal over the batch.
    wbp, bbp = params["backbone_proj"]                        # (3,F), (F,)
    feat_ch = wbp.shape[1]
    wpblk = jnp.kron(eye_b, wbp.T)                            # (B*F, B*3)
    bpstk = jnp.tile(bbp, B).reshape(-1, 1)

    # fc1: rows of W1 follow the NCHW flatten order (k = f*S2 + p).  In-kernel
    # the S2 pooled positions are stacked on the sublane axis (row index
    # p*B*F + b*F + f), so permute + block-diagonalise the weight here.
    w1, b1 = params["fc1"]                                    # (F*S2, hidden), (hidden,)
    hidden = w1.shape[1]
    assert w1.shape[0] == feat_ch * s2
    m1 = w1.reshape(feat_ch, s2, hidden).transpose(2, 1, 0)   # (hidden, S2, F) = W1[f*S2+p, j]
    w1bc = jnp.concatenate(
        [jnp.kron(eye_b, m1[:, p, :]) for p in range(s2)], axis=1)   # (B*hid, S2*B*F)
    b1stk = jnp.tile(b1, B).reshape(-1, 1)

    # 5 regression heads: wide per-sample block (hidden -> 5*hidden) then a
    # block-diagonal (5*hidden -> 5), both block-diagonalised over the batch.
    wa_all = jnp.concatenate([params[f"reg2_{h}_a"][0].T for h in HEADS], axis=0)  # (5*hid, hid)
    ba_all = jnp.concatenate([params[f"reg2_{h}_a"][1] for h in HEADS])
    wastk = jnp.kron(eye_b, wa_all)                           # (B*5*hid, B*hid)
    bastk = jnp.tile(ba_all, B).reshape(-1, 1)

    wb_heads = jnp.zeros((nh, nh * hidden), f32)
    for d, h in enumerate(HEADS):
        wb_heads = wb_heads.at[d, d * hidden:(d + 1) * hidden].set(
            params[f"reg2_{h}_b"][0][:, 0])
    bb_all = jnp.concatenate([params[f"reg2_{h}_b"][1] for h in HEADS])
    wbstk = jnp.kron(eye_b, wb_heads)                         # (B*5, B*5*hid)
    bbstk = jnp.tile(bb_all, B).reshape(-1, 1)

    # ---- input packing: torch.cat([img, depth], dim=1), NCHW -> (B*4, HW) ----
    xin = jnp.concatenate([img, depth], axis=1).reshape(B * 4, HW)

    cast = lambda a: a.astype(bf16)
    out = pl.pallas_call(
        _fused_forward_kernel,
        out_shape=jax.ShapeDtypeStruct((B * nh, 1), f32),
        in_specs=[VMEM_SPEC] * 13,
        out_specs=VMEM_SPEC,
    )(cast(xin), cast(w0blk), b0stk, cast(p1), cast(wpblk), bpstk, cast(p2),
      cast(w1bc), b1stk, cast(wastk), bastk, cast(wbstk), bbstk)

    out2 = out.reshape(B, nh)                                 # rows were b*5 + head
    return {h: out2[:, d:d + 1] for d, h in enumerate(HEADS)}


if __name__ == "__main__":
    key = jax.random.PRNGKey(0)
    k_img, k_depth, k_params = jax.random.split(key, 3)

    B, H, W = 2, 16, 16
    img = jax.random.normal(k_img, (B, 3, H, W), jnp.float32)     # rgb   [B,3,H,W]
    dep = jax.random.normal(k_depth, (B, 1, H, W), jnp.float32)   # depth [B,1,H,W]

    params = init_params(k_params)
    fwd = jax.jit(lambda i, d: simple_inception_v2_forward(params, i, d))
    out = jax.block_until_ready(fwd(img, dep))

    assert set(out.keys()) == set(HEADS)
    assert all(v.shape == (B, 1) and v.dtype == jnp.float32 for v in out.values())
    print("KERNEL_OK")
</pallas_src>

<mosaic_0001>
module attributes {stable_mosaic.version = 11 : i64} {
  func.func @_fused_forward_kernel(%arg0: memref<8x256xbf16, #tpu.memory_space<vmem>>, %arg1: memref<6x8xbf16, #tpu.memory_space<vmem>>, %arg2: memref<6x1xf32, #tpu.memory_space<vmem>>, %arg3: memref<256x36xbf16, #tpu.memory_space<vmem>>, %arg4: memref<64x6xbf16, #tpu.memory_space<vmem>>, %arg5: memref<64x1xf32, #tpu.memory_space<vmem>>, %arg6: memref<36x4xbf16, #tpu.memory_space<vmem>>, %arg7: memref<128x256xbf16, #tpu.memory_space<vmem>>, %arg8: memref<128x1xf32, #tpu.memory_space<vmem>>, %arg9: memref<640x128xbf16, #tpu.memory_space<vmem>>, %arg10: memref<640x1xf32, #tpu.memory_space<vmem>>, %arg11: memref<10x640xbf16, #tpu.memory_space<vmem>>, %arg12: memref<10x1xf32, #tpu.memory_space<vmem>>, %arg13: memref<10x1xf32, #tpu.memory_space<vmem>>) attributes {dimension_semantics = [], scalar_prefetch = 0 : i64, scratch_operands = 0 : i64, tpu.core_type = #tpu.core_type<tc>} {
    %c0 = arith.constant 0 : index
    %c0_0 = arith.constant 0 : index
    %0 = vector.load %arg1[%c0, %c0_0] : memref<6x8xbf16, #tpu.memory_space<vmem>>, vector<6x8xbf16>
    %c0_1 = arith.constant 0 : index
    %c0_2 = arith.constant 0 : index
    %1 = vector.load %arg0[%c0_1, %c0_2] : memref<8x256xbf16, #tpu.memory_space<vmem>>, vector<8x256xbf16>
    %cst = arith.constant dense<0.000000e+00> : vector<6x256xf32>
    %2 = tpu.matmul %0, %1, %cst {dimension_numbers = #tpu.dot_dimension_numbers<[1], [0], [0], [1], [0, 0, 1, 1], [], []>} : vector<6x8xbf16>, vector<8x256xbf16>, vector<6x256xf32> -> vector<6x256xf32>
    %c0_3 = arith.constant 0 : index
    %c0_4 = arith.constant 0 : index
    %3 = vector.load %arg2[%c0_3, %c0_4] : memref<6x1xf32, #tpu.memory_space<vmem>>, vector<6x1xf32>
    %4 = vector.broadcast %3 : vector<6x1xf32> to vector<6x256xf32>
    %5 = arith.addf %2, %4 : vector<6x256xf32>
    %6 = arith.truncf %5 : vector<6x256xf32> to vector<6x256xbf16>
    %c0_5 = arith.constant 0 : index
    %c0_6 = arith.constant 0 : index
    %7 = vector.load %arg3[%c0_5, %c0_6] : memref<256x36xbf16, #tpu.memory_space<vmem>>, vector<256x36xbf16>
    %cst_7 = arith.constant dense<0.000000e+00> : vector<6x36xf32>
    %8 = tpu.matmul %6, %7, %cst_7 {dimension_numbers = #tpu.dot_dimension_numbers<[1], [0], [0], [1], [0, 0, 1, 1], [], []>} : vector<6x256xbf16>, vector<256x36xbf16>, vector<6x36xf32> -> vector<6x36xf32>
    %c0_8 = arith.constant 0 : index
    %c0_9 = arith.constant 0 : index
    %9 = vector.load %arg4[%c0_8, %c0_9] : memref<64x6xbf16, #tpu.memory_space<vmem>>, vector<64x6xbf16>
    %10 = arith.truncf %8 : vector<6x36xf32> to vector<6x36xbf16>
    %cst_10 = arith.constant dense<0.000000e+00> : vector<64x36xf32>
    %11 = tpu.matmul %9, %10, %cst_10 {dimension_numbers = #tpu.dot_dimension_numbers<[1], [0], [0], [1], [0, 0, 1, 1], [], []>} : vector<64x6xbf16>, vector<6x36xbf16>, vector<64x36xf32> -> vector<64x36xf32>
    %c0_11 = arith.constant 0 : index
    %c0_12 = arith.constant 0 : index
    %12 = vector.load %arg5[%c0_11, %c0_12] : memref<64x1xf32, #tpu.memory_space<vmem>>, vector<64x1xf32>
    %13 = vector.broadcast %12 : vector<64x1xf32> to vector<64x36xf32>
    %14 = arith.addf %11, %13 : vector<64x36xf32>
    %cst_13 = arith.constant 0.000000e+00 : f32
    %15 = vector.broadcast %cst_13 : f32 to vector<64x36xf32>
    %16 = arith.maximumf %14, %15 : vector<64x36xf32>
    %17 = arith.truncf %16 : vector<64x36xf32> to vector<64x36xbf16>
    %c0_14 = arith.constant 0 : index
    %c0_15 = arith.constant 0 : index
    %18 = vector.load %arg6[%c0_14, %c0_15] : memref<36x4xbf16, #tpu.memory_space<vmem>>, vector<36x4xbf16>
    %cst_16 = arith.constant dense<0.000000e+00> : vector<64x4xf32>
    %19 = tpu.matmul %17, %18, %cst_16 {dimension_numbers = #tpu.dot_dimension_numbers<[1], [0], [0], [1], [0, 0, 1, 1], [], []>} : vector<64x36xbf16>, vector<36x4xbf16>, vector<64x4xf32> -> vector<64x4xf32>
    %20 = vector.extract_strided_slice %19 {offsets = [0, 0], sizes = [64, 1], strides = [1, 1]} : vector<64x4xf32> to vector<64x1xf32>
    %21 = vector.extract_strided_slice %19 {offsets = [0, 1], sizes = [64, 1], strides = [1, 1]} : vector<64x4xf32> to vector<64x1xf32>
    %22 = vector.extract_strided_slice %19 {offsets = [0, 2], sizes = [64, 1], strides = [1, 1]} : vector<64x4xf32> to vector<64x1xf32>
    %23 = vector.extract_strided_slice %19 {offsets = [0, 3], sizes = [64, 1], strides = [1, 1]} : vector<64x4xf32> to vector<64x1xf32>
    %24 = tpu.concatenate %20, %21, %22, %23 in 0 : vector<64x1xf32>, vector<64x1xf32>, vector<64x1xf32>, vector<64x1xf32> -> vector<256x1xf32>
    %c0_17 = arith.constant 0 : index
    %c0_18 = arith.constant 0 : index
    %25 = vector.load %arg7[%c0_17, %c0_18] : memref<128x256xbf16, #tpu.memory_space<vmem>>, vector<128x256xbf16>
    %26 = arith.truncf %24 : vector<256x1xf32> to vector<256x1xbf16>
    %cst_19 = arith.constant dense<0.000000e+00> : vector<128x1xf32>
    %27 = tpu.matmul %25, %26, %cst_19 {dimension_numbers = #tpu.dot_dimension_numbers<[1], [0], [0], [1], [0, 0, 1, 1], [], []>} : vector<128x256xbf16>, vector<256x1xbf16>, vector<128x1xf32> -> vector<128x1xf32>
    %c0_20 = arith.constant 0 : index
    %c0_21 = arith.constant 0 : index
    %28 = vector.load %arg8[%c0_20, %c0_21] : memref<128x1xf32, #tpu.memory_space<vmem>>, vector<128x1xf32>
    %29 = arith.addf %27, %28 : vector<128x1xf32>
    %cst_22 = arith.constant 0.000000e+00 : f32
    %30 = vector.broadcast %cst_22 : f32 to vector<128x1xf32>
    %31 = arith.maximumf %29, %30 : vector<128x1xf32>
    %c0_23 = arith.constant 0 : index
    %c0_24 = arith.constant 0 : index
    %32 = vector.load %arg9[%c0_23, %c0_24] : memref<640x128xbf16, #tpu.memory_space<vmem>>, vector<640x128xbf16>
    %33 = arith.truncf %31 : vector<128x1xf32> to vector<128x1xbf16>
    %cst_25 = arith.constant dense<0.000000e+00> : vector<640x1xf32>
    %34 = tpu.matmul %32, %33, %cst_25 {dimension_numbers = #tpu.dot_dimension_numbers<[1], [0], [0], [1], [0, 0, 1, 1], [], []>} : vector<640x128xbf16>, vector<128x1xbf16>, vector<640x1xf32> -> vector<640x1xf32>
    %c0_26 = arith.constant 0 : index
    %c0_27 = arith.constant 0 : index
    %35 = vector.load %arg10[%c0_26, %c0_27] : memref<640x1xf32, #tpu.memory_space<vmem>>, vector<640x1xf32>
    %36 = arith.addf %34, %35 : vector<640x1xf32>
    %cst_28 = arith.constant 0.000000e+00 : f32
    %37 = vector.broadcast %cst_28 : f32 to vector<640x1xf32>
    %38 = arith.maximumf %36, %37 : vector<640x1xf32>
    %c0_29 = arith.constant 0 : index
    %c0_30 = arith.constant 0 : index
    %39 = vector.load %arg11[%c0_29, %c0_30] : memref<10x640xbf16, #tpu.memory_space<vmem>>, vector<10x640xbf16>
    %40 = arith.truncf %38 : vector<640x1xf32> to vector<640x1xbf16>
    %cst_31 = arith.constant dense<0.000000e+00> : vector<10x1xf32>
    %41 = tpu.matmul %39, %40, %cst_31 {dimension_numbers = #tpu.dot_dimension_numbers<[1], [0], [0], [1], [0, 0, 1, 1], [], []>} : vector<10x640xbf16>, vector<640x1xbf16>, vector<10x1xf32> -> vector<10x1xf32>
    %c0_32 = arith.constant 0 : index
    %c0_33 = arith.constant 0 : index
    %42 = vector.load %arg12[%c0_32, %c0_33] : memref<10x1xf32, #tpu.memory_space<vmem>>, vector<10x1xf32>
    %43 = arith.addf %41, %42 : vector<10x1xf32>
    %c0_34 = arith.constant 0 : index
    %c0_35 = arith.constant 0 : index
    %44 = vector.load %arg13[%c0_34, %c0_35] : memref<10x1xf32, #tpu.memory_space<vmem>>, vector<10x1xf32>
    tpu.vector_store %arg13[%c0_34, %c0_35], %43 {strides = array<i32>} : memref<10x1xf32, #tpu.memory_space<vmem>>, vector<10x1xf32>,
    return
  }
}

</mosaic_0001>

<bundles_post_ra>
// kernel: tile.22
= control target key start
LH: loop header
LB: loop body
LE: loop exit
PB: predicated region body
PF: predicated region fallthrough
CT: control target
= control target key end

     0   :  { %s22_s0 = inlined_call_operand.vmem [shape: f32[3], index: 0, kind: input, shape index: {}]   ;;  %s23_s1 = inlined_call_operand.vmem [shape: f32[2,3], index: 1, kind: output, shape index: {}]  }
   0x1   :  { %v4_v0 = vld [vmem:[%s22_s0] ss:$0 sm:$0xff] }
   0x2   :  { %5 = vst [vmem:[%s23_s1] sm:$0x3] %v4_v0 }

// kernel: tile.0
= control target key start
LH: loop header
LB: loop body
LE: loop exit
PB: predicated region body
PF: predicated region fallthrough
CT: control target
= control target key end

     0   :  { %vm7_vm0 = vcmask 7168   ;;  %s26_s10 = smov 126   ;;  %s49_s0 = inlined_call_operand.vmem [shape: f32[2,3], index: 0, kind: input, shape index: {}]   ;;  %s50_s1 = inlined_call_operand.vmem [shape: f32[6,1], index: 1, kind: output, shape index: {}]  }
   0x1   :  { %v4_v0 = vld [vmem:[%s49_s0] sm:$0x3]  ;;  %s25_s0 = smov 127  }
   0x2   :  { %5 = vst [vmem:[#allocation0] sm:$0x3] %v4_v0 }
   0x9   :  { %v9_v1 = vld [vmem:[#allocation0] sm:$0x3]  }
   0xa   :  { %v6_v2 = vld [vmem:[#allocation0] sm:$0x3]   ;;  %10 = vrot.lane.b32.xlu0 %v9_v1, %s25_s0 }
   0xb   :  { %8 = vst.msk [vmem:[%s50_s1] ss:$3 sm:$0x3] %vm7_vm0, %v6_v2   ;;  %v15_v3 = vld [vmem:[#allocation0] sm:$0x3]  }
   0xe   :  { %16 = vrot.lane.b32.xlu0 %v15_v3, %s26_s10 }
  0x7c   :  { %v11_v4 = vpop.permute.xlu0 %10  }
  0x7d   :  { %21 = vst.msk [vmem:[%s50_s1 + $0x1] ss:$3 sm:$0x3] %vm7_vm0, %v11_v4  }
  0x80   :  { %v17_v5 = vpop.permute.xlu0 %16  }
  0x81   :  { %22 = vst.msk [vmem:[%s50_s1 + $0x2] ss:$3 sm:$0x3] %vm7_vm0, %v17_v5  }

// kernel: tile.38
= control target key start
LH: loop header
LB: loop body
LE: loop exit
PB: predicated region body
PF: predicated region fallthrough
CT: control target
= control target key end

     0   :  { %s22_s0 = inlined_call_operand.vmem [shape: f32[5], index: 0, kind: input, shape index: {}]   ;;  %s23_s1 = inlined_call_operand.vmem [shape: f32[2,5], index: 1, kind: output, shape index: {}]  }
   0x1   :  { %v4_v0 = vld [vmem:[%s22_s0] ss:$0 sm:$0xff] }
   0x2   :  { %5 = vst [vmem:[%s23_s1] sm:$0x3] %v4_v0 }

// kernel: tile.4
= control target key start
LH: loop header
LB: loop body
LE: loop exit
PB: predicated region body
PF: predicated region fallthrough
CT: control target
= control target key end

     0   :  { %s42_s8 = smov 127   ;;  %vm7_vm0 = vcmask 7168   ;;  %s43_s11 = smov 124   ;;  %s78_s0 = inlined_call_operand.vmem [shape: f32[2,5], index: 0, kind: input, shape index: {}]   ;;  %s79_s1 = inlined_call_operand.vmem [shape: f32[10,1], index: 1, kind: output, shape index: {}]  }
   0x1   :  { %v4_v0 = vld [vmem:[%s78_s0] sm:$0x3]  ;;  %s41_s0 = smov 125   ;;  %s44_s12 = smov 126  }
   0x2   :  { %5 = vst [vmem:[#allocation0] sm:$0x3] %v4_v0 }
   0x9   :  { %v21_v1 = vld [vmem:[#allocation0] sm:$0x3]  }
   0xa   :  { %v9_v2 = vld [vmem:[#allocation0] sm:$0x3]   ;;  %22 = vrot.lane.b32.xlu1 %v21_v1, %s41_s0 }
   0xb   :  { %10 = vrot.lane.b32.xlu0 %v9_v2, %s42_s8  ;;  %v6_v3 = vld [vmem:[#allocation0] sm:$0x3]  }
   0xc   :  { %v27_v4 = vld [vmem:[#allocation0] sm:$0x3]   ;;  %8 = vst.msk [vmem:[%s79_s1] ss:$5 sm:$0x3] %vm7_vm0, %v6_v3  }
   0xd   :  { %v15_v5 = vld [vmem:[#allocation0] sm:$0x3]  }
   0xe   :  { %28 = vrot.lane.b32.xlu1 %v27_v4, %s43_s11 }
   0xf   :  { %16 = vrot.lane.b32.xlu0 %v15_v5, %s44_s12 }
  0x7c   :  { %v23_v6 = vpop.permute.xlu1 %22  }
  0x7d   :  { %v11_v7 = vpop.permute.xlu0 %10   ;;  %35 = vst.msk [vmem:[%s79_s1 + $0x3] ss:$5 sm:$0x3] %vm7_vm0, %v23_v6  }
  0x7e   :  { %33 = vst.msk [vmem:[%s79_s1 + $0x1] ss:$5 sm:$0x3] %vm7_vm0, %v11_v7  }
  0x80   :  { %v29_v8 = vpop.permute.xlu1 %28  }
  0x81   :  { %v17_v9 = vpop.permute.xlu0 %16   ;;  %36 = vst.msk [vmem:[%s79_s1 + $0x4] ss:$5 sm:$0x3] %vm7_vm0, %v29_v8  }
  0x82   :  { %34 = vst.msk [vmem:[%s79_s1 + $0x2] ss:$5 sm:$0x3] %vm7_vm0, %v17_v9  }

// kernel: tile.26
= control target key start
LH: loop header
LB: loop body
LE: loop exit
PB: predicated region body
PF: predicated region fallthrough
CT: control target
= control target key end

     0   :  { %s22_s0 = inlined_call_operand.vmem [shape: f32[32], index: 0, kind: input, shape index: {}]   ;;  %s23_s1 = inlined_call_operand.vmem [shape: f32[2,32], index: 1, kind: output, shape index: {}]  }
   0x1   :  { %v4_v0 = vld [vmem:[%s22_s0] ss:$0 sm:$0xff] }
   0x2   :  { %5 = vst [vmem:[%s23_s1] sm:$0x3] %v4_v0 }

// kernel: tile.30
= control target key start
LH: loop header
LB: loop body
LE: loop exit
PB: predicated region body
PF: predicated region fallthrough
CT: control target
= control target key end

     0   :  { %s22_s0 = inlined_call_operand.vmem [shape: f32[64], index: 0, kind: input, shape index: {}]   ;;  %s23_s1 = inlined_call_operand.vmem [shape: f32[2,64], index: 1, kind: output, shape index: {}]  }
   0x1   :  { %v4_v0 = vld [vmem:[%s22_s0] ss:$0 sm:$0xff] }
   0x2   :  { %5 = vst [vmem:[%s23_s1] sm:$0x3] %v4_v0 }

// kernel: tile.1
= control target key start
LH: loop header
LB: loop body
LE: loop exit
PB: predicated region body
PF: predicated region fallthrough
CT: control target
= control target key end

     0   :  { %s354_s8 = smov 125   ;;  %s355_s9 = smov 126   ;;  %vm7_vm0 = vcmask 7168   ;;  %s653_s0 = inlined_call_operand.vmem [shape: f32[2,32], index: 0, kind: input, shape index: {}]   ;;  %s654_s1 = inlined_call_operand.vmem [shape: f32[64,1], index: 1, kind: output, shape index: {}]  }
   0x1   :  { %v4_v0 = vld [vmem:[%s653_s0] sm:$0x3]  ;;  %s353_s0 = smov 127   ;;  %s356_s10 = smov 124  }
   0x2   :  { %5 = vst [vmem:[#allocation0] sm:$0x3] %v4_v0  ;;  %s357_s11 = smov 123   ;;  %s358_s12 = smov 122  }
   0x3   :  { %s359_s13 = smov 121   ;;  %s360_s14 = smov 120  }
   0x4   :  { %s361_s15 = smov 119   ;;  %s362_s16 = smov 118  }
   0x5   :  { %s363_s17 = smov 117   ;;  %s364_s18 = smov 116  }
   0x6   :  { %s365_s19 = smov 115   ;;  %s366_s20 = smov 114  }
   0x7   :  { %s367_s21 = smov 113   ;;  %s368_s22 = smov 112  }
   0x8   :  { %s369_s23 = smov 111   ;;  %s370_s24 = smov 110  }
   0x9   :  { %v11_v1 = vld [vmem:[#allocation0] sm:$0x3]   ;;  %s371_s25 = smov 109   ;;  %s372_s26 = smov 108  }
   0xa   :  { %v27_v2 = vld [vmem:[#allocation0] sm:$0x3]   ;;  %12 = vrot.lane.b32.xlu0 %v11_v1, %s353_s0  ;;  %s373_s27 = smov 107   ;;  %s374_s28 = smov 106  }
   0xb   :  { %28 = vrot.lane.b32.xlu1 %v27_v2, %s354_s8  ;;  %v19_v3 = vld [vmem:[#allocation0] sm:$0x3]   ;;  %s375_s29 = smov 105   ;;  %s376_s30 = smov 104  }
   0xc   :  { %v35_v4 = vld [vmem:[#allocation0] sm:$0x3]   ;;  %s377_s6 = smov 103   ;;  %s378_s7 = smov 102  }
   0xd   :  { %v43_v5 = vld [vmem:[#allocation0] sm:$0x3]   ;;  %s379_s0 = smov 101   ;;  %s380_s8 = smov 100  }
   0xe   :  { %20 = vrot.lane.b32.xlu0 %v19_v3, %s355_s9  ;;  %v51_v6 = vld [vmem:[#allocation0] sm:$0x3]   ;;  %s381_s9 = smov 99  }
   0xf   :  { %36 = vrot.lane.b32.xlu1 %v35_v4, %s356_s10  ;;  %v59_v7 = vld [vmem:[#allocation0] sm:$0x3]   ;;  %s382_s10 = smov 98  }
  0x10   :  { %v67_v8 = vld [vmem:[#allocation0] sm:$0x3]  }
  0x11   :  { %v75_v9 = vld [vmem:[#allocation0] sm:$0x3]  }
  0x12   :  { %44 = vrot.lane.b32.xlu0 %v43_v5, %s357_s11  ;;  %v83_v10 = vld [vmem:[#allocation0] sm:$0x3]   ;;  %s383_s11 = smov 97  }
  0x13   :  { %52 = vrot.lane.b32.xlu1 %v51_v6, %s358_s12  ;;  %v91_v11 = vld [vmem:[#allocation0] sm:$0x3]  }
  0x14   :  { %v99_v12 = vld [vmem:[#allocation0] sm:$0x3]  }
  0x15   :  { %v107_v13 = vld [vmem:[#allocation0] sm:$0x3]  }
  0x16   :  { %60 = vrot.lane.b32.xlu0 %v59_v7, %s359_s13  ;;  %v115_v14 = vld [vmem:[#allocation0] sm:$0x3]  }
  0x17   :  { %68 = vrot.lane.b32.xlu1 %v67_v8, %s360_s14  ;;  %v123_v15 = vld [vmem:[#allocation0] sm:$0x3]  }
  0x18   :  { %v131_v16 = vld [vmem:[#allocation0] sm:$0x3]  }
  0x19   :  { %v139_v17 = vld [vmem:[#allocation0] sm:$0x3]  }
  0x1a   :  { %76 = vrot.lane.b32.xlu0 %v75_v9, %s361_s15  ;;  %v147_v18 = vld [vmem:[#allocation0] sm:$0x3]  }
  0x1b   :  { %84 = vrot.lane.b32.xlu1 %v83_v10, %s362_s16  ;;  %v155_v19 = vld [vmem:[#allocation0] sm:$0x3]  }
  0x1c   :  { %v163_v20 = vld [vmem:[#allocation0] sm:$0x3]  }
  0x1d   :  { %v171_v21 = vld [vmem:[#allocation0] sm:$0x3]  }
  0x1e   :  { %92 = vrot.lane.b32.xlu0 %v91_v11, %s363_s17  ;;  %v179_v22 = vld [vmem:[#allocation0] sm:$0x3]  }
  0x1f   :  { %100 = vrot.lane.b32.xlu1 %v99_v12, %s364_s18  ;;  %v187_v23 = vld [vmem:[#allocation0] sm:$0x3]  }
  0x20   :  { %v195_v24 = vld [vmem:[#allocation0] sm:$0x3]  }
  0x21   :  { %v203_v25 = vld [vmem:[#allocation0] sm:$0x3]  }
  0x22   :  { %108 = vrot.lane.b32.xlu0 %v107_v13, %s365_s19  ;;  %v211_v26 = vld [vmem:[#allocation0] sm:$0x3]  }
  0x23   :  { %116 = vrot.lane.b32.xlu1 %v115_v14, %s366_s20  ;;  %v6_v27 = vld [vmem:[#allocation0] sm:$0x3]  }
  0x24   :  { %8 = vst.msk [vmem:[%s654_s1] sm:$0x1] %vm7_vm0, %v6_v27   ;;  %259 = vst.msk [vmem:[%s654_s1 + $0x1f] sm:$0x2] %vm7_vm0, %v6_v27   ;;  %v219_v28 = vld [vmem:[#allocation0] sm:$0x3]  }
  0x25   :  { %v227_v29 = vld [vmem:[#allocation0] sm:$0x3]  }
  0x26   :  { %124 = vrot.lane.b32.xlu0 %v123_v15, %s367_s21  ;;  %v235_v30 = vld [vmem:[#allocation0] sm:$0x3]  }
  0x27   :  { %132 = vrot.lane.b32.xlu1 %v131_v16, %s368_s22  ;;  %v243_v31 = vld [vmem:[#allocation0] sm:$0x3]  }
  0x28   :  { %v251_v32 = vld [vmem:[#allocation0] sm:$0x3]  }
  0x2a   :  { %140 = vrot.lane.b32.xlu0 %v139_v17, %s369_s23 }
  0x2b   :  { %148 = vrot.lane.b32.xlu1 %v147_v18, %s370_s24 }
  0x2e   :  { %156 = vrot.lane.b32.xlu0 %v155_v19, %s371_s25 }
  0x2f   :  { %164 = vrot.lane.b32.xlu1 %v163_v20, %s372_s26 }
  0x32   :  { %172 = vrot.lane.b32.xlu0 %v171_v21, %s373_s27 }
  0x33   :  { %180 = vrot.lane.b32.xlu1 %v179_v22, %s374_s28 }
  0x36   :  { %188 = vrot.lane.b32.xlu0 %v187_v23, %s375_s29 }
  0x37   :  { %196 = vrot.lane.b32.xlu1 %v195_v24, %s376_s30 }
  0x3a   :  { %204 = vrot.lane.b32.xlu0 %v203_v25, %s377_s6 }
  0x3b   :  { %212 = vrot.lane.b32.xlu1 %v211_v26, %s378_s7 }
  0x3e   :  { %220 = vrot.lane.b32.xlu0 %v219_v28, %s379_s0 }
  0x3f   :  { %228 = vrot.lane.b32.xlu1 %v227_v29, %s380_s8 }
  0x42   :  { %236 = vrot.lane.b32.xlu0 %v235_v30, %s381_s9 }
  0x43   :  { %244 = vrot.lane.b32.xlu1 %v243_v31, %s382_s10 }
  0x46   :  { %252 = vrot.lane.b32.xlu0 %v251_v32, %s383_s11 }
  0x7c   :  { %v13_v33 = vpop.permute.xlu0 %12  }
  0x7d   :  { %v29_v34 = vpop.permute.xlu1 %28   ;;  %260 = vst.msk [vmem:[%s654_s1 + $0x1] sm:$0x1] %vm7_vm0, %v13_v33   ;;  %261 = vst.msk [vmem:[%s654_s1 + $0x20] sm:$0x2] %vm7_vm0, %v13_v33  }
  0x7e   :  { %264 = vst.msk [vmem:[%s654_s1 + $0x3] sm:$0x1] %vm7_vm0, %v29_v34   ;;  %265 = vst.msk [vmem:[%s654_s1 + $0x22] sm:$0x2] %vm7_vm0, %v29_v34  }
  0x80   :  { %v21_v35 = vpop.permute.xlu0 %20  }
  0x81   :  { %v37_v36 = vpop.permute.xlu1 %36   ;;  %262 = vst.msk [vmem:[%s654_s1 + $0x2] sm:$0x1] %vm7_vm0, %v21_v35   ;;  %263 = vst.msk [vmem:[%s654_s1 + $0x21] sm:$0x2] %vm7_vm0, %v21_v35  }
  0x82   :  { %266 = vst.msk [vmem:[%s654_s1 + $0x4] sm:$0x1] %vm7_vm0, %v37_v36   ;;  %267 = vst.msk [vmem:[%s654_s1 + $0x23] sm:$0x2] %vm7_vm0, %v37_v36  }
  0x84   :  { %v45_v37 = vpop.permute.xlu0 %44  }
  0x85   :  { %v53_v38 = vpop.permute.xlu1 %52   ;;  %268 = vst.msk [vmem:[%s654_s1 + $0x5] sm:$0x1] %vm7_vm0, %v45_v37   ;;  %269 = vst.msk [vmem:[%s654_s1 + $0x24] sm:$0x2] %vm7_vm0, %v45_v37  }
  0x86   :  { %270 = vst.msk [vmem:[%s654_s1 + $0x6] sm:$0x1] %vm7_vm0, %v53_v38   ;;  %271 = vst.msk [vmem:[%s654_s1 + $0x25] sm:$0x2] %vm7_vm0, %v53_v38  }
  0x88   :  { %v61_v39 = vpop.permute.xlu0 %60  }
  0x89   :  { %v69_v40 = vpop.permute.xlu1 %68   ;;  %272 = vst.msk [vmem:[%s654_s1 + $0x7] sm:$0x1] %vm7_vm0, %v61_v39   ;;  %273 = vst.msk [vmem:[%s654_s1 + $0x26] sm:$0x2] %vm7_vm0, %v61_v39  }
  0x8a   :  { %274 = vst.msk [vmem:[%s654_s1 + $0x8] sm:$0x1] %vm7_vm0, %v69_v40   ;;  %275 = vst.msk [vmem:[%s654_s1 + $0x27] sm:$0x2] %vm7_vm0, %v69_v40  }
  0x8c   :  { %v77_v41 = vpop.permute.xlu0 %76  }
  0x8d   :  { %v85_v42 = vpop.permute.xlu1 %84   ;;  %276 = vst.msk [vmem:[%s654_s1 + $0x9] sm:$0x1] %vm7_vm0, %v77_v41   ;;  %277 = vst.msk [vmem:[%s654_s1 + $0x28] sm:$0x2] %vm7_vm0, %v77_v41  }
  0x8e   :  { %278 = vst.msk [vmem:[%s654_s1 + $0xa] sm:$0x1] %vm7_vm0, %v85_v42   ;;  %279 = vst.msk [vmem:[%s654_s1 + $0x29] sm:$0x2] %vm7_vm0, %v85_v42  }
  0x90   :  { %v93_v43 = vpop.permute.xlu0 %92  }
  0x91   :  { %v101_v44 = vpop.permute.xlu1 %100   ;;  %280 = vst.msk [vmem:[%s654_s1 + $0xb] sm:$0x1] %vm7_vm0, %v93_v43   ;;  %281 = vst.msk [vmem:[%s654_s1 + $0x2a] sm:$0x2] %vm7_vm0, %v93_v43  }
  0x92   :  { %282 = vst.msk [vmem:[%s654_s1 + $0xc] sm:$0x1] %vm7_vm0, %v101_v44   ;;  %283 = vst.msk [vmem:[%s654_s1 + $0x2b] sm:$0x2] %vm7_vm0, %v101_v44  }
  0x94   :  { %v109_v45 = vpop.permute.xlu0 %108  }
  0x95   :  { %v117_v46 = vpop.permute.xlu1 %116   ;;  %284 = vst.msk [vmem:[%s654_s1 + $0xd] sm:$0x1] %vm7_vm0, %v109_v45   ;;  %285 = vst.msk [vmem:[%s654_s1 + $0x2c] sm:$0x2] %vm7_vm0, %v109_v45  }
  0x96   :  { %286 = vst.msk [vmem:[%s654_s1 + $0xe] sm:$0x1] %vm7_vm0, %v117_v46   ;;  %287 = vst.msk [vmem:[%s654_s1 + $0x2d] sm:$0x2] %vm7_vm0, %v117_v46  }
  0x98   :  { %v125_v47 = vpop.permute.xlu0 %124  }
  0x99   :  { %v133_v48 = vpop.permute.xlu1 %132   ;;  %288 = vst.msk [vmem:[%s654_s1 + $0xf] sm:$0x1] %vm7_vm0, %v125_v47   ;;  %289 = vst.msk [vmem:[%s654_s1 + $0x2e] sm:$0x2] %vm7_vm0, %v125_v47  }
  0x9a   :  { %290 = vst.msk [vmem:[%s654_s1 + $0x10] sm:$0x1] %vm7_vm0, %v133_v48   ;;  %291 = vst.msk [vmem:[%s654_s1 + $0x2f] sm:$0x2] %vm7_vm0, %v133_v48  }
  0x9c   :  { %v141_v49 = vpop.permute.xlu0 %140  }
  0x9d   :  { %v149_v50 = vpop.permute.xlu1 %148   ;;  %292 = vst.msk [vmem:[%s654_s1 + $0x11] sm:$0x1] %vm7_vm0, %v141_v49   ;;  %293 = vst.msk [vmem:[%s654_s1 + $0x30] sm:$0x2] %vm7_vm0, %v141_v49  }
  0x9e   :  { %294 = vst.msk [vmem:[%s654_s1 + $0x12] sm:$0x1] %vm7_vm0, %v149_v50   ;;  %295 = vst.msk [vmem:[%s654_s1 + $0x31] sm:$0x2] %vm7_vm0, %v149_v50  }
  0xa0   :  { %v157_v51 = vpop.permute.xlu0 %156  }
  0xa1   :  { %v165_v52 = vpop.permute.xlu1 %164   ;;  %296 = vst.msk [vmem:[%s654_s1 + $0x13] sm:$0x1] %vm7_vm0, %v157_v51   ;;  %297 = vst.msk [vmem:[%s654_s1 + $0x32] sm:$0x2] %vm7_vm0, %v157_v51  }
  0xa2   :  { %298 = vst.msk [vmem:[%s654_s1 + $0x14] sm:$0x1] %vm7_vm0, %v165_v52   ;;  %299 = vst.msk [vmem:[%s654_s1 + $0x33] sm:$0x2] %vm7_vm0, %v165_v52  }
  0xa4   :  { %v173_v53 = vpop.permute.xlu0 %172  }
  0xa5   :  { %v181_v54 = vpop.permute.xlu1 %180   ;;  %300 = vst.msk [vmem:[%s654_s1 + $0x15] sm:$0x1] %vm7_vm0, %v173_v53   ;;  %301 = vst.msk [vmem:[%s654_s1 + $0x34] sm:$0x2] %vm7_vm0, %v173_v53  }
  0xa6   :  { %302 = vst.msk [vmem:[%s654_s1 + $0x16] sm:$0x1] %vm7_vm0, %v181_v54   ;;  %303 = vst.msk [vmem:[%s654_s1 + $0x35] sm:$0x2] %vm7_vm0, %v181_v54  }
  0xa8   :  { %v189_v55 = vpop.permute.xlu0 %188  }
  0xa9   :  { %v197_v56 = vpop.permute.xlu1 %196   ;;  %304 = vst.msk [vmem:[%s654_s1 + $0x17] sm:$0x1] %vm7_vm0, %v189_v55   ;;  %305 = vst.msk [vmem:[%s654_s1 + $0x36] sm:$0x2] %vm7_vm0, %v189_v55  }
  0xaa   :  { %306 = vst.msk [vmem:[%s654_s1 + $0x18] sm:$0x1] %vm7_vm0, %v197_v56   ;;  %307 = vst.msk [vmem:[%s654_s1 + $0x37] sm:$0x2] %vm7_vm0, %v197_v56  }
  0xac   :  { %v205_v57 = vpop.permute.xlu0 %204  }
  0xad   :  { %v213_v58 = vpop.permute.xlu1 %212   ;;  %308 = vst.msk [vmem:[%s654_s1 + $0x19] sm:$0x1] %vm7_vm0, %v205_v57   ;;  %309 = vst.msk [vmem:[%s654_s1 + $0x38] sm:$0x2] %vm7_vm0, %v205_v57  }
  0xae   :  { %310 = vst.msk [vmem:[%s654_s1 + $0x1a] sm:$0x1] %vm7_vm0, %v213_v58   ;;  %311 = vst.msk [vmem:[%s654_s1 + $0x39] sm:$0x2] %vm7_vm0, %v213_v58  }
  0xb0   :  { %v221_v59 = vpop.permute.xlu0 %220  }
  0xb1   :  { %v229_v60 = vpop.permute.xlu1 %228   ;;  %312 = vst.msk [vmem:[%s654_s1 + $0x1b] sm:$0x1] %vm7_vm0, %v221_v59   ;;  %313 = vst.msk [vmem:[%s654_s1 + $0x3a] sm:$0x2] %vm7_vm0, %v221_v59  }
  0xb2   :  { %314 = vst.msk [vmem:[%s654_s1 + $0x1c] sm:$0x1] %vm7_vm0, %v229_v60   ;;  %315 = vst.msk [vmem:[%s654_s1 + $0x3b] sm:$0x2] %vm7_vm0, %v229_v60  }
  0xb4   :  { %v237_v61 = vpop.permute.xlu0 %236  }
  0xb5   :  { %v245_v62 = vpop.permute.xlu1 %244   ;;  %316 = vst.msk [vmem:[%s654_s1 + $0x1d] sm:$0x1] %vm7_vm0, %v237_v61   ;;  %317 = vst.msk [vmem:[%s654_s1 + $0x3c] sm:$0x2] %vm7_vm0, %v237_v61  }
  0xb6   :  { %318 = vst.msk [vmem:[%s654_s1 + $0x1e] sm:$0x1] %vm7_vm0, %v245_v62   ;;  %319 = vst.msk [vmem:[%s654_s1 + $0x3d] sm:$0x2] %vm7_vm0, %v245_v62  }
  0xb8   :  { %v253_v63 = vpop.permute.xlu0 %252  }
  0xb9   :  { %320 = vst.msk [vmem:[%s654_s1 + $0x1f] sm:$0x1] %vm7_vm0, %v253_v63   ;;  %321 = vst.msk [vmem:[%s654_s1 + $0x3e] sm:$0x2] %vm7_vm0, %v253_v63  }

// kernel: tile.2
= control target key start
LH: loop header
LB: loop body
LE: loop exit
PB: predicated region body
PF: predicated region fallthrough
CT: control target
= control target key end

     0   :  { %s706_s8 = smov 125   ;;  %s707_s9 = smov 126   ;;  %vm7_vm0 = vcmask 7168   ;;  %s1293_s0 = inlined_call_operand.vmem [shape: f32[2,64], index: 0, kind: input, shape index: {}]   ;;  %s1294_s1 = inlined_call_operand.vmem [shape: f32[128,1], index: 1, kind: output, shape index: {}]  }
   0x1   :  { %v4_v0 = vld [vmem:[%s1293_s0] sm:$0x3]  ;;  %s705_s0 = smov 127   ;;  %s708_s10 = smov 124  }
   0x2   :  { %5 = vst [vmem:[#allocation0] sm:$0x3] %v4_v0  ;;  %s709_s11 = smov 123   ;;  %s710_s12 = smov 122  }
   0x3   :  { %s711_s13 = smov 121   ;;  %s712_s14 = smov 120  }
   0x4   :  { %s713_s15 = smov 119   ;;  %s714_s16 = smov 118  }
   0x5   :  { %s715_s17 = smov 117   ;;  %s716_s18 = smov 116  }
   0x6   :  { %s717_s19 = smov 115   ;;  %s718_s20 = smov 114  }
   0x7   :  { %s719_s21 = smov 113   ;;  %s720_s22 = smov 112  }
   0x8   :  { %s721_s23 = smov 111   ;;  %s722_s24 = smov 110  }
   0x9   :  { %v11_v1 = vld [vmem:[#allocation0] sm:$0x3]   ;;  %s723_s25 = smov 109   ;;  %s724_s26 = smov 108  }
   0xa   :  { %v27_v2 = vld [vmem:[#allocation0] sm:$0x3]   ;;  %12 = vrot.lane.b32.xlu0 %v11_v1, %s705_s0  ;;  %s725_s27 = smov 107   ;;  %s726_s28 = smov 106  }
   0xb   :  { %28 = vrot.lane.b32.xlu1 %v27_v2, %s706_s8  ;;  %v19_v3 = vld [vmem:[#allocation0] sm:$0x3]   ;;  %s727_s29 = smov 105   ;;  %s728_s30 = smov 104  }
   0xc   :  { %v35_v4 = vld [vmem:[#allocation0] sm:$0x3]   ;;  %s729_s2 = smov 103   ;;  %s730_s3 = smov 102  }
   0xd   :  { %v43_v5 = vld [vmem:[#allocation0] sm:$0x3]   ;;  %s731_s4 = smov 101   ;;  %s732_s5 = smov 100  }
   0xe   :  { %20 = vrot.lane.b32.xlu0 %v19_v3, %s707_s9  ;;  %v51_v6 = vld [vmem:[#allocation0] sm:$0x3]   ;;  %s733_s6 = smov 99   ;;  %s734_s7 = smov 98  }
   0xf   :  { %36 = vrot.lane.b32.xlu1 %v35_v4, %s708_s10  ;;  %v59_v7 = vld [vmem:[#allocation0] sm:$0x3]   ;;  %s735_s0 = smov 97   ;;  %s736_s8 = smov 96  }
  0x10   :  { %v67_v8 = vld [vmem:[#allocation0] sm:$0x3]   ;;  %s737_s9 = smov 95   ;;  %s738_s10 = smov 94  }
  0x11   :  { %v75_v9 = vld [vmem:[#allocation0] sm:$0x3]  }
  0x12   :  { %44 = vrot.lane.b32.xlu0 %v43_v5, %s709_s11  ;;  %v83_v10 = vld [vmem:[#allocation0] sm:$0x3]   ;;  %s739_s11 = smov 93  }
  0x13   :  { %52 = vrot.lane.b32.xlu1 %v51_v6, %s710_s12  ;;  %v91_v11 = vld [vmem:[#allocation0] sm:$0x3]   ;;  %s740_s12 = smov 92  }
  0x14   :  { %v99_v12 = vld [vmem:[#allocation0] sm:$0x3]  }
  0x15   :  { %v107_v13 = vld [vmem:[#allocation0] sm:$0x3]  }
  0x16   :  { %60 = vrot.lane.b32.xlu0 %v59_v7, %s711_s13  ;;  %v115_v14 = vld [vmem:[#allocation0] sm:$0x3]   ;;  %s741_s13 = smov 91  }
  0x17   :  { %68 = vrot.lane.b32.xlu1 %v67_v8, %s712_s14  ;;  %v123_v15 = vld [vmem:[#allocation0] sm:$0x3]   ;;  %s742_s14 = smov 90  }
  0x18   :  { %v131_v16 = vld [vmem:[#allocation0] sm:$0x3]  }
  0x19   :  { %v139_v17 = vld [vmem:[#allocation0] sm:$0x3]  }
  0x1a   :  { %76 = vrot.lane.b32.xlu0 %v75_v9, %s713_s15  ;;  %v147_v18 = vld [vmem:[#allocation0] sm:$0x3]   ;;  %s743_s15 = smov 89  }
  0x1b   :  { %84 = vrot.lane.b32.xlu1 %v83_v10, %s714_s16  ;;  %v155_v19 = vld [vmem:[#allocation0] sm:$0x3]   ;;  %s744_s16 = smov 88  }
  0x1c   :  { %v163_v20 = vld [vmem:[#allocation0] sm:$0x3]  }
  0x1d   :  { %v171_v21 = vld [vmem:[#allocation0] sm:$0x3]  }
  0x1e   :  { %92 = vrot.lane.b32.xlu0 %v91_v11, %s715_s17  ;;  %v179_v22 = vld [vmem:[#allocation0] sm:$0x3]   ;;  %s745_s17 = smov 87  }
  0x1f   :  { %100 = vrot.lane.b32.xlu1 %v99_v12, %s716_s18  ;;  %v187_v23 = vld [vmem:[#allocation0] sm:$0x3]   ;;  %s746_s18 = smov 86  }
  0x20   :  { %v195_v24 = vld [vmem:[#allocation0] sm:$0x3]  }
  0x21   :  { %v203_v25 = vld [vmem:[#allocation0] sm:$0x3]  }
  0x22   :  { %108 = vrot.lane.b32.xlu0 %v107_v13, %s717_s19  ;;  %v211_v26 = vld [vmem:[#allocation0] sm:$0x3]   ;;  %s747_s19 = smov 85  }
  0x23   :  { %116 = vrot.lane.b32.xlu1 %v115_v14, %s718_s20  ;;  %v219_v27 = vld [vmem:[#allocation0] sm:$0x3]   ;;  %s748_s20 = smov 84  }
  0x24   :  { %v227_v28 = vld [vmem:[#allocation0] sm:$0x3]  }
  0x25   :  { %v235_v29 = vld [vmem:[#allocation0] sm:$0x3]  }
  0x26   :  { %124 = vrot.lane.b32.xlu0 %v123_v15, %s719_s21  ;;  %v243_v30 = vld [vmem:[#allocation0] sm:$0x3]   ;;  %s749_s21 = smov 83  }
  0x27   :  { %132 = vrot.lane.b32.xlu1 %v131_v16, %s720_s22  ;;  %v251_v31 = vld [vmem:[#allocation0] sm:$0x3]   ;;  %s750_s22 = smov 82  }
  0x28   :  { %v259_v32 = vld [vmem:[#allocation0] sm:$0x3]  }
  0x29   :  { %v267_v33 = vld [vmem:[#allocation0] sm:$0x3]  }
  0x2a   :  { %140 = vrot.lane.b32.xlu0 %v139_v17, %s721_s23  ;;  %v275_v34 = vld [vmem:[#allocation0] sm:$0x3]   ;;  %s751_s23 = smov 81  }
  0x2b   :  { %148 = vrot.lane.b32.xlu1 %v147_v18, %s722_s24  ;;  %v283_v35 = vld [vmem:[#allocation0] sm:$0x3]   ;;  %s752_s24 = smov 80  }
  0x2c   :  { %v291_v36 = vld [vmem:[#allocation0] sm:$0x3]  }
  0x2d   :  { %v299_v37 = vld [vmem:[#allocation0] sm:$0x3]  }
  0x2e   :  { %156 = vrot.lane.b32.xlu0 %v155_v19, %s723_s25  ;;  %v307_v38 = vld [vmem:[#allocation0] sm:$0x3]   ;;  %s753_s25 = smov 79  }
  0x2f   :  { %164 = vrot.lane.b32.xlu1 %v163_v20, %s724_s26  ;;  %v315_v39 = vld [vmem:[#allocation0] sm:$0x3]   ;;  %s754_s26 = smov 78  }
  0x30   :  { %v323_v40 = vld [vmem:[#allocation0] sm:$0x3]  }
  0x31   :  { %v331_v41 = vld [vmem:[#allocation0] sm:$0x3]  }
  0x32   :  { %172 = vrot.lane.b32.xlu0 %v171_v21, %s725_s27  ;;  %v339_v42 = vld [vmem:[#allocation0] sm:$0x3]   ;;  %s755_s27 = smov 77  }
  0x33   :  { %180 = vrot.lane.b32.xlu1 %v179_v22, %s726_s28  ;;  %v347_v43 = vld [vmem:[#allocation0] sm:$0x3]   ;;  %s756_s28 = smov 76  }
  0x34   :  { %v355_v44 = vld [vmem:[#allocation0] sm:$0x3]  }
  0x35   :  { %v363_v45 = vld [vmem:[#allocation0] sm:$0x3]  }
  0x36   :  { %188 = vrot.lane.b32.xlu0 %v187_v23, %s727_s29  ;;  %v371_v46 = vld [vmem:[#allocation0] sm:$0x3]   ;;  %s757_s29 = smov 75  }
  0x37   :  { %196 = vrot.lane.b32.xlu1 %v195_v24, %s728_s30  ;;  %v379_v47 = vld [vmem:[#allocation0] sm:$0x3]   ;;  %s758_s30 = smov 74  }
  0x38   :  { %v387_v48 = vld [vmem:[#allocation0] sm:$0x3]  }
  0x39   :  { %v395_v49 = vld [vmem:[#allocation0] sm:$0x3]  }
  0x3a   :  { %204 = vrot.lane.b32.xlu0 %v203_v25, %s729_s2  ;;  %v403_v50 = vld [vmem:[#allocation0] sm:$0x3]   ;;  %s759_s2 = smov 73  }
  0x3b   :  { %212 = vrot.lane.b32.xlu1 %v211_v26, %s730_s3  ;;  %v411_v51 = vld [vmem:[#allocation0] sm:$0x3]   ;;  %s760_s3 = smov 72  }
  0x3c   :  { %v419_v52 = vld [vmem:[#allocation0] sm:$0x3]  }
  0x3d   :  { %v427_v53 = vld [vmem:[#allocation0] sm:$0x3]  }
  0x3e   :  { %220 = vrot.lane.b32.xlu0 %v219_v27, %s731_s4  ;;  %v435_v54 = vld [vmem:[#allocation0] sm:$0x3]  }
  0x3f   :  { %228 = vrot.lane.b32.xlu1 %v227_v28, %s732_s5  ;;  %v443_v55 = vld [vmem:[#allocation0] sm:$0x3]  }
  0x40   :  { %v451_v56 = vld [vmem:[#allocation0] sm:$0x3]  }
  0x41   :  { %v459_v57 = vld [vmem:[#allocation0] sm:$0x3]  }
  0x42   :  { %236 = vrot.lane.b32.xlu0 %v235_v29, %s733_s6  ;;  %v467_v58 = vld [vmem:[#allocation0] sm:$0x3]  }
  0x43   :  { %244 = vrot.lane.b32.xlu1 %v243_v30, %s734_s7  ;;  %v6_v59 = vld [vmem:[#allocation0] sm:$0x3]  }
  0x44   :  { %8 = vst.msk [vmem:[%s1294_s1] sm:$0x1] %vm7_vm0, %v6_v59   ;;  %515 = vst.msk [vmem:[%s1294_s1 + $0x3f] sm:$0x2] %vm7_vm0, %v6_v59   ;;  %v475_v60 = vld [vmem:[#allocation0] sm:$0x3]  }
  0x45   :  { %v483_v61 = vld [vmem:[#allocation0] sm:$0x3]  }
  0x46   :  { %252 = vrot.lane.b32.xlu0 %v251_v31, %s735_s0  ;;  %s761_s0 = smov 71   ;;  %v491_v0 = vld [vmem:[#allocation0] sm:$0x3]  }
  0x47   :  { %260 = vrot.lane.b32.xlu1 %v259_v32, %s736_s8  ;;  %s762_s8 = smov 70   ;;  %v499_v1 = vld [vmem:[#allocation0] sm:$0x3]  }
  0x48   :  { %v507_v4 = vld [vmem:[#allocation0] sm:$0x3]  }
  0x4a   :  { %268 = vrot.lane.b32.xlu0 %v267_v33, %s737_s9 }
  0x4b   :  { %276 = vrot.lane.b32.xlu1 %v275_v34, %s738_s10 }
  0x4e   :  { %284 = vrot.lane.b32.xlu0 %v283_v35, %s739_s11 }
  0x4f   :  { %292 = vrot.lane.b32.xlu1 %v291_v36, %s740_s12 }
  0x52   :  { %300 = vrot.lane.b32.xlu0 %v299_v37, %s741_s13 }
  0x53   :  { %308 = vrot.lane.b32.xlu1 %v307_v38, %s742_s14 }
  0x56   :  { %316 = vrot.lane.b32.xlu0 %v315_v39, %s743_s15 }
  0x57   :  { %324 = vrot.lane.b32.xlu1 %v323_v40, %s744_s16 }
  0x5a   :  { %332 = vrot.lane.b32.xlu0 %v331_v41, %s745_s17  ;;  %s763_s17 = smov 69  }
  0x5b   :  { %340 = vrot.lane.b32.xlu1 %v339_v42, %s746_s18  ;;  %s764_s18 = smov 68  }
  0x5e   :  { %348 = vrot.lane.b32.xlu0 %v347_v43, %s747_s19 }
  0x5f   :  { %356 = vrot.lane.b32.xlu1 %v355_v44, %s748_s20 }
  0x62   :  { %364 = vrot.lane.b32.xlu0 %v363_v45, %s749_s21 }
  0x63   :  { %372 = vrot.lane.b32.xlu1 %v371_v46, %s750_s22 }
  0x66   :  { %380 = vrot.lane.b32.xlu0 %v379_v47, %s751_s23 }
  0x67   :  { %388 = vrot.lane.b32.xlu1 %v387_v48, %s752_s24 }
  0x6a   :  { %396 = vrot.lane.b32.xlu0 %v395_v49, %s753_s25 }
  0x6b   :  { %404 = vrot.lane.b32.xlu1 %v403_v50, %s754_s26 }
  0x6e   :  { %412 = vrot.lane.b32.xlu0 %v411_v51, %s755_s27  ;;  %s765_s27 = smov 67  }
  0x6f   :  { %420 = vrot.lane.b32.xlu1 %v419_v52, %s756_s28  ;;  %s766_s28 = smov 66  }
  0x72   :  { %428 = vrot.lane.b32.xlu0 %v427_v53, %s757_s29 }
  0x73   :  { %436 = vrot.lane.b32.xlu1 %v435_v54, %s758_s30 }
  0x76   :  { %444 = vrot.lane.b32.xlu0 %v443_v55, %s759_s2 }
  0x77   :  { %452 = vrot.lane.b32.xlu1 %v451_v56, %s760_s3 }
  0x7a   :  { %460 = vrot.lane.b32.xlu0 %v459_v57, %s761_s0  ;;  %s767_s0 = smov 65  }
  0x7b   :  { %468 = vrot.lane.b32.xlu1 %v467_v58, %s762_s8 }
  0x7c   :  { %v13_v62 = vpop.permute.xlu0 %12  }
  0x7d   :  { %v29_v63 = vpop.permute.xlu1 %28   ;;  %516 = vst.msk [vmem:[%s1294_s1 + $0x1] sm:$0x1] %vm7_vm0, %v13_v62   ;;  %517 = vst.msk [vmem:[%s1294_s1 + $0x40] sm:$0x2] %vm7_vm0, %v13_v62  }
  0x7e   :  { %520 = vst.msk [vmem:[%s1294_s1 + $0x3] sm:$0x1] %vm7_vm0, %v29_v63   ;;  %521 = vst.msk [vmem:[%s1294_s1 + $0x42] sm:$0x2] %vm7_vm0, %v29_v63   ;;  %476 = vrot.lane.b32.xlu0 %v475_v60, %s763_s17 }
  0x7f   :  { %484 = vrot.lane.b32.xlu1 %v483_v61, %s764_s18 }
  0x80   :  { %v21_v2 = vpop.permute.xlu0 %20  }
  0x81   :  { %v37_v3 = vpop.permute.xlu1 %36   ;;  %518 = vst.msk [vmem:[%s1294_s1 + $0x2] sm:$0x1] %vm7_vm0, %v21_v2   ;;  %519 = vst.msk [vmem:[%s1294_s1 + $0x41] sm:$0x2] %vm7_vm0, %v21_v2  }
  0x82   :  { %522 = vst.msk [vmem:[%s1294_s1 + $0x4] sm:$0x1] %vm7_vm0, %v37_v3   ;;  %523 = vst.msk [vmem:[%s1294_s1 + $0x43] sm:$0x2] %vm7_vm0, %v37_v3   ;;  %492 = vrot.lane.b32.xlu0 %v491_v0, %s765_s27 }
  0x83   :  { %500 = vrot.lane.b32.xlu1 %v499_v1, %s766_s28 }
  0x84   :  { %v45_v5 = vpop.permute.xlu0 %44  }
  0x85   :  { %v53_v6 = vpop.permute.xlu1 %52   ;;  %524 = vst.msk [vmem:[%s1294_s1 + $0x5] sm:$0x1] %vm7_vm0, %v45_v5   ;;  %525 = vst.msk [vmem:[%s1294_s1 + $0x44] sm:$0x2] %vm7_vm0, %v45_v5  }
  0x86   :  { %526 = vst.msk [vmem:[%s1294_s1 + $0x6] sm:$0x1] %vm7_vm0, %v53_v6   ;;  %527 = vst.msk [vmem:[%s1294_s1 + $0x45] sm:$0x2] %vm7_vm0, %v53_v6   ;;  %508 = vrot.lane.b32.xlu0 %v507_v4, %s767_s0 }
  0x88   :  { %v61_v7 = vpop.permute.xlu0 %60  }
  0x89   :  { %v69_v8 = vpop.permute.xlu1 %68   ;;  %528 = vst.msk [vmem:[%s1294_s1 + $0x7] sm:$0x1] %vm7_vm0, %v61_v7   ;;  %529 = vst.msk [vmem:[%s1294_s1 + $0x46] sm:$0x2] %vm7_vm0, %v61_v7  }
  0x8a   :  { %530 = vst.msk [vmem:[%s1294_s1 + $0x8] sm:$0x1] %vm7_vm0, %v69_v8   ;;  %531 = vst.msk [vmem:[%s1294_s1 + $0x47] sm:$0x2] %vm7_vm0, %v69_v8  }
  0x8c   :  { %v77_v9 = vpop.permute.xlu0 %76  }
  0x8d   :  { %v85_v10 = vpop.permute.xlu1 %84   ;;  %532 = vst.msk [vmem:[%s1294_s1 + $0x9] sm:$0x1] %vm7_vm0, %v77_v9   ;;  %533 = vst.msk [vmem:[%s1294_s1 + $0x48] sm:$0x2] %vm7_vm0, %v77_v9  }
  0x8e   :  { %534 = vst.msk [vmem:[%s1294_s1 + $0xa] sm:$0x1] %vm7_vm0, %v85_v10   ;;  %535 = vst.msk [vmem:[%s1294_s1 + $0x49] sm:$0x2] %vm7_vm0, %v85_v10  }
  0x90   :  { %v93_v11 = vpop.permute.xlu0 %92  }
  0x91   :  { %v101_v12 = vpop.permute.xlu1 %100   ;;  %536 = vst.msk [vmem:[%s1294_s1 + $0xb] sm:$0x1] %vm7_vm0, %v93_v11   ;;  %537 = vst.msk [vmem:[%s1294_s1 + $0x4a] sm:$0x2] %vm7_vm0, %v93_v11  }
  0x92   :  { %538 = vst.msk [vmem:[%s1294_s1 + $0xc] sm:$0x1] %vm7_vm0, %v101_v12   ;;  %539 = vst.msk [vmem:[%s1294_s1 + $0x4b] sm:$0x2] %vm7_vm0, %v101_v12  }
  0x94   :  { %v109_v13 = vpop.permute.xlu0 %108  }
  0x95   :  { %v117_v14 = vpop.permute.xlu1 %116   ;;  %540 = vst.msk [vmem:[%s1294_s1 + $0xd] sm:$0x1] %vm7_vm0, %v109_v13   ;;  %541 = vst.msk [vmem:[%s1294_s1 + $0x4c] sm:$0x2] %vm7_vm0, %v109_v13  }
  0x96   :  { %542 = vst.msk [vmem:[%s1294_s1 + $0xe] sm:$0x1] %vm7_vm0, %v117_v14   ;;  %543 = vst.msk [vmem:[%s1294_s1 + $0x4d] sm:$0x2] %vm7_vm0, %v117_v14  }
  0x98   :  { %v125_v15 = vpop.permute.xlu0 %124  }
  0x99   :  { %v133_v16 = vpop.permute.xlu1 %132   ;;  %544 = vst.msk [vmem:[%s1294_s1 + $0xf] sm:$0x1] %vm7_vm0, %v125_v15   ;;  %545 = vst.msk [vmem:[%s1294_s1 + $0x4e] sm:$0x2] %vm7_vm0, %v125_v15  }
  0x9a   :  { %546 = vst.msk [vmem:[%s1294_s1 + $0x10] sm:$0x1] %vm7_vm0, %v133_v16   ;;  %547 = vst.msk [vmem:[%s1294_s1 + $0x4f] sm:$0x2] %vm7_vm0, %v133_v16  }
  0x9c   :  { %v141_v17 = vpop.permute.xlu0 %140  }
  0x9d   :  { %v149_v18 = vpop.permute.xlu1 %148   ;;  %548 = vst.msk [vmem:[%s1294_s1 + $0x11] sm:$0x1] %vm7_vm0, %v141_v17   ;;  %549 = vst.msk [vmem:[%s1294_s1 + $0x50] sm:$0x2] %vm7_vm0, %v141_v17  }
  0x9e   :  { %550 = vst.msk [vmem:[%s1294_s1 + $0x12] sm:$0x1] %vm7_vm0, %v149_v18   ;;  %551 = vst.msk [vmem:[%s1294_s1 + $0x51] sm:$0x2] %vm7_vm0, %v149_v18  }
  0xa0   :  { %v157_v19 = vpop.permute.xlu0 %156  }
  0xa1   :  { %v165_v20 = vpop.permute.xlu1 %164   ;;  %552 = vst.msk [vmem:[%s1294_s1 + $0x13] sm:$0x1] %vm7_vm0, %v157_v19   ;;  %553 = vst.msk [vmem:[%s1294_s1 + $0x52] sm:$0x2] %vm7_vm0, %v157_v19  }
  0xa2   :  { %554 = vst.msk [vmem:[%s1294_s1 + $0x14] sm:$0x1] %vm7_vm0, %v165_v20   ;;  %555 = vst.msk [vmem:[%s1294_s1 + $0x53] sm:$0x2] %vm7_vm0, %v165_v20  }
  0xa4   :  { %v173_v21 = vpop.permute.xlu0 %172  }
  0xa5   :  { %v181_v22 = vpop.permute.xlu1 %180   ;;  %556 = vst.msk [vmem:[%s1294_s1 + $0x15] sm:$0x1] %vm7_vm0, %v173_v21   ;;  %557 = vst.msk [vmem:[%s1294_s1 + $0x54] sm:$0x2] %vm7_vm0, %v173_v21  }
  0xa6   :  { %558 = vst.msk [vmem:[%s1294_s1 + $0x16] sm:$0x1] %vm7_vm0, %v181_v22   ;;  %559 = vst.msk [vmem:[%s1294_s1 + $0x55] sm:$0x2] %vm7_vm0, %v181_v22  }
  0xa8   :  { %v189_v23 = vpop.permute.xlu0 %188  }
  0xa9   :  { %v197_v24 = vpop.permute.xlu1 %196   ;;  %560 = vst.msk [vmem:[%s1294_s1 + $0x17] sm:$0x1] %vm7_vm0, %v189_v23   ;;  %561 = vst.msk [vmem:[%s1294_s1 + $0x56] sm:$0x2] %vm7_vm0, %v189_v23  }
  0xaa   :  { %562 = vst.msk [vmem:[%s1294_s1 + $0x18] sm:$0x1] %vm7_vm0, %v197_v24   ;;  %563 = vst.msk [vmem:[%s1294_s1 + $0x57] sm:$0x2] %vm7_vm0, %v197_v24  }
  0xac   :  { %v205_v25 = vpop.permute.xlu0 %204  }
  0xad   :  { %v213_v26 = vpop.permute.xlu1 %212   ;;  %564 = vst.msk [vmem:[%s1294_s1 + $0x19] sm:$0x1] %vm7_vm0, %v205_v25   ;;  %565 = vst.msk [vmem:[%s1294_s1 + $0x58] sm:$0x2] %vm7_vm0, %v205_v25  }
  0xae   :  { %566 = vst.msk [vmem:[%s1294_s1 + $0x1a] sm:$0x1] %vm7_vm0, %v213_v26   ;;  %567 = vst.msk [vmem:[%s1294_s1 + $0x59] sm:$0x2] %vm7_vm0, %v213_v26  }
  0xb0   :  { %v221_v27 = vpop.permute.xlu0 %220  }
  0xb1   :  { %v229_v28 = vpop.permute.xlu1 %228   ;;  %568 = vst.msk [vmem:[%s1294_s1 + $0x1b] sm:$0x1] %vm7_vm0, %v221_v27   ;;  %569 = vst.msk [vmem:[%s1294_s1 + $0x5a] sm:$0x2] %vm7_vm0, %v221_v27  }
  0xb2   :  { %570 = vst.msk [vmem:[%s1294_s1 + $0x1c] sm:$0x1] %vm7_vm0, %v229_v28   ;;  %571 = vst.msk [vmem:[%s1294_s1 + $0x5b] sm:$0x2] %vm7_vm0, %v229_v28  }
  0xb4   :  { %v237_v29 = vpop.permute.xlu0 %236  }
  0xb5   :  { %v245_v30 = vpop.permute.xlu1 %244   ;;  %572 = vst.msk [vmem:[%s1294_s1 + $0x1d] sm:$0x1] %vm7_vm0, %v237_v29   ;;  %573 = vst.msk [vmem:[%s1294_s1 + $0x5c] sm:$0x2] %vm7_vm0, %v237_v29  }
  0xb6   :  { %574 = vst.msk [vmem:[%s1294_s1 + $0x1e] sm:$0x1] %vm7_vm0, %v245_v30   ;;  %575 = vst.msk [vmem:[%s1294_s1 + $0x5d] sm:$0x2] %vm7_vm0, %v245_v30  }
  0xb8   :  { %v253_v31 = vpop.permute.xlu0 %252  }
  0xb9   :  { %v261_v32 = vpop.permute.xlu1 %260   ;;  %576 = vst.msk [vmem:[%s1294_s1 + $0x1f] sm:$0x1] %vm7_vm0, %v253_v31   ;;  %577 = vst.msk [vmem:[%s1294_s1 + $0x5e] sm:$0x2] %vm7_vm0, %v253_v31  }
  0xba   :  { %578 = vst.msk [vmem:[%s1294_s1 + $0x20] sm:$0x1] %vm7_vm0, %v261_v32   ;;  %579 = vst.msk [vmem:[%s1294_s1 + $0x5f] sm:$0x2] %vm7_vm0, %v261_v32  }
  0xbc   :  { %v269_v33 = vpop.permute.xlu0 %268  }
  0xbd   :  { %v277_v34 = vpop.permute.xlu1 %276   ;;  %580 = vst.msk [vmem:[%s1294_s1 + $0x21] sm:$0x1] %vm7_vm0, %v269_v33   ;;  %581 = vst.msk [vmem:[%s1294_s1 + $0x60] sm:$0x2] %vm7_vm0, %v269_v33  }
  0xbe   :  { %582 = vst.msk [vmem:[%s1294_s1 + $0x22] sm:$0x1] %vm7_vm0, %v277_v34   ;;  %583 = vst.msk [vmem:[%s1294_s1 + $0x61] sm:$0x2] %vm7_vm0, %v277_v34  }
  0xc0   :  { %v285_v35 = vpop.permute.xlu0 %284  }
  0xc1   :  { %v293_v36 = vpop.permute.xlu1 %292   ;;  %584 = vst.msk [vmem:[%s1294_s1 + $0x23] sm:$0x1] %vm7_vm0, %v285_v35   ;;  %585 = vst.msk [vmem:[%s1294_s1 + $0x62] sm:$0x2] %vm7_vm0, %v285_v35  }
  0xc2   :  { %586 = vst.msk [vmem:[%s1294_s1 + $0x24] sm:$0x1] %vm7_vm0, %v293_v36   ;;  %587 = vst.msk [vmem:[%s1294_s1 + $0x63] sm:$0x2] %vm7_vm0, %v293_v36  }
  0xc4   :  { %v301_v37 = vpop.permute.xlu0 %300  }
  0xc5   :  { %v309_v38 = vpop.permute.xlu1 %308   ;;  %588 = vst.msk [vmem:[%s1294_s1 + $0x25] sm:$0x1] %vm7_vm0, %v301_v37   ;;  %589 = vst.msk [vmem:[%s1294_s1 + $0x64] sm:$0x2] %vm7_vm0, %v301_v37  }
  0xc6   :  { %590 = vst.msk [vmem:[%s1294_s1 + $0x26] sm:$0x1] %vm7_vm0, %v309_v38   ;;  %591 = vst.msk [vmem:[%s1294_s1 + $0x65] sm:$0x2] %vm7_vm0, %v309_v38  }
  0xc8   :  { %v317_v39 = vpop.permute.xlu0 %316  }
  0xc9   :  { %v325_v40 = vpop.permute.xlu1 %324   ;;  %592 = vst.msk [vmem:[%s1294_s1 + $0x27] sm:$0x1] %vm7_vm0, %v317_v39   ;;  %593 = vst.msk [vmem:[%s1294_s1 + $0x66] sm:$0x2] %vm7_vm0, %v317_v39  }
  0xca   :  { %594 = vst.msk [vmem:[%s1294_s1 + $0x28] sm:$0x1] %vm7_vm0, %v325_v40   ;;  %595 = vst.msk [vmem:[%s1294_s1 + $0x67] sm:$0x2] %vm7_vm0, %v325_v40  }
  0xcc   :  { %v333_v41 = vpop.permute.xlu0 %332  }
  0xcd   :  { %v341_v42 = vpop.permute.xlu1 %340   ;;  %596 = vst.msk [vmem:[%s1294_s1 + $0x29] sm:$0x1] %vm7_vm0, %v333_v41   ;;  %597 = vst.msk [vmem:[%s1294_s1 + $0x68] sm:$0x2] %vm7_vm0, %v333_v41  }
  0xce   :  { %598 = vst.msk [vmem:[%s1294_s1 + $0x2a] sm:$0x1] %vm7_vm0, %v341_v42   ;;  %599 = vst.msk [vmem:[%s1294_s1 + $0x69] sm:$0x2] %vm7_vm0, %v341_v42  }
  0xd0   :  { %v349_v43 = vpop.permute.xlu0 %348  }
  0xd1   :  { %v357_v44 = vpop.permute.xlu1 %356   ;;  %600 = vst.msk [vmem:[%s1294_s1 + $0x2b] sm:$0x1] %vm7_vm0, %v349_v43   ;;  %601 = vst.msk [vmem:[%s1294_s1 + $0x6a] sm:$0x2] %vm7_vm0, %v349_v43  }
  0xd2   :  { %602 = vst.msk [vmem:[%s1294_s1 + $0x2c] sm:$0x1] %vm7_vm0, %v357_v44   ;;  %603 = vst.msk [vmem:[%s1294_s1 + $0x6b] sm:$0x2] %vm7_vm0, %v357_v44  }
  0xd4   :  { %v365_v45 = vpop.permute.xlu0 %364  }
  0xd5   :  { %v373_v46 = vpop.permute.xlu1 %372   ;;  %604 = vst.msk [vmem:[%s1294_s1 + $0x2d] sm:$0x1] %vm7_vm0, %v365_v45   ;;  %605 = vst.msk [vmem:[%s1294_s1 + $0x6c] sm:$0x2] %vm7_vm0, %v365_v45  }
  0xd6   :  { %606 = vst.msk [vmem:[%s1294_s1 + $0x2e] sm:$0x1] %vm7_vm0, %v373_v46   ;;  %607 = vst.msk [vmem:[%s1294_s1 + $0x6d] sm:$0x2] %vm7_vm0, %v373_v46  }
  0xd8   :  { %v381_v47 = vpop.permute.xlu0 %380  }
  0xd9   :  { %v389_v48 = vpop.permute.xlu1 %388   ;;  %608 = vst.msk [vmem:[%s1294_s1 + $0x2f] sm:$0x1] %vm7_vm0, %v381_v47   ;;  %609 = vst.msk [vmem:[%s1294_s1 + $0x6e] sm:$0x2] %vm7_vm0, %v381_v47  }
  0xda   :  { %610 = vst.msk [vmem:[%s1294_s1 + $0x30] sm:$0x1] %vm7_vm0, %v389_v48   ;;  %611 = vst.msk [vmem:[%s1294_s1 + $0x6f] sm:$0x2] %vm7_vm0, %v389_v48  }
  0xdc   :  { %v397_v49 = vpop.permute.xlu0 %396  }
  0xdd   :  { %v405_v50 = vpop.permute.xlu1 %404   ;;  %612 = vst.msk [vmem:[%s1294_s1 + $0x31] sm:$0x1] %vm7_vm0, %v397_v49   ;;  %613 = vst.msk [vmem:[%s1294_s1 + $0x70] sm:$0x2] %vm7_vm0, %v397_v49  }
  0xde   :  { %614 = vst.msk [vmem:[%s1294_s1 + $0x32] sm:$0x1] %vm7_vm0, %v405_v50   ;;  %615 = vst.msk [vmem:[%s1294_s1 + $0x71] sm:$0x2] %vm7_vm0, %v405_v50  }
  0xe0   :  { %v413_v51 = vpop.permute.xlu0 %412  }
  0xe1   :  { %v421_v52 = vpop.permute.xlu1 %420   ;;  %616 = vst.msk [vmem:[%s1294_s1 + $0x33] sm:$0x1] %vm7_vm0, %v413_v51   ;;  %617 = vst.msk [vmem:[%s1294_s1 + $0x72] sm:$0x2] %vm7_vm0, %v413_v51  }
  0xe2   :  { %618 = vst.msk [vmem:[%s1294_s1 + $0x34] sm:$0x1] %vm7_vm0, %v421_v52   ;;  %619 = vst.msk [vmem:[%s1294_s1 + $0x73] sm:$0x2] %vm7_vm0, %v421_v52  }
  0xe4   :  { %v429_v53 = vpop.permute.xlu0 %428  }
  0xe5   :  { %v437_v54 = vpop.permute.xlu1 %436   ;;  %620 = vst.msk [vmem:[%s1294_s1 + $0x35] sm:$0x1] %vm7_vm0, %v429_v53   ;;  %621 = vst.msk [vmem:[%s1294_s1 + $0x74] sm:$0x2] %vm7_vm0, %v429_v53  }
  0xe6   :  { %622 = vst.msk [vmem:[%s1294_s1 + $0x36] sm:$0x1] %vm7_vm0, %v437_v54   ;;  %623 = vst.msk [vmem:[%s1294_s1 + $0x75] sm:$0x2] %vm7_vm0, %v437_v54  }
  0xe8   :  { %v445_v55 = vpop.permute.xlu0 %444  }
  0xe9   :  { %v453_v56 = vpop.permute.xlu1 %452   ;;  %624 = vst.msk [vmem:[%s1294_s1 + $0x37] sm:$0x1] %vm7_vm0, %v445_v55   ;;  %625 = vst.msk [vmem:[%s1294_s1 + $0x76] sm:$0x2] %vm7_vm0, %v445_v55  }
  0xea   :  { %626 = vst.msk [vmem:[%s1294_s1 + $0x38] sm:$0x1] %vm7_vm0, %v453_v56   ;;  %627 = vst.msk [vmem:[%s1294_s1 + $0x77] sm:$0x2] %vm7_vm0, %v453_v56  }
  0xec   :  { %v461_v57 = vpop.permute.xlu0 %460  }
  0xed   :  { %v469_v58 = vpop.permute.xlu1 %468   ;;  %628 = vst.msk [vmem:[%s1294_s1 + $0x39] sm:$0x1] %vm7_vm0, %v461_v57   ;;  %629 = vst.msk [vmem:[%s1294_s1 + $0x78] sm:$0x2] %vm7_vm0, %v461_v57  }
  0xee   :  { %630 = vst.msk [vmem:[%s1294_s1 + $0x3a] sm:$0x1] %vm7_vm0, %v469_v58   ;;  %631 = vst.msk [vmem:[%s1294_s1 + $0x79] sm:$0x2] %vm7_vm0, %v469_v58  }
  0xf0   :  { %v477_v59 = vpop.permute.xlu0 %476  }
  0xf1   :  { %v485_v60 = vpop.permute.xlu1 %484   ;;  %632 = vst.msk [vmem:[%s1294_s1 + $0x3b] sm:$0x1] %vm7_vm0, %v477_v59   ;;  %633 = vst.msk [vmem:[%s1294_s1 + $0x7a] sm:$0x2] %vm7_vm0, %v477_v59  }
  0xf2   :  { %634 = vst.msk [vmem:[%s1294_s1 + $0x3c] sm:$0x1] %vm7_vm0, %v485_v60   ;;  %635 = vst.msk [vmem:[%s1294_s1 + $0x7b] sm:$0x2] %vm7_vm0, %v485_v60  }
  0xf4   :  { %v493_v61 = vpop.permute.xlu0 %492  }
  0xf5   :  { %v501_v62 = vpop.permute.xlu1 %500   ;;  %636 = vst.msk [vmem:[%s1294_s1 + $0x3d] sm:$0x1] %vm7_vm0, %v493_v61   ;;  %637 = vst.msk [vmem:[%s1294_s1 + $0x7c] sm:$0x2] %vm7_vm0, %v493_v61  }
  0xf6   :  { %638 = vst.msk [vmem:[%s1294_s1 + $0x3e] sm:$0x1] %vm7_vm0, %v501_v62   ;;  %639 = vst.msk [vmem:[%s1294_s1 + $0x7d] sm:$0x2] %vm7_vm0, %v501_v62  }
  0xf8   :  { %v509_v63 = vpop.permute.xlu0 %508  }
  0xf9   :  { %640 = vst.msk [vmem:[%s1294_s1 + $0x3f] sm:$0x1] %vm7_vm0, %v509_v63   ;;  %641 = vst.msk [vmem:[%s1294_s1 + $0x7e] sm:$0x2] %vm7_vm0, %v509_v63  }

// kernel: tile.34
= control target key start
LH: loop header
LB: loop body
LE: loop exit
PB: predicated region body
PF: predicated region fallthrough
CT: control target
= control target key end

     0   :  { %s46_s0 = inlined_call_operand.vmem [shape: f32[320], index: 0, kind: input, shape index: {}]   ;;  %s47_s1 = inlined_call_operand.vmem [shape: f32[2,320], index: 1, kind: output, shape index: {}]  }
   0x1   :  { %v4_v0 = vld [vmem:[%s46_s0] ss:$0 sm:$0xff]  ;;  %v14_v1 = vld [vmem:[%s46_s0 + $0x1] ss:$0 sm:$0xff]  ;;  %v16_v2 = vld [vmem:[%s46_s0 + $0x2] ss:$0 sm:$0xff] }
   0x2   :  { %5 = vst [vmem:[%s47_s1] sm:$0x3] %v4_v0  ;;  %15 = vst [vmem:[%s47_s1 + $0x2] sm:$0x3] %v14_v1 }
   0x3   :  { %17 = vst [vmem:[%s47_s1 + $0x4] sm:$0x3] %v16_v2 }

// kernel: tile.3
= control target key start
LH: loop header
LB: loop body
LE: loop exit
PB: predicated region body
PF: predicated region fallthrough
CT: control target
= control target key end

     0   :  { %vm37_vm0 = vcmask 1045508   ;;  %s2832_s12 = smov 125   ;;  %s2833_s13 = smov 126   ;;  %vm16_vm1 = vcmask 7168   ;;  %s5731_s0 = inlined_call_operand.vmem [shape: f32[2,320], index: 0, kind: input, shape index: {}]   ;;  %s5732_s1 = inlined_call_operand.vmem [shape: f32[640,1], index: 1, kind: output, shape index: {}]  }
   0x1   :  { %v2063_v0 = vld [vmem:[%s5731_s0 + $0x4] sm:$0x3]  ;;  %v2064_v1 = vld [vmem:[%s5731_s0 + $0x2] sm:$0x3]  ;;  %v13_v2 = vld [vmem:[%s5731_s0] sm:$0x3] }
   0x2   :  { %8 = vst [vmem:[#allocation0 + $0x10] sm:$0x3] %v2063_v0  ;;  %12 = vst [vmem:[#allocation0 + $0x8] sm:$0x3] %v2064_v1  ;;  %s2831_s0 = smov 127   ;;  %s2834_s14 = smov 124  }
   0x3   :  { %14 = vst [vmem:[#allocation0] sm:$0x3] %v13_v2  ;;  %s2835_s15 = smov 123   ;;  %s2836_s16 = smov 122  }
   0x4   :  { %s2837_s17 = smov 121   ;;  %s2838_s18 = smov 120  }
   0x5   :  { %s2839_s19 = smov 119   ;;  %s2840_s20 = smov 118  }
   0x6   :  { %s2841_s21 = smov 117   ;;  %s2842_s22 = smov 116  }
   0x7   :  { %s2843_s23 = smov 115   ;;  %s2844_s24 = smov 114  }
   0x8   :  { %s2845_s25 = smov 113   ;;  %s2846_s26 = smov 112  }
   0x9   :  { %v36_v4 = vld [vmem:[#allocation0 + $0xc] sm:$0x30]   ;;  %s2847_s27 = smov 111   ;;  %s2848_s28 = smov 110  }
   0xa   :  { %v2977_v3 = vld.sshfl [vmem:[#allocation0] sm:$0xff pattern:$0x99999810]   ;;  %v76_v6 = vld [vmem:[#allocation0 + $0xc] sm:$0x30]   ;;  %s2849_s29 = smov 109  }
   0xb   :  { %v38_v5 = vsel %vm37_vm0, %v36_v4, %v2977_v3  ;;  %v56_v7 = vld [vmem:[#allocation0 + $0xc] sm:$0x30]   ;;  %v78_v9 = vsel %vm37_vm0, %v76_v6, %v2977_v3  ;;  %s2850_s30 = smov 108   ;;  %s2851_s2 = smov 107  }
   0xc   :  { %v96_v8 = vld [vmem:[#allocation0 + $0xc] sm:$0x30]   ;;  %39 = vrot.lane.b32.xlu0 %v38_v5, %s2831_s0  ;;  %79 = vrot.lane.b32.xlu1 %v78_v9, %s2832_s12  ;;  %v58_v10 = vsel %vm37_vm0, %v56_v7, %v2977_v3  ;;  %s2852_s3 = smov 106   ;;  %s2853_s4 = smov 105  }
   0xd   :  { %v98_v11 = vsel %vm37_vm0, %v96_v8, %v2977_v3  ;;  %v116_v12 = vld [vmem:[#allocation0 + $0xc] sm:$0x30]   ;;  %s2854_s5 = smov 104   ;;  %s2855_s6 = smov 103  }
   0xe   :  { %v136_v13 = vld [vmem:[#allocation0 + $0xc] sm:$0x30]   ;;  %v118_v14 = vsel %vm37_vm0, %v116_v12, %v2977_v3  ;;  %s2856_s7 = smov 102   ;;  %s2857_s8 = smov 101  }
   0xf   :  { %v138_v15 = vsel %vm37_vm0, %v136_v13, %v2977_v3  ;;  %v156_v16 = vld [vmem:[#allocation0 + $0xc] sm:$0x30]   ;;  %s2858_s9 = smov 100   ;;  %s2859_s10 = smov 99  }
  0x10   :  { %59 = vrot.lane.b32.xlu0 %v58_v10, %s2833_s13  ;;  %99 = vrot.lane.b32.xlu1 %v98_v11, %s2834_s14  ;;  %v176_v17 = vld [vmem:[#allocation0 + $0xc] sm:$0x30]   ;;  %v158_v18 = vsel %vm37_vm0, %v156_v16, %v2977_v3  ;;  %s2860_s11 = smov 98   ;;  %s2861_s0 = smov 97  }
  0x11   :  { %v178_v19 = vsel %vm37_vm0, %v176_v17, %v2977_v3  ;;  %v196_v20 = vld [vmem:[#allocation0 + $0xc] sm:$0x30]   ;;  %s2862_s12 = smov 96   ;;  %s2863_s13 = smov 95  }
  0x12   :  { %v216_v21 = vld [vmem:[#allocation0 + $0xc] sm:$0x30]   ;;  %v198_v22 = vsel %vm37_vm0, %v196_v20, %v2977_v3  ;;  %s2864_s14 = smov 94  }
  0x13   :  { %v218_v23 = vsel %vm37_vm0, %v216_v21, %v2977_v3  ;;  %v236_v24 = vld [vmem:[#allocation0 + $0xc] sm:$0x30]  }
  0x14   :  { %119 = vrot.lane.b32.xlu0 %v118_v14, %s2835_s15  ;;  %139 = vrot.lane.b32.xlu1 %v138_v15, %s2836_s16  ;;  %v256_v25 = vld [vmem:[#allocation0 + $0xc] sm:$0x30]   ;;  %v238_v26 = vsel %vm37_vm0, %v236_v24, %v2977_v3  ;;  %s2865_s15 = smov 93   ;;  %s2866_s16 = smov 92  }
  0x15   :  { %v258_v27 = vsel %vm37_vm0, %v256_v25, %v2977_v3  ;;  %v276_v28 = vld [vmem:[#allocation0 + $0xc] sm:$0x30]  }
  0x16   :  { %v296_v29 = vld [vmem:[#allocation0 + $0xc] sm:$0x30]   ;;  %v278_v30 = vsel %vm37_vm0, %v276_v28, %v2977_v3 }
  0x17   :  { %v298_v31 = vsel %vm37_vm0, %v296_v29, %v2977_v3  ;;  %v316_v32 = vld [vmem:[#allocation0 + $0xc] sm:$0x30]  }
  0x18   :  { %159 = vrot.lane.b32.xlu0 %v158_v18, %s2837_s17  ;;  %179 = vrot.lane.b32.xlu1 %v178_v19, %s2838_s18  ;;  %v336_v33 = vld [vmem:[#allocation0 + $0xc] sm:$0x30]   ;;  %v318_v34 = vsel %vm37_vm0, %v316_v32, %v2977_v3  ;;  %s2867_s17 = smov 91   ;;  %s2868_s18 = smov 90  }
  0x19   :  { %v338_v35 = vsel %vm37_vm0, %v336_v33, %v2977_v3  ;;  %v356_v36 = vld [vmem:[#allocation0 + $0xc] sm:$0x30]  }
  0x1a   :  { %v376_v37 = vld [vmem:[#allocation0 + $0xc] sm:$0x30]   ;;  %v358_v38 = vsel %vm37_vm0, %v356_v36, %v2977_v3 }
  0x1b   :  { %v378_v39 = vsel %vm37_vm0, %v376_v37, %v2977_v3  ;;  %v396_v40 = vld [vmem:[#allocation0 + $0xc] sm:$0x30]  }
  0x1c   :  { %199 = vrot.lane.b32.xlu0 %v198_v22, %s2839_s19  ;;  %219 = vrot.lane.b32.xlu1 %v218_v23, %s2840_s20  ;;  %v416_v41 = vld [vmem:[#allocation0 + $0xc] sm:$0x30]   ;;  %v398_v42 = vsel %vm37_vm0, %v396_v40, %v2977_v3  ;;  %s2869_s19 = smov 89   ;;  %s2870_s20 = smov 88  }
  0x1d   :  { %v418_v43 = vsel %vm37_vm0, %v416_v41, %v2977_v3  ;;  %v436_v44 = vld [vmem:[#allocation0 + $0xc] sm:$0x30]  }
  0x1e   :  { %v456_v45 = vld [vmem:[#allocation0 + $0xc] sm:$0x30]   ;;  %v438_v46 = vsel %vm37_vm0, %v436_v44, %v2977_v3 }
  0x1f   :  { %v458_v47 = vsel %vm37_vm0, %v456_v45, %v2977_v3  ;;  %v476_v48 = vld [vmem:[#allocation0 + $0xc] sm:$0x30]  }
  0x20   :  { %239 = vrot.lane.b32.xlu0 %v238_v26, %s2841_s21  ;;  %259 = vrot.lane.b32.xlu1 %v258_v27, %s2842_s22  ;;  %v496_v49 = vld [vmem:[#allocation0 + $0xc] sm:$0x30]   ;;  %v478_v50 = vsel %vm37_vm0, %v476_v48, %v2977_v3  ;;  %s2871_s21 = smov 87   ;;  %s2872_s22 = smov 86  }
  0x21   :  { %v498_v51 = vsel %vm37_vm0, %v496_v49, %v2977_v3  ;;  %v516_v52 = vld [vmem:[#allocation0 + $0xc] sm:$0x30]  }
  0x22   :  { %v536_v53 = vld [vmem:[#allocation0 + $0xc] sm:$0x30]   ;;  %v518_v54 = vsel %vm37_vm0, %v516_v52, %v2977_v3 }
  0x23   :  { %v538_v55 = vsel %vm37_vm0, %v536_v53, %v2977_v3  ;;  %v556_v56 = vld [vmem:[#allocation0 + $0xc] sm:$0x30]  }
  0x24   :  { %279 = vrot.lane.b32.xlu0 %v278_v30, %s2843_s23  ;;  %299 = vrot.lane.b32.xlu1 %v298_v31, %s2844_s24  ;;  %v576_v57 = vld [vmem:[#allocation0 + $0xc] sm:$0x30]   ;;  %v558_v58 = vsel %vm37_vm0, %v556_v56, %v2977_v3  ;;  %s2873_s23 = smov 85   ;;  %s2874_s24 = smov 84  }
  0x25   :  { %v578_v59 = vsel %vm37_vm0, %v576_v57, %v2977_v3  ;;  %v596_v60 = vld [vmem:[#allocation0 + $0xc] sm:$0x30]  }
  0x26   :  { %v616_v61 = vld [vmem:[#allocation0 + $0xc] sm:$0x30]   ;;  %v598_v62 = vsel %vm37_vm0, %v596_v60, %v2977_v3 }
  0x27   :  { %v618_v63 = vsel %vm37_vm0, %v616_v61, %v2977_v3  ;;  %v636_v0 = vld [vmem:[#allocation0 + $0xc] sm:$0x30]  }
  0x28   :  { %319 = vrot.lane.b32.xlu0 %v318_v34, %s2845_s25  ;;  %339 = vrot.lane.b32.xlu1 %v338_v35, %s2846_s26  ;;  %v656_v1 = vld [vmem:[#allocation0 + $0xc] sm:$0x30]   ;;  %v638_v2 = vsel %vm37_vm0, %v636_v0, %v2977_v3  ;;  %s2875_s25 = smov 83   ;;  %s2876_s26 = smov 82  }
  0x29   :  { %v658_v4 = vsel %vm37_vm0, %v656_v1, %v2977_v3  ;;  %v676_v5 = vld [vmem:[#allocation0 + $0xc] sm:$0x30]  }
  0x2a   :  { %v696_v6 = vld [vmem:[#allocation0 + $0xc] sm:$0x30]   ;;  %v678_v7 = vsel %vm37_vm0, %v676_v5, %v2977_v3 }
  0x2b   :  { %v698_v8 = vsel %vm37_vm0, %v696_v6, %v2977_v3  ;;  %v716_v9 = vld [vmem:[#allocation0 + $0xc] sm:$0x30]  }
  0x2c   :  { %359 = vrot.lane.b32.xlu0 %v358_v38, %s2847_s27  ;;  %379 = vrot.lane.b32.xlu1 %v378_v39, %s2848_s28  ;;  %v736_v10 = vld [vmem:[#allocation0 + $0xc] sm:$0x30]   ;;  %v718_v11 = vsel %vm37_vm0, %v716_v9, %v2977_v3  ;;  %s2877_s27 = smov 81   ;;  %s2878_s28 = smov 80  }
  0x2d   :  { %v738_v12 = vsel %vm37_vm0, %v736_v10, %v2977_v3  ;;  %v756_v13 = vld [vmem:[#allocation0 + $0xc] sm:$0x30]  }
  0x2e   :  { %v776_v14 = vld [vmem:[#allocation0 + $0xc] sm:$0x30]   ;;  %v758_v15 = vsel %vm37_vm0, %v756_v13, %v2977_v3 }
  0x2f   :  { %v778_v16 = vsel %vm37_vm0, %v776_v14, %v2977_v3  ;;  %v796_v17 = vld [vmem:[#allocation0 + $0xc] sm:$0x30]  }
  0x30   :  { %399 = vrot.lane.b32.xlu0 %v398_v42, %s2849_s29  ;;  %419 = vrot.lane.b32.xlu1 %v418_v43, %s2850_s30  ;;  %v816_v18 = vld [vmem:[#allocation0 + $0xc] sm:$0x30]   ;;  %v798_v19 = vsel %vm37_vm0, %v796_v17, %v2977_v3  ;;  %s2879_s29 = smov 79   ;;  %s2880_s30 = smov 78  }
  0x31   :  { %v818_v20 = vsel %vm37_vm0, %v816_v18, %v2977_v3  ;;  %v836_v21 = vld [vmem:[#allocation0 + $0xc] sm:$0x30]  }
  0x32   :  { %v856_v22 = vld [vmem:[#allocation0 + $0xc] sm:$0x30]   ;;  %v838_v23 = vsel %vm37_vm0, %v836_v21, %v2977_v3 }
  0x33   :  { %v858_v24 = vsel %vm37_vm0, %v856_v22, %v2977_v3  ;;  %v876_v25 = vld [vmem:[#allocation0 + $0xc] sm:$0x30]  }
  0x34   :  { %439 = vrot.lane.b32.xlu0 %v438_v46, %s2851_s2  ;;  %459 = vrot.lane.b32.xlu1 %v458_v47, %s2852_s3  ;;  %v896_v26 = vld [vmem:[#allocation0 + $0xc] sm:$0x30]   ;;  %v878_v27 = vsel %vm37_vm0, %v876_v25, %v2977_v3  ;;  %s2881_s2 = smov 77   ;;  %s2882_s3 = smov 76  }
  0x35   :  { %v898_v28 = vsel %vm37_vm0, %v896_v26, %v2977_v3  ;;  %v916_v29 = vld [vmem:[#allocation0 + $0xc] sm:$0x30]   ;;  %v3600_v25 = vld.sshfl [vmem:[#allocation0] sm:$0xff pattern:$0x99999810]  }
  0x36   :  { %v936_v30 = vld [vmem:[#allocation0 + $0xc] sm:$0x30]   ;;  %v918_v31 = vsel %vm37_vm0, %v916_v29, %v2977_v3 }
  0x37   :  { %v938_v32 = vsel %vm37_vm0, %v936_v30, %v2977_v3  ;;  %v956_v33 = vld [vmem:[#allocation0 + $0xc] sm:$0x30]  }
  0x38   :  { %479 = vrot.lane.b32.xlu0 %v478_v50, %s2853_s4  ;;  %499 = vrot.lane.b32.xlu1 %v498_v51, %s2854_s5  ;;  %v976_v34 = vld [vmem:[#allocation0 + $0xc] sm:$0x30]   ;;  %v958_v35 = vsel %vm37_vm0, %v956_v33, %v2977_v3  ;;  %s2883_s4 = smov 75   ;;  %s2884_s5 = smov 74  }
  0x39   :  { %v978_v36 = vsel %vm37_vm0, %v976_v34, %v2977_v3  ;;  %v996_v37 = vld [vmem:[#allocation0 + $0xc] sm:$0x30]  }
  0x3a   :  { %v1016_v38 = vld [vmem:[#allocation0 + $0xc] sm:$0x30]   ;;  %v998_v39 = vsel %vm37_vm0, %v996_v37, %v2977_v3 }
  0x3b   :  { %v1018_v40 = vsel %vm37_vm0, %v1016_v38, %v2977_v3  ;;  %v1036_v41 = vld [vmem:[#allocation0 + $0xc] sm:$0x30]  }
  0x3c   :  { %519 = vrot.lane.b32.xlu0 %v518_v54, %s2855_s6  ;;  %539 = vrot.lane.b32.xlu1 %v538_v55, %s2856_s7  ;;  %v1056_v42 = vld [vmem:[#allocation0 + $0xc] sm:$0x30]   ;;  %v1038_v43 = vsel %vm37_vm0, %v1036_v41, %v2977_v3  ;;  %s2885_s6 = smov 73   ;;  %s2886_s7 = smov 72  }
  0x3d   :  { %v1058_v44 = vsel %vm37_vm0, %v1056_v42, %v2977_v3  ;;  %v1076_v45 = vld [vmem:[#allocation0 + $0xc] sm:$0x30]  }
  0x3e   :  { %v1096_v46 = vld [vmem:[#allocation0 + $0xc] sm:$0x30]   ;;  %v1078_v47 = vsel %vm37_vm0, %v1076_v45, %v2977_v3 }
  0x3f   :  { %v1098_v48 = vsel %vm37_vm0, %v1096_v46, %v2977_v3  ;;  %v1116_v49 = vld [vmem:[#allocation0 + $0xc] sm:$0x30]  }
  0x40   :  { %559 = vrot.lane.b32.xlu0 %v558_v58, %s2857_s8  ;;  %579 = vrot.lane.b32.xlu1 %v578_v59, %s2858_s9  ;;  %v1136_v50 = vld [vmem:[#allocation0 + $0xc] sm:$0x30]   ;;  %v1118_v51 = vsel %vm37_vm0, %v1116_v49, %v2977_v3  ;;  %s2887_s8 = smov 71   ;;  %s2888_s9 = smov 70  }
  0x41   :  { %v1138_v52 = vsel %vm37_vm0, %v1136_v50, %v2977_v3  ;;  %v1156_v53 = vld [vmem:[#allocation0 + $0xc] sm:$0x30]  }
  0x42   :  { %v1176_v54 = vld [vmem:[#allocation0 + $0xc] sm:$0x30]   ;;  %v1158_v55 = vsel %vm37_vm0, %v1156_v53, %v2977_v3 }
  0x43   :  { %v1178_v56 = vsel %vm37_vm0, %v1176_v54, %v2977_v3  ;;  %v1196_v57 = vld [vmem:[#allocation0 + $0xc] sm:$0x30]  }
  0x44   :  { %599 = vrot.lane.b32.xlu0 %v598_v62, %s2859_s10  ;;  %619 = vrot.lane.b32.xlu1 %v618_v63, %s2860_s11  ;;  %v1216_v58 = vld [vmem:[#allocation0 + $0xc] sm:$0x30]   ;;  %v1198_v59 = vsel %vm37_vm0, %v1196_v57, %v2977_v3  ;;  %s2895_s10 = smov 63   ;;  %s2902_s11 = smov 56  }
  0x45   :  { %v1218_v61 = vsel %vm37_vm0, %v1216_v58, %v2977_v3  ;;  %v1236_v62 = vld [vmem:[#allocation0 + $0xc] sm:$0x30]  }
  0x46   :  { %v1256_v0 = vld [vmem:[#allocation0 + $0xc] sm:$0x30]   ;;  %v1238_v1 = vsel %vm37_vm0, %v1236_v62, %v2977_v3 }
  0x47   :  { %v1276_v5 = vld [vmem:[#allocation0 + $0xc] sm:$0x30]  }
  0x48   :  { %639 = vrot.lane.b32.xlu0 %v638_v2, %s2861_s0  ;;  %659 = vrot.lane.b32.xlu1 %v658_v4, %s2862_s12  ;;  %v1258_v4 = vsel %vm37_vm0, %v1256_v0, %v2977_v3  ;;  %s2909_s0 = smov 49   ;;  %s2916_s12 = smov 42  }
  0x4c   :  { %679 = vrot.lane.b32.xlu0 %v678_v7, %s2863_s13  ;;  %699 = vrot.lane.b32.xlu1 %v698_v8, %s2864_s14  ;;  %v1278_v7 = vsel %vm37_vm0, %v1276_v5, %v2977_v3  ;;  %s2893_s13 = smov 65   ;;  %s2900_s14 = smov 58   ;;  %v21_v5 = vld [vmem:[#allocation0 + $0x8] sm:$0x3]  }
  0x4d   :  { %2066 = vst.msk [vmem:[%s5732_s1 + $0x80] sm:$0x1] %vm16_vm1, %v21_v5   ;;  %2067 = vst.msk [vmem:[%s5732_s1 + $0x1bf] sm:$0x2] %vm16_vm1, %v21_v5  }
  0x50   :  { %719 = vrot.lane.b32.xlu0 %v718_v11, %s2865_s15  ;;  %739 = vrot.lane.b32.xlu1 %v738_v12, %s2866_s16  ;;  %s2907_s15 = smov 51   ;;  %s2914_s16 = smov 44  }
  0x54   :  { %759 = vrot.lane.b32.xlu0 %v758_v15, %s2867_s17  ;;  %779 = vrot.lane.b32.xlu1 %v778_v16, %s2868_s18  ;;  %s2891_s17 = smov 67   ;;  %s2898_s18 = smov 60  }
  0x58   :  { %799 = vrot.lane.b32.xlu0 %v798_v19, %s2869_s19  ;;  %819 = vrot.lane.b32.xlu1 %v818_v20, %s2870_s20  ;;  %s2905_s19 = smov 53   ;;  %s2912_s20 = smov 46  }
  0x5c   :  { %839 = vrot.lane.b32.xlu0 %v838_v23, %s2871_s21  ;;  %859 = vrot.lane.b32.xlu1 %v858_v24, %s2872_s22  ;;  %s2889_s21 = smov 69   ;;  %s2896_s22 = smov 62  }
  0x60   :  { %879 = vrot.lane.b32.xlu0 %v878_v27, %s2873_s23  ;;  %899 = vrot.lane.b32.xlu1 %v898_v28, %s2874_s24  ;;  %s2903_s23 = smov 55   ;;  %s2910_s24 = smov 48  }
  0x64   :  { %919 = vrot.lane.b32.xlu0 %v918_v31, %s2875_s25  ;;  %939 = vrot.lane.b32.xlu1 %v938_v32, %s2876_s26  ;;  %s2894_s26 = smov 64   ;;  %s2917_s25 = smov 41  }
  0x68   :  { %959 = vrot.lane.b32.xlu0 %v958_v35, %s2877_s27  ;;  %979 = vrot.lane.b32.xlu1 %v978_v36, %s2878_s28  ;;  %s2901_s27 = smov 57   ;;  %s2908_s28 = smov 50  }
  0x6c   :  { %999 = vrot.lane.b32.xlu0 %v998_v39, %s2879_s29  ;;  %1019 = vrot.lane.b32.xlu1 %v1018_v40, %s2880_s30  ;;  %s2892_s30 = smov 66   ;;  %s2915_s29 = smov 43  }
  0x70   :  { %1039 = vrot.lane.b32.xlu0 %v1038_v43, %s2881_s2  ;;  %1059 = vrot.lane.b32.xlu1 %v1058_v44, %s2882_s3  ;;  %s2899_s2 = smov 59   ;;  %s2906_s3 = smov 52  }
  0x74   :  { %1079 = vrot.lane.b32.xlu0 %v1078_v47, %s2883_s4  ;;  %1099 = vrot.lane.b32.xlu1 %v1098_v48, %s2884_s5  ;;  %s2890_s5 = smov 68   ;;  %s2913_s4 = smov 45  }
  0x78   :  { %1119 = vrot.lane.b32.xlu0 %v1118_v51, %s2885_s6  ;;  %1139 = vrot.lane.b32.xlu1 %v1138_v52, %s2886_s7  ;;  %s2897_s6 = smov 61   ;;  %s2904_s7 = smov 54  }
  0x7c   :  { %1159 = vrot.lane.b32.xlu0 %v1158_v55, %s2887_s8  ;;  %1179 = vrot.lane.b32.xlu1 %v1178_v56, %s2888_s9  ;;  %s2911_s8 = smov 47   ;;  %s2918_s9 = smov 40  }
  0x7e   :  { %v40_v60 = vpop.permute.xlu0 %39   ;;  %v80_v63 = vpop.permute.xlu1 %79  }
  0x7f   :  { %2070 = vst.msk [vmem:[%s5732_s1 + $0x1] sm:$0x1] %vm16_vm1, %v40_v60   ;;  %2071 = vst.msk [vmem:[%s5732_s1 + $0x140] sm:$0x2] %vm16_vm1, %v40_v60  }
  0x80   :  { %2072 = vst.msk [vmem:[%s5732_s1 + $0x7f] sm:$0x4] %vm16_vm1, %v40_v60   ;;  %2073 = vst.msk [vmem:[%s5732_s1 + $0x1be] sm:$0x8] %vm16_vm1, %v40_v60   ;;  %1199 = vrot.lane.b32.xlu0 %v1198_v59, %s2889_s21  ;;  %1219 = vrot.lane.b32.xlu1 %v1218_v61, %s2890_s5  ;;  %s2919_s21 = smov 39   ;;  %s2920_s5 = smov 38  }
  0x81   :  { %2074 = vst.msk [vmem:[%s5732_s1 + $0xfd] sm:$0x10] %vm16_vm1, %v40_v60   ;;  %2075 = vst.msk [vmem:[%s5732_s1 + $0x23c] sm:$0x20] %vm16_vm1, %v40_v60  }
  0x82   :  { %2082 = vst.msk [vmem:[%s5732_s1 + $0x3] sm:$0x1] %vm16_vm1, %v80_v63   ;;  %2083 = vst.msk [vmem:[%s5732_s1 + $0x142] sm:$0x2] %vm16_vm1, %v80_v63   ;;  %v60_v2 = vpop.permute.xlu0 %59   ;;  %v100_v6 = vpop.permute.xlu1 %99  }
  0x83   :  { %2084 = vst.msk [vmem:[%s5732_s1 + $0x81] sm:$0x4] %vm16_vm1, %v80_v63   ;;  %2085 = vst.msk [vmem:[%s5732_s1 + $0x1c0] sm:$0x8] %vm16_vm1, %v80_v63  }
  0x84   :  { %2086 = vst.msk [vmem:[%s5732_s1 + $0xff] sm:$0x10] %vm16_vm1, %v80_v63   ;;  %2087 = vst.msk [vmem:[%s5732_s1 + $0x23e] sm:$0x20] %vm16_vm1, %v80_v63   ;;  %1239 = vrot.lane.b32.xlu0 %v1238_v1, %s2891_s17  ;;  %1259 = vrot.lane.b32.xlu1 %v1258_v4, %s2892_s30  ;;  %s2921_s17 = smov 37   ;;  %s2922_s30 = smov 36  }
  0x85   :  { %2076 = vst.msk [vmem:[%s5732_s1 + $0x2] sm:$0x1] %vm16_vm1, %v60_v2   ;;  %2077 = vst.msk [vmem:[%s5732_s1 + $0x141] sm:$0x2] %vm16_vm1, %v60_v2   ;;  %v15_v4 = vld [vmem:[#allocation0] sm:$0x3]  }
  0x86   :  { %2078 = vst.msk [vmem:[%s5732_s1 + $0x80] sm:$0x4] %vm16_vm1, %v60_v2   ;;  %2079 = vst.msk [vmem:[%s5732_s1 + $0x1bf] sm:$0x8] %vm16_vm1, %v60_v2   ;;  %v120_v8 = vpop.permute.xlu0 %119   ;;  %v140_v9 = vpop.permute.xlu1 %139  }
  0x87   :  { %2080 = vst.msk [vmem:[%s5732_s1 + $0xfe] sm:$0x10] %vm16_vm1, %v60_v2   ;;  %2081 = vst.msk [vmem:[%s5732_s1 + $0x23d] sm:$0x20] %vm16_vm1, %v60_v2  }
  0x88   :  { %2088 = vst.msk [vmem:[%s5732_s1 + $0x4] sm:$0x1] %vm16_vm1, %v100_v6   ;;  %2089 = vst.msk [vmem:[%s5732_s1 + $0x143] sm:$0x2] %vm16_vm1, %v100_v6   ;;  %1279 = vrot.lane.b32.xlu0 %v1278_v7, %s2893_s13  ;;  %1295 = vrot.lane.b32.xlu1 %v2977_v3, %s2894_s26  ;;  %s2923_s13 = smov 35   ;;  %s2924_s26 = smov 34  }
  0x89   :  { %2090 = vst.msk [vmem:[%s5732_s1 + $0x82] sm:$0x4] %vm16_vm1, %v100_v6   ;;  %2091 = vst.msk [vmem:[%s5732_s1 + $0x1c1] sm:$0x8] %vm16_vm1, %v100_v6  }
  0x8a   :  { %2092 = vst.msk [vmem:[%s5732_s1 + $0x100] sm:$0x10] %vm16_vm1, %v100_v6   ;;  %2093 = vst.msk [vmem:[%s5732_s1 + $0x23f] sm:$0x20] %vm16_vm1, %v100_v6   ;;  %v160_v10 = vpop.permute.xlu0 %159   ;;  %v180_v11 = vpop.permute.xlu1 %179   ;;  %v28_v6 = vld [vmem:[#allocation0 + $0x10] sm:$0x3]  }
  0x8b   :  { %2094 = vst.msk [vmem:[%s5732_s1 + $0x5] sm:$0x1] %vm16_vm1, %v120_v8   ;;  %2095 = vst.msk [vmem:[%s5732_s1 + $0x144] sm:$0x2] %vm16_vm1, %v120_v8  }
  0x8c   :  { %2096 = vst.msk [vmem:[%s5732_s1 + $0x83] sm:$0x4] %vm16_vm1, %v120_v8   ;;  %2097 = vst.msk [vmem:[%s5732_s1 + $0x1c2] sm:$0x8] %vm16_vm1, %v120_v8   ;;  %1307 = vrot.lane.b32.xlu0 %v2977_v3, %s2895_s10  ;;  %1319 = vrot.lane.b32.xlu1 %v2977_v3, %s2896_s22  ;;  %s2925_s10 = smov 33   ;;  %s2926_s22 = smov 32  }
  0x8d   :  { %2098 = vst.msk [vmem:[%s5732_s1 + $0x101] sm:$0x10] %vm16_vm1, %v120_v8   ;;  %2099 = vst.msk [vmem:[%s5732_s1 + $0x240] sm:$0x20] %vm16_vm1, %v120_v8  }
  0x8e   :  { %2100 = vst.msk [vmem:[%s5732_s1 + $0x6] sm:$0x1] %vm16_vm1, %v140_v9   ;;  %2101 = vst.msk [vmem:[%s5732_s1 + $0x145] sm:$0x2] %vm16_vm1, %v140_v9   ;;  %v200_v12 = vpop.permute.xlu0 %199   ;;  %v220_v13 = vpop.permute.xlu1 %219  }
  0x8f   :  { %2102 = vst.msk [vmem:[%s5732_s1 + $0x84] sm:$0x4] %vm16_vm1, %v140_v9   ;;  %2103 = vst.msk [vmem:[%s5732_s1 + $0x1c3] sm:$0x8] %vm16_vm1, %v140_v9  }
  0x90   :  { %2104 = vst.msk [vmem:[%s5732_s1 + $0x102] sm:$0x10] %vm16_vm1, %v140_v9   ;;  %2105 = vst.msk [vmem:[%s5732_s1 + $0x241] sm:$0x20] %vm16_vm1, %v140_v9   ;;  %1331 = vrot.lane.b32.xlu0 %v2977_v3, %s2897_s6  ;;  %1343 = vrot.lane.b32.xlu1 %v2977_v3, %s2898_s18  ;;  %s2927_s6 = smov 31   ;;  %s2928_s18 = smov 30  }
  0x91   :  { %2106 = vst.msk [vmem:[%s5732_s1 + $0x7] sm:$0x1] %vm16_vm1, %v160_v10   ;;  %2107 = vst.msk [vmem:[%s5732_s1 + $0x146] sm:$0x2] %vm16_vm1, %v160_v10  }
  0x92   :  { %2108 = vst.msk [vmem:[%s5732_s1 + $0x85] sm:$0x4] %vm16_vm1, %v160_v10   ;;  %2109 = vst.msk [vmem:[%s5732_s1 + $0x1c4] sm:$0x8] %vm16_vm1, %v160_v10   ;;  %v240_v14 = vpop.permute.xlu0 %239   ;;  %v260_v15 = vpop.permute.xlu1 %259  }
  0x93   :  { %2110 = vst.msk [vmem:[%s5732_s1 + $0x103] sm:$0x10] %vm16_vm1, %v160_v10   ;;  %2111 = vst.msk [vmem:[%s5732_s1 + $0x242] sm:$0x20] %vm16_vm1, %v160_v10  }
  0x94   :  { %2112 = vst.msk [vmem:[%s5732_s1 + $0x8] sm:$0x1] %vm16_vm1, %v180_v11   ;;  %2113 = vst.msk [vmem:[%s5732_s1 + $0x147] sm:$0x2] %vm16_vm1, %v180_v11   ;;  %1355 = vrot.lane.b32.xlu0 %v2977_v3, %s2899_s2  ;;  %1367 = vrot.lane.b32.xlu1 %v2977_v3, %s2900_s14  ;;  %s2929_s2 = smov 29   ;;  %s2930_s14 = smov 28  }
  0x95   :  { %2114 = vst.msk [vmem:[%s5732_s1 + $0x86] sm:$0x4] %vm16_vm1, %v180_v11   ;;  %2115 = vst.msk [vmem:[%s5732_s1 + $0x1c5] sm:$0x8] %vm16_vm1, %v180_v11  }
  0x96   :  { %2116 = vst.msk [vmem:[%s5732_s1 + $0x104] sm:$0x10] %vm16_vm1, %v180_v11   ;;  %2117 = vst.msk [vmem:[%s5732_s1 + $0x243] sm:$0x20] %vm16_vm1, %v180_v11   ;;  %v280_v16 = vpop.permute.xlu0 %279   ;;  %v300_v17 = vpop.permute.xlu1 %299  }
  0x97   :  { %2118 = vst.msk [vmem:[%s5732_s1 + $0x9] sm:$0x1] %vm16_vm1, %v200_v12   ;;  %2119 = vst.msk [vmem:[%s5732_s1 + $0x148] sm:$0x2] %vm16_vm1, %v200_v12  }
  0x98   :  { %2120 = vst.msk [vmem:[%s5732_s1 + $0x87] sm:$0x4] %vm16_vm1, %v200_v12   ;;  %2121 = vst.msk [vmem:[%s5732_s1 + $0x1c6] sm:$0x8] %vm16_vm1, %v200_v12   ;;  %1379 = vrot.lane.b32.xlu0 %v2977_v3, %s2901_s27  ;;  %1391 = vrot.lane.b32.xlu1 %v2977_v3, %s2902_s11  ;;  %s2931_s27 = smov 27   ;;  %s2932_s11 = smov 26  }
  0x99   :  { %2122 = vst.msk [vmem:[%s5732_s1 + $0x105] sm:$0x10] %vm16_vm1, %v200_v12   ;;  %2123 = vst.msk [vmem:[%s5732_s1 + $0x244] sm:$0x20] %vm16_vm1, %v200_v12  }
  0x9a   :  { %2124 = vst.msk [vmem:[%s5732_s1 + $0xa] sm:$0x1] %vm16_vm1, %v220_v13   ;;  %2125 = vst.msk [vmem:[%s5732_s1 + $0x149] sm:$0x2] %vm16_vm1, %v220_v13   ;;  %v320_v18 = vpop.permute.xlu0 %319   ;;  %v340_v19 = vpop.permute.xlu1 %339  }
  0x9b   :  { %2126 = vst.msk [vmem:[%s5732_s1 + $0x88] sm:$0x4] %vm16_vm1, %v220_v13   ;;  %2127 = vst.msk [vmem:[%s5732_s1 + $0x1c7] sm:$0x8] %vm16_vm1, %v220_v13  }
  0x9c   :  { %2128 = vst.msk [vmem:[%s5732_s1 + $0x106] sm:$0x10] %vm16_vm1, %v220_v13   ;;  %2129 = vst.msk [vmem:[%s5732_s1 + $0x245] sm:$0x20] %vm16_vm1, %v220_v13   ;;  %1403 = vrot.lane.b32.xlu0 %v2977_v3, %s2903_s23  ;;  %1415 = vrot.lane.b32.xlu1 %v2977_v3, %s2904_s7  ;;  %s2933_s23 = smov 25   ;;  %s2934_s7 = smov 24  }
  0x9d   :  { %2130 = vst.msk [vmem:[%s5732_s1 + $0xb] sm:$0x1] %vm16_vm1, %v240_v14   ;;  %2131 = vst.msk [vmem:[%s5732_s1 + $0x14a] sm:$0x2] %vm16_vm1, %v240_v14  }
  0x9e   :  { %2132 = vst.msk [vmem:[%s5732_s1 + $0x89] sm:$0x4] %vm16_vm1, %v240_v14   ;;  %2133 = vst.msk [vmem:[%s5732_s1 + $0x1c8] sm:$0x8] %vm16_vm1, %v240_v14   ;;  %v360_v20 = vpop.permute.xlu0 %359   ;;  %v380_v21 = vpop.permute.xlu1 %379  }
  0x9f   :  { %2134 = vst.msk [vmem:[%s5732_s1 + $0x107] sm:$0x10] %vm16_vm1, %v240_v14   ;;  %2135 = vst.msk [vmem:[%s5732_s1 + $0x246] sm:$0x20] %vm16_vm1, %v240_v14  }
  0xa0   :  { %2136 = vst.msk [vmem:[%s5732_s1 + $0xc] sm:$0x1] %vm16_vm1, %v260_v15   ;;  %2137 = vst.msk [vmem:[%s5732_s1 + $0x14b] sm:$0x2] %vm16_vm1, %v260_v15   ;;  %1427 = vrot.lane.b32.xlu0 %v2977_v3, %s2905_s19  ;;  %1439 = vrot.lane.b32.xlu1 %v2977_v3, %s2906_s3  ;;  %s2935_s19 = smov 23   ;;  %s2936_s3 = smov 22  }
  0xa1   :  { %2138 = vst.msk [vmem:[%s5732_s1 + $0x8a] sm:$0x4] %vm16_vm1, %v260_v15   ;;  %2139 = vst.msk [vmem:[%s5732_s1 + $0x1c9] sm:$0x8] %vm16_vm1, %v260_v15  }
  0xa2   :  { %2140 = vst.msk [vmem:[%s5732_s1 + $0x108] sm:$0x10] %vm16_vm1, %v260_v15   ;;  %2141 = vst.msk [vmem:[%s5732_s1 + $0x247] sm:$0x20] %vm16_vm1, %v260_v15   ;;  %v400_v22 = vpop.permute.xlu0 %399   ;;  %v420_v23 = vpop.permute.xlu1 %419  }
  0xa3   :  { %2142 = vst.msk [vmem:[%s5732_s1 + $0xd] sm:$0x1] %vm16_vm1, %v280_v16   ;;  %2143 = vst.msk [vmem:[%s5732_s1 + $0x14c] sm:$0x2] %vm16_vm1, %v280_v16  }
  0xa4   :  { %2144 = vst.msk [vmem:[%s5732_s1 + $0x8b] sm:$0x4] %vm16_vm1, %v280_v16   ;;  %2145 = vst.msk [vmem:[%s5732_s1 + $0x1ca] sm:$0x8] %vm16_vm1, %v280_v16   ;;  %1451 = vrot.lane.b32.xlu0 %v2977_v3, %s2907_s15  ;;  %1463 = vrot.lane.b32.xlu1 %v2977_v3, %s2908_s28  ;;  %s2937_s15 = smov 21   ;;  %s2938_s28 = smov 20  }
  0xa5   :  { %2146 = vst.msk [vmem:[%s5732_s1 + $0x109] sm:$0x10] %vm16_vm1, %v280_v16   ;;  %2147 = vst.msk [vmem:[%s5732_s1 + $0x248] sm:$0x20] %vm16_vm1, %v280_v16  }
  0xa6   :  { %2148 = vst.msk [vmem:[%s5732_s1 + $0xe] sm:$0x1] %vm16_vm1, %v300_v17   ;;  %2149 = vst.msk [vmem:[%s5732_s1 + $0x14d] sm:$0x2] %vm16_vm1, %v300_v17   ;;  %v440_v24 = vpop.permute.xlu0 %439   ;;  %v460_v26 = vpop.permute.xlu1 %459  }
  0xa7   :  { %2150 = vst.msk [vmem:[%s5732_s1 + $0x8c] sm:$0x4] %vm16_vm1, %v300_v17   ;;  %2151 = vst.msk [vmem:[%s5732_s1 + $0x1cb] sm:$0x8] %vm16_vm1, %v300_v17  }
  0xa8   :  { %2152 = vst.msk [vmem:[%s5732_s1 + $0x10a] sm:$0x10] %vm16_vm1, %v300_v17   ;;  %2153 = vst.msk [vmem:[%s5732_s1 + $0x249] sm:$0x20] %vm16_vm1, %v300_v17   ;;  %1475 = vrot.lane.b32.xlu0 %v2977_v3, %s2909_s0  ;;  %1487 = vrot.lane.b32.xlu1 %v3600_v25, %s2910_s24  ;;  %s2939_s0 = smov 19   ;;  %s2940_s24 = smov 18  }
  0xa9   :  { %2154 = vst.msk [vmem:[%s5732_s1 + $0xf] sm:$0x1] %vm16_vm1, %v320_v18   ;;  %2155 = vst.msk [vmem:[%s5732_s1 + $0x14e] sm:$0x2] %vm16_vm1, %v320_v18  }
  0xaa   :  { %2156 = vst.msk [vmem:[%s5732_s1 + $0x8d] sm:$0x4] %vm16_vm1, %v320_v18   ;;  %2157 = vst.msk [vmem:[%s5732_s1 + $0x1cc] sm:$0x8] %vm16_vm1, %v320_v18   ;;  %v480_v3 = vpop.permute.xlu0 %479   ;;  %v500_v27 = vpop.permute.xlu1 %499  }
  0xab   :  { %2158 = vst.msk [vmem:[%s5732_s1 + $0x10b] sm:$0x10] %vm16_vm1, %v320_v18   ;;  %2159 = vst.msk [vmem:[%s5732_s1 + $0x24a] sm:$0x20] %vm16_vm1, %v320_v18  }
  0xac   :  { %2160 = vst.msk [vmem:[%s5732_s1 + $0x10] sm:$0x1] %vm16_vm1, %v340_v19   ;;  %2161 = vst.msk [vmem:[%s5732_s1 + $0x14f] sm:$0x2] %vm16_vm1, %v340_v19   ;;  %1499 = vrot.lane.b32.xlu0 %v3600_v25, %s2911_s8  ;;  %1511 = vrot.lane.b32.xlu1 %v3600_v25, %s2912_s20  ;;  %s2941_s8 = smov 17   ;;  %s2942_s20 = smov 16  }
  0xad   :  { %2162 = vst.msk [vmem:[%s5732_s1 + $0x8e] sm:$0x4] %vm16_vm1, %v340_v19   ;;  %2163 = vst.msk [vmem:[%s5732_s1 + $0x1cd] sm:$0x8] %vm16_vm1, %v340_v19  }
  0xae   :  { %2164 = vst.msk [vmem:[%s5732_s1 + $0x10c] sm:$0x10] %vm16_vm1, %v340_v19   ;;  %2165 = vst.msk [vmem:[%s5732_s1 + $0x24b] sm:$0x20] %vm16_vm1, %v340_v19   ;;  %v520_v28 = vpop.permute.xlu0 %519   ;;  %v540_v29 = vpop.permute.xlu1 %539  }
  0xaf   :  { %2166 = vst.msk [vmem:[%s5732_s1 + $0x11] sm:$0x1] %vm16_vm1, %v360_v20   ;;  %2167 = vst.msk [vmem:[%s5732_s1 + $0x150] sm:$0x2] %vm16_vm1, %v360_v20  }
  0xb0   :  { %2168 = vst.msk [vmem:[%s5732_s1 + $0x8f] sm:$0x4] %vm16_vm1, %v360_v20   ;;  %2169 = vst.msk [vmem:[%s5732_s1 + $0x1ce] sm:$0x8] %vm16_vm1, %v360_v20   ;;  %1523 = vrot.lane.b32.xlu0 %v3600_v25, %s2913_s4  ;;  %1535 = vrot.lane.b32.xlu1 %v3600_v25, %s2914_s16  ;;  %s2943_s4 = smov 15   ;;  %s2944_s16 = smov 14  }
  0xb1   :  { %2170 = vst.msk [vmem:[%s5732_s1 + $0x10d] sm:$0x10] %vm16_vm1, %v360_v20   ;;  %2171 = vst.msk [vmem:[%s5732_s1 + $0x24c] sm:$0x20] %vm16_vm1, %v360_v20  }
  0xb2   :  { %2172 = vst.msk [vmem:[%s5732_s1 + $0x12] sm:$0x1] %vm16_vm1, %v380_v21   ;;  %2173 = vst.msk [vmem:[%s5732_s1 + $0x151] sm:$0x2] %vm16_vm1, %v380_v21   ;;  %v560_v30 = vpop.permute.xlu0 %559   ;;  %v580_v31 = vpop.permute.xlu1 %579  }
  0xb3   :  { %2174 = vst.msk [vmem:[%s5732_s1 + $0x90] sm:$0x4] %vm16_vm1, %v380_v21   ;;  %2175 = vst.msk [vmem:[%s5732_s1 + $0x1cf] sm:$0x8] %vm16_vm1, %v380_v21  }
  0xb4   :  { %2176 = vst.msk [vmem:[%s5732_s1 + $0x10e] sm:$0x10] %vm16_vm1, %v380_v21   ;;  %2177 = vst.msk [vmem:[%s5732_s1 + $0x24d] sm:$0x20] %vm16_vm1, %v380_v21   ;;  %1547 = vrot.lane.b32.xlu0 %v3600_v25, %s2915_s29  ;;  %1559 = vrot.lane.b32.xlu1 %v3600_v25, %s2916_s12  ;;  %s2945_s29 = smov 13   ;;  %s2946_s12 = smov 12  }
  0xb5   :  { %2178 = vst.msk [vmem:[%s5732_s1 + $0x13] sm:$0x1] %vm16_vm1, %v400_v22   ;;  %2179 = vst.msk [vmem:[%s5732_s1 + $0x152] sm:$0x2] %vm16_vm1, %v400_v22  }
  0xb6   :  { %2180 = vst.msk [vmem:[%s5732_s1 + $0x91] sm:$0x4] %vm16_vm1, %v400_v22   ;;  %2181 = vst.msk [vmem:[%s5732_s1 + $0x1d0] sm:$0x8] %vm16_vm1, %v400_v22   ;;  %v600_v32 = vpop.permute.xlu0 %599   ;;  %v620_v33 = vpop.permute.xlu1 %619  }
  0xb7   :  { %2182 = vst.msk [vmem:[%s5732_s1 + $0x10f] sm:$0x10] %vm16_vm1, %v400_v22   ;;  %2183 = vst.msk [vmem:[%s5732_s1 + $0x24e] sm:$0x20] %vm16_vm1, %v400_v22  }
  0xb8   :  { %2184 = vst.msk [vmem:[%s5732_s1 + $0x14] sm:$0x1] %vm16_vm1, %v420_v23   ;;  %2185 = vst.msk [vmem:[%s5732_s1 + $0x153] sm:$0x2] %vm16_vm1, %v420_v23   ;;  %1571 = vrot.lane.b32.xlu0 %v3600_v25, %s2917_s25  ;;  %1583 = vrot.lane.b32.xlu1 %v3600_v25, %s2918_s9  ;;  %s2947_s25 = smov 11   ;;  %s2948_s9 = smov 10  }
  0xb9   :  { %2186 = vst.msk [vmem:[%s5732_s1 + $0x92] sm:$0x4] %vm16_vm1, %v420_v23   ;;  %2187 = vst.msk [vmem:[%s5732_s1 + $0x1d1] sm:$0x8] %vm16_vm1, %v420_v23  }
  0xba   :  { %2188 = vst.msk [vmem:[%s5732_s1 + $0x110] sm:$0x10] %vm16_vm1, %v420_v23   ;;  %2189 = vst.msk [vmem:[%s5732_s1 + $0x24f] sm:$0x20] %vm16_vm1, %v420_v23   ;;  %v640_v34 = vpop.permute.xlu0 %639   ;;  %v660_v35 = vpop.permute.xlu1 %659  }
  0xbb   :  { %2190 = vst.msk [vmem:[%s5732_s1 + $0x15] sm:$0x1] %vm16_vm1, %v440_v24   ;;  %2191 = vst.msk [vmem:[%s5732_s1 + $0x154] sm:$0x2] %vm16_vm1, %v440_v24  }
  0xbc   :  { %2192 = vst.msk [vmem:[%s5732_s1 + $0x93] sm:$0x4] %vm16_vm1, %v440_v24   ;;  %2193 = vst.msk [vmem:[%s5732_s1 + $0x1d2] sm:$0x8] %vm16_vm1, %v440_v24   ;;  %1595 = vrot.lane.b32.xlu0 %v3600_v25, %s2919_s21  ;;  %1607 = vrot.lane.b32.xlu1 %v3600_v25, %s2920_s5  ;;  %s2949_s21 = smov 9   ;;  %s2950_s5 = smov 8  }
  0xbd   :  { %2194 = vst.msk [vmem:[%s5732_s1 + $0x111] sm:$0x10] %vm16_vm1, %v440_v24   ;;  %2195 = vst.msk [vmem:[%s5732_s1 + $0x250] sm:$0x20] %vm16_vm1, %v440_v24  }
  0xbe   :  { %2196 = vst.msk [vmem:[%s5732_s1 + $0x16] sm:$0x1] %vm16_vm1, %v460_v26   ;;  %2197 = vst.msk [vmem:[%s5732_s1 + $0x155] sm:$0x2] %vm16_vm1, %v460_v26   ;;  %v680_v36 = vpop.permute.xlu0 %679   ;;  %v700_v37 = vpop.permute.xlu1 %699  }
  0xbf   :  { %2198 = vst.msk [vmem:[%s5732_s1 + $0x94] sm:$0x4] %vm16_vm1, %v460_v26   ;;  %2199 = vst.msk [vmem:[%s5732_s1 + $0x1d3] sm:$0x8] %vm16_vm1, %v460_v26  }
  0xc0   :  { %2200 = vst.msk [vmem:[%s5732_s1 + $0x112] sm:$0x10] %vm16_vm1, %v460_v26   ;;  %2201 = vst.msk [vmem:[%s5732_s1 + $0x251] sm:$0x20] %vm16_vm1, %v460_v26   ;;  %1619 = vrot.lane.b32.xlu0 %v3600_v25, %s2921_s17  ;;  %1631 = vrot.lane.b32.xlu1 %v3600_v25, %s2922_s30  ;;  %s2953_s17 = smov 5  }
  0xc1   :  { %2202 = vst.msk [vmem:[%s5732_s1 + $0x17] sm:$0x1] %vm16_vm1, %v480_v3   ;;  %2203 = vst.msk [vmem:[%s5732_s1 + $0x156] sm:$0x2] %vm16_vm1, %v480_v3  }
  0xc2   :  { %2204 = vst.msk [vmem:[%s5732_s1 + $0x95] sm:$0x4] %vm16_vm1, %v480_v3   ;;  %2205 = vst.msk [vmem:[%s5732_s1 + $0x1d4] sm:$0x8] %vm16_vm1, %v480_v3   ;;  %v720_v38 = vpop.permute.xlu0 %719   ;;  %v740_v39 = vpop.permute.xlu1 %739  }
  0xc3   :  { %2206 = vst.msk [vmem:[%s5732_s1 + $0x113] sm:$0x10] %vm16_vm1, %v480_v3   ;;  %2207 = vst.msk [vmem:[%s5732_s1 + $0x252] sm:$0x20] %vm16_vm1, %v480_v3  }
  0xc4   :  { %2208 = vst.msk [vmem:[%s5732_s1 + $0x18] sm:$0x1] %vm16_vm1, %v500_v27   ;;  %2209 = vst.msk [vmem:[%s5732_s1 + $0x157] sm:$0x2] %vm16_vm1, %v500_v27   ;;  %1643 = vrot.lane.b32.xlu0 %v3600_v25, %s2923_s13  ;;  %1655 = vrot.lane.b32.xlu1 %v3600_v25, %s2924_s26  ;;  %s2954_s26 = smov 4  }
  0xc5   :  { %2210 = vst.msk [vmem:[%s5732_s1 + $0x96] sm:$0x4] %vm16_vm1, %v500_v27   ;;  %2211 = vst.msk [vmem:[%s5732_s1 + $0x1d5] sm:$0x8] %vm16_vm1, %v500_v27  }
  0xc6   :  { %2212 = vst.msk [vmem:[%s5732_s1 + $0x114] sm:$0x10] %vm16_vm1, %v500_v27   ;;  %2213 = vst.msk [vmem:[%s5732_s1 + $0x253] sm:$0x20] %vm16_vm1, %v500_v27   ;;  %v760_v40 = vpop.permute.xlu0 %759   ;;  %v780_v41 = vpop.permute.xlu1 %779  }
  0xc7   :  { %2214 = vst.msk [vmem:[%s5732_s1 + $0x19] sm:$0x1] %vm16_vm1, %v520_v28   ;;  %2215 = vst.msk [vmem:[%s5732_s1 + $0x158] sm:$0x2] %vm16_vm1, %v520_v28  }
  0xc8   :  { %2216 = vst.msk [vmem:[%s5732_s1 + $0x97] sm:$0x4] %vm16_vm1, %v520_v28   ;;  %2217 = vst.msk [vmem:[%s5732_s1 + $0x1d6] sm:$0x8] %vm16_vm1, %v520_v28   ;;  %1667 = vrot.lane.b32.xlu0 %v3600_v25, %s2925_s10  ;;  %1679 = vrot.lane.b32.xlu1 %v3600_v25, %s2926_s22 }
  0xc9   :  { %2218 = vst.msk [vmem:[%s5732_s1 + $0x115] sm:$0x10] %vm16_vm1, %v520_v28   ;;  %2219 = vst.msk [vmem:[%s5732_s1 + $0x254] sm:$0x20] %vm16_vm1, %v520_v28  }
  0xca   :  { %2220 = vst.msk [vmem:[%s5732_s1 + $0x1a] sm:$0x1] %vm16_vm1, %v540_v29   ;;  %2221 = vst.msk [vmem:[%s5732_s1 + $0x159] sm:$0x2] %vm16_vm1, %v540_v29   ;;  %v800_v42 = vpop.permute.xlu0 %799   ;;  %v820_v43 = vpop.permute.xlu1 %819  }
  0xcb   :  { %2222 = vst.msk [vmem:[%s5732_s1 + $0x98] sm:$0x4] %vm16_vm1, %v540_v29   ;;  %2223 = vst.msk [vmem:[%s5732_s1 + $0x1d7] sm:$0x8] %vm16_vm1, %v540_v29  }
  0xcc   :  { %2224 = vst.msk [vmem:[%s5732_s1 + $0x116] sm:$0x10] %vm16_vm1, %v540_v29   ;;  %2225 = vst.msk [vmem:[%s5732_s1 + $0x255] sm:$0x20] %vm16_vm1, %v540_v29   ;;  %1691 = vrot.lane.b32.xlu0 %v3600_v25, %s2927_s6  ;;  %1703 = vrot.lane.b32.xlu1 %v3600_v25, %s2928_s18  ;;  %s2955_s6 = smov 3  }
  0xcd   :  { %2226 = vst.msk [vmem:[%s5732_s1 + $0x1b] sm:$0x1] %vm16_vm1, %v560_v30   ;;  %2227 = vst.msk [vmem:[%s5732_s1 + $0x15a] sm:$0x2] %vm16_vm1, %v560_v30  }
  0xce   :  { %2228 = vst.msk [vmem:[%s5732_s1 + $0x99] sm:$0x4] %vm16_vm1, %v560_v30   ;;  %2229 = vst.msk [vmem:[%s5732_s1 + $0x1d8] sm:$0x8] %vm16_vm1, %v560_v30   ;;  %v840_v44 = vpop.permute.xlu0 %839   ;;  %v860_v45 = vpop.permute.xlu1 %859  }
  0xcf   :  { %2230 = vst.msk [vmem:[%s5732_s1 + $0x117] sm:$0x10] %vm16_vm1, %v560_v30   ;;  %2231 = vst.msk [vmem:[%s5732_s1 + $0x256] sm:$0x20] %vm16_vm1, %v560_v30  }
  0xd0   :  { %2232 = vst.msk [vmem:[%s5732_s1 + $0x1c] sm:$0x1] %vm16_vm1, %v580_v31   ;;  %2233 = vst.msk [vmem:[%s5732_s1 + $0x15b] sm:$0x2] %vm16_vm1, %v580_v31   ;;  %1715 = vrot.lane.b32.xlu0 %v3600_v25, %s2929_s2  ;;  %1727 = vrot.lane.b32.xlu1 %v3600_v25, %s2930_s14  ;;  %s2956_s14 = smov 2  }
  0xd1   :  { %2234 = vst.msk [vmem:[%s5732_s1 + $0x9a] sm:$0x4] %vm16_vm1, %v580_v31   ;;  %2235 = vst.msk [vmem:[%s5732_s1 + $0x1d9] sm:$0x8] %vm16_vm1, %v580_v31  }
  0xd2   :  { %2236 = vst.msk [vmem:[%s5732_s1 + $0x118] sm:$0x10] %vm16_vm1, %v580_v31   ;;  %2237 = vst.msk [vmem:[%s5732_s1 + $0x257] sm:$0x20] %vm16_vm1, %v580_v31   ;;  %v880_v46 = vpop.permute.xlu0 %879   ;;  %v900_v47 = vpop.permute.xlu1 %899  }
  0xd3   :  { %2238 = vst.msk [vmem:[%s5732_s1 + $0x1d] sm:$0x1] %vm16_vm1, %v600_v32   ;;  %2239 = vst.msk [vmem:[%s5732_s1 + $0x15c] sm:$0x2] %vm16_vm1, %v600_v32  }
  0xd4   :  { %2240 = vst.msk [vmem:[%s5732_s1 + $0x9b] sm:$0x4] %vm16_vm1, %v600_v32   ;;  %2241 = vst.msk [vmem:[%s5732_s1 + $0x1da] sm:$0x8] %vm16_vm1, %v600_v32   ;;  %1739 = vrot.lane.b32.xlu0 %v3600_v25, %s2931_s27  ;;  %1751 = vrot.lane.b32.xlu1 %v3600_v25, %s2932_s11 }
  0xd5   :  { %2242 = vst.msk [vmem:[%s5732_s1 + $0x119] sm:$0x10] %vm16_vm1, %v600_v32   ;;  %2243 = vst.msk [vmem:[%s5732_s1 + $0x258] sm:$0x20] %vm16_vm1, %v600_v32  }
  0xd6   :  { %2244 = vst.msk [vmem:[%s5732_s1 + $0x1e] sm:$0x1] %vm16_vm1, %v620_v33   ;;  %2245 = vst.msk [vmem:[%s5732_s1 + $0x15d] sm:$0x2] %vm16_vm1, %v620_v33   ;;  %v920_v48 = vpop.permute.xlu0 %919   ;;  %v940_v49 = vpop.permute.xlu1 %939  }
  0xd7   :  { %2246 = vst.msk [vmem:[%s5732_s1 + $0x9c] sm:$0x4] %vm16_vm1, %v620_v33   ;;  %2247 = vst.msk [vmem:[%s5732_s1 + $0x1db] sm:$0x8] %vm16_vm1, %v620_v33  }
  0xd8   :  { %2248 = vst.msk [vmem:[%s5732_s1 + $0x11a] sm:$0x10] %vm16_vm1, %v620_v33   ;;  %2249 = vst.msk [vmem:[%s5732_s1 + $0x259] sm:$0x20] %vm16_vm1, %v620_v33   ;;  %1763 = vrot.lane.b32.xlu0 %v3600_v25, %s2933_s23  ;;  %1775 = vrot.lane.b32.xlu1 %v3600_v25, %s2934_s7  ;;  %s2957_s23 = smov 1  }
  0xd9   :  { %2250 = vst.msk [vmem:[%s5732_s1 + $0x1f] sm:$0x1] %vm16_vm1, %v640_v34   ;;  %2251 = vst.msk [vmem:[%s5732_s1 + $0x15e] sm:$0x2] %vm16_vm1, %v640_v34  }
  0xda   :  { %2252 = vst.msk [vmem:[%s5732_s1 + $0x9d] sm:$0x4] %vm16_vm1, %v640_v34   ;;  %2253 = vst.msk [vmem:[%s5732_s1 + $0x1dc] sm:$0x8] %vm16_vm1, %v640_v34   ;;  %v960_v50 = vpop.permute.xlu0 %959   ;;  %v980_v51 = vpop.permute.xlu1 %979  }
  0xdb   :  { %2254 = vst.msk [vmem:[%s5732_s1 + $0x11b] sm:$0x10] %vm16_vm1, %v640_v34   ;;  %2255 = vst.msk [vmem:[%s5732_s1 + $0x25a] sm:$0x20] %vm16_vm1, %v640_v34  }
  0xdc   :  { %2256 = vst.msk [vmem:[%s5732_s1 + $0x20] sm:$0x1] %vm16_vm1, %v660_v35   ;;  %2257 = vst.msk [vmem:[%s5732_s1 + $0x15f] sm:$0x2] %vm16_vm1, %v660_v35   ;;  %1787 = vrot.lane.b32.xlu0 %v3600_v25, %s2935_s19  ;;  %1799 = vrot.lane.b32.xlu1 %v3600_v25, %s2936_s3 }
  0xdd   :  { %2258 = vst.msk [vmem:[%s5732_s1 + $0x9e] sm:$0x4] %vm16_vm1, %v660_v35   ;;  %2259 = vst.msk [vmem:[%s5732_s1 + $0x1dd] sm:$0x8] %vm16_vm1, %v660_v35  }
  0xde   :  { %2260 = vst.msk [vmem:[%s5732_s1 + $0x11c] sm:$0x10] %vm16_vm1, %v660_v35   ;;  %2261 = vst.msk [vmem:[%s5732_s1 + $0x25b] sm:$0x20] %vm16_vm1, %v660_v35   ;;  %v1000_v52 = vpop.permute.xlu0 %999   ;;  %v1020_v53 = vpop.permute.xlu1 %1019  }
  0xdf   :  { %2262 = vst.msk [vmem:[%s5732_s1 + $0x21] sm:$0x1] %vm16_vm1, %v680_v36   ;;  %2263 = vst.msk [vmem:[%s5732_s1 + $0x160] sm:$0x2] %vm16_vm1, %v680_v36  }
  0xe0   :  { %2264 = vst.msk [vmem:[%s5732_s1 + $0x9f] sm:$0x4] %vm16_vm1, %v680_v36   ;;  %2265 = vst.msk [vmem:[%s5732_s1 + $0x1de] sm:$0x8] %vm16_vm1, %v680_v36   ;;  %1811 = vrot.lane.b32.xlu0 %v3600_v25, %s2937_s15  ;;  %1823 = vrot.lane.b32.xlu1 %v3600_v25, %s2938_s28 }
  0xe1   :  { %2266 = vst.msk [vmem:[%s5732_s1 + $0x11d] sm:$0x10] %vm16_vm1, %v680_v36   ;;  %2267 = vst.msk [vmem:[%s5732_s1 + $0x25c] sm:$0x20] %vm16_vm1, %v680_v36  }
  0xe2   :  { %2268 = vst.msk [vmem:[%s5732_s1 + $0x22] sm:$0x1] %vm16_vm1, %v700_v37   ;;  %2269 = vst.msk [vmem:[%s5732_s1 + $0x161] sm:$0x2] %vm16_vm1, %v700_v37   ;;  %v1040_v54 = vpop.permute.xlu0 %1039   ;;  %v1060_v55 = vpop.permute.xlu1 %1059  }
  0xe3   :  { %2270 = vst.msk [vmem:[%s5732_s1 + $0xa0] sm:$0x4] %vm16_vm1, %v700_v37   ;;  %2271 = vst.msk [vmem:[%s5732_s1 + $0x1df] sm:$0x8] %vm16_vm1, %v700_v37  }
  0xe4   :  { %2272 = vst.msk [vmem:[%s5732_s1 + $0x11e] sm:$0x10] %vm16_vm1, %v700_v37   ;;  %2273 = vst.msk [vmem:[%s5732_s1 + $0x25d] sm:$0x20] %vm16_vm1, %v700_v37   ;;  %1835 = vrot.lane.b32.xlu0 %v3600_v25, %s2939_s0  ;;  %1847 = vrot.lane.b32.xlu1 %v3600_v25, %s2940_s24 }
  0xe5   :  { %2274 = vst.msk [vmem:[%s5732_s1 + $0x23] sm:$0x1] %vm16_vm1, %v720_v38   ;;  %2275 = vst.msk [vmem:[%s5732_s1 + $0x162] sm:$0x2] %vm16_vm1, %v720_v38  }
  0xe6   :  { %2276 = vst.msk [vmem:[%s5732_s1 + $0xa1] sm:$0x4] %vm16_vm1, %v720_v38   ;;  %2277 = vst.msk [vmem:[%s5732_s1 + $0x1e0] sm:$0x8] %vm16_vm1, %v720_v38   ;;  %v1080_v56 = vpop.permute.xlu0 %1079   ;;  %v1100_v57 = vpop.permute.xlu1 %1099  }
  0xe7   :  { %2278 = vst.msk [vmem:[%s5732_s1 + $0x11f] sm:$0x10] %vm16_vm1, %v720_v38   ;;  %2279 = vst.msk [vmem:[%s5732_s1 + $0x25e] sm:$0x20] %vm16_vm1, %v720_v38  }
  0xe8   :  { %2280 = vst.msk [vmem:[%s5732_s1 + $0x24] sm:$0x1] %vm16_vm1, %v740_v39   ;;  %2281 = vst.msk [vmem:[%s5732_s1 + $0x163] sm:$0x2] %vm16_vm1, %v740_v39   ;;  %1859 = vrot.lane.b32.xlu0 %v3600_v25, %s2941_s8  ;;  %1871 = vrot.lane.b32.xlu1 %v3600_v25, %s2942_s20 }
  0xe9   :  { %2282 = vst.msk [vmem:[%s5732_s1 + $0xa2] sm:$0x4] %vm16_vm1, %v740_v39   ;;  %2283 = vst.msk [vmem:[%s5732_s1 + $0x1e1] sm:$0x8] %vm16_vm1, %v740_v39  }
  0xea   :  { %2284 = vst.msk [vmem:[%s5732_s1 + $0x120] sm:$0x10] %vm16_vm1, %v740_v39   ;;  %2285 = vst.msk [vmem:[%s5732_s1 + $0x25f] sm:$0x20] %vm16_vm1, %v740_v39   ;;  %v1120_v58 = vpop.permute.xlu0 %1119   ;;  %v1140_v59 = vpop.permute.xlu1 %1139  }
  0xeb   :  { %2286 = vst.msk [vmem:[%s5732_s1 + $0x25] sm:$0x1] %vm16_vm1, %v760_v40   ;;  %2287 = vst.msk [vmem:[%s5732_s1 + $0x164] sm:$0x2] %vm16_vm1, %v760_v40  }
  0xec   :  { %2288 = vst.msk [vmem:[%s5732_s1 + $0xa3] sm:$0x4] %vm16_vm1, %v760_v40   ;;  %2289 = vst.msk [vmem:[%s5732_s1 + $0x1e2] sm:$0x8] %vm16_vm1, %v760_v40   ;;  %1883 = vrot.lane.b32.xlu0 %v3600_v25, %s2943_s4  ;;  %1895 = vrot.lane.b32.xlu1 %v3600_v25, %s2944_s16 }
  0xed   :  { %2290 = vst.msk [vmem:[%s5732_s1 + $0x121] sm:$0x10] %vm16_vm1, %v760_v40   ;;  %2291 = vst.msk [vmem:[%s5732_s1 + $0x260] sm:$0x20] %vm16_vm1, %v760_v40  }
  0xee   :  { %2292 = vst.msk [vmem:[%s5732_s1 + $0x26] sm:$0x1] %vm16_vm1, %v780_v41   ;;  %2293 = vst.msk [vmem:[%s5732_s1 + $0x165] sm:$0x2] %vm16_vm1, %v780_v41   ;;  %v1160_v60 = vpop.permute.xlu0 %1159   ;;  %v1180_v61 = vpop.permute.xlu1 %1179  }
  0xef   :  { %2294 = vst.msk [vmem:[%s5732_s1 + $0xa4] sm:$0x4] %vm16_vm1, %v780_v41   ;;  %2295 = vst.msk [vmem:[%s5732_s1 + $0x1e3] sm:$0x8] %vm16_vm1, %v780_v41  }
  0xf0   :  { %2296 = vst.msk [vmem:[%s5732_s1 + $0x122] sm:$0x10] %vm16_vm1, %v780_v41   ;;  %2297 = vst.msk [vmem:[%s5732_s1 + $0x261] sm:$0x20] %vm16_vm1, %v780_v41   ;;  %1907 = vrot.lane.b32.xlu0 %v3600_v25, %s2945_s29  ;;  %1919 = vrot.lane.b32.xlu1 %v3600_v25, %s2946_s12  ;;  %s2951_s29 = smov 7  }
  0xf1   :  { %2298 = vst.msk [vmem:[%s5732_s1 + $0x27] sm:$0x1] %vm16_vm1, %v800_v42   ;;  %2299 = vst.msk [vmem:[%s5732_s1 + $0x166] sm:$0x2] %vm16_vm1, %v800_v42  }
  0xf2   :  { %2300 = vst.msk [vmem:[%s5732_s1 + $0xa5] sm:$0x4] %vm16_vm1, %v800_v42   ;;  %2301 = vst.msk [vmem:[%s5732_s1 + $0x1e4] sm:$0x8] %vm16_vm1, %v800_v42   ;;  %v1200_v62 = vpop.permute.xlu0 %1199   ;;  %v1220_v63 = vpop.permute.xlu1 %1219  }
  0xf3   :  { %2302 = vst.msk [vmem:[%s5732_s1 + $0x123] sm:$0x10] %vm16_vm1, %v800_v42   ;;  %2303 = vst.msk [vmem:[%s5732_s1 + $0x262] sm:$0x20] %vm16_vm1, %v800_v42  }
  0xf4   :  { %2304 = vst.msk [vmem:[%s5732_s1 + $0x28] sm:$0x1] %vm16_vm1, %v820_v43   ;;  %2305 = vst.msk [vmem:[%s5732_s1 + $0x167] sm:$0x2] %vm16_vm1, %v820_v43   ;;  %1931 = vrot.lane.b32.xlu0 %v3600_v25, %s2947_s25  ;;  %1943 = vrot.lane.b32.xlu1 %v3600_v25, %s2948_s9  ;;  %s2952_s9 = smov 6  }
  0xf5   :  { %2306 = vst.msk [vmem:[%s5732_s1 + $0xa6] sm:$0x4] %vm16_vm1, %v820_v43   ;;  %2307 = vst.msk [vmem:[%s5732_s1 + $0x1e5] sm:$0x8] %vm16_vm1, %v820_v43  }
  0xf6   :  { %2308 = vst.msk [vmem:[%s5732_s1 + $0x124] sm:$0x10] %vm16_vm1, %v820_v43   ;;  %2309 = vst.msk [vmem:[%s5732_s1 + $0x263] sm:$0x20] %vm16_vm1, %v820_v43   ;;  %v1240_v0 = vpop.permute.xlu0 %1239   ;;  %v1260_v1 = vpop.permute.xlu1 %1259  }
  0xf7   :  { %2310 = vst.msk [vmem:[%s5732_s1 + $0x29] sm:$0x1] %vm16_vm1, %v840_v44   ;;  %2311 = vst.msk [vmem:[%s5732_s1 + $0x168] sm:$0x2] %vm16_vm1, %v840_v44  }
  0xf8   :  { %2312 = vst.msk [vmem:[%s5732_s1 + $0xa7] sm:$0x4] %vm16_vm1, %v840_v44   ;;  %2313 = vst.msk [vmem:[%s5732_s1 + $0x1e6] sm:$0x8] %vm16_vm1, %v840_v44   ;;  %1955 = vrot.lane.b32.xlu0 %v3600_v25, %s2949_s21  ;;  %1967 = vrot.lane.b32.xlu1 %v3600_v25, %s2950_s5 }
  0xf9   :  { %2314 = vst.msk [vmem:[%s5732_s1 + $0x125] sm:$0x10] %vm16_vm1, %v840_v44   ;;  %2315 = vst.msk [vmem:[%s5732_s1 + $0x264] sm:$0x20] %vm16_vm1, %v840_v44  }
  0xfa   :  { %2316 = vst.msk [vmem:[%s5732_s1 + $0x2a] sm:$0x1] %vm16_vm1, %v860_v45   ;;  %2317 = vst.msk [vmem:[%s5732_s1 + $0x169] sm:$0x2] %vm16_vm1, %v860_v45   ;;  %v1280_v2 = vpop.permute.xlu0 %1279   ;;  %v1296_v7 = vpop.permute.xlu1 %1295  }
  0xfb   :  { %2318 = vst.msk [vmem:[%s5732_s1 + $0xa8] sm:$0x4] %vm16_vm1, %v860_v45   ;;  %2319 = vst.msk [vmem:[%s5732_s1 + $0x1e7] sm:$0x8] %vm16_vm1, %v860_v45  }
  0xfc   :  { %2320 = vst.msk [vmem:[%s5732_s1 + $0x126] sm:$0x10] %vm16_vm1, %v860_v45   ;;  %2321 = vst.msk [vmem:[%s5732_s1 + $0x265] sm:$0x20] %vm16_vm1, %v860_v45   ;;  %1979 = vrot.lane.b32.xlu0 %v3600_v25, %s2951_s29  ;;  %1991 = vrot.lane.b32.xlu1 %v3600_v25, %s2952_s9 }
  0xfd   :  { %2322 = vst.msk [vmem:[%s5732_s1 + $0x2b] sm:$0x1] %vm16_vm1, %v880_v46   ;;  %2323 = vst.msk [vmem:[%s5732_s1 + $0x16a] sm:$0x2] %vm16_vm1, %v880_v46  }
  0xfe   :  { %2324 = vst.msk [vmem:[%s5732_s1 + $0xa9] sm:$0x4] %vm16_vm1, %v880_v46   ;;  %2325 = vst.msk [vmem:[%s5732_s1 + $0x1e8] sm:$0x8] %vm16_vm1, %v880_v46   ;;  %v1308_v8 = vpop.permute.xlu0 %1307   ;;  %v1320_v9 = vpop.permute.xlu1 %1319  }
  0xff   :  { %2326 = vst.msk [vmem:[%s5732_s1 + $0x127] sm:$0x10] %vm16_vm1, %v880_v46   ;;  %2327 = vst.msk [vmem:[%s5732_s1 + $0x266] sm:$0x20] %vm16_vm1, %v880_v46  }
 0x100   :  { %2328 = vst.msk [vmem:[%s5732_s1 + $0x2c] sm:$0x1] %vm16_vm1, %v900_v47   ;;  %2329 = vst.msk [vmem:[%s5732_s1 + $0x16b] sm:$0x2] %vm16_vm1, %v900_v47   ;;  %2003 = vrot.lane.b32.xlu0 %v3600_v25, %s2953_s17  ;;  %2015 = vrot.lane.b32.xlu1 %v3600_v25, %s2954_s26 }
 0x101   :  { %2330 = vst.msk [vmem:[%s5732_s1 + $0xaa] sm:$0x4] %vm16_vm1, %v900_v47   ;;  %2331 = vst.msk [vmem:[%s5732_s1 + $0x1e9] sm:$0x8] %vm16_vm1, %v900_v47  }
 0x102   :  { %2332 = vst.msk [vmem:[%s5732_s1 + $0x128] sm:$0x10] %vm16_vm1, %v900_v47   ;;  %2333 = vst.msk [vmem:[%s5732_s1 + $0x267] sm:$0x20] %vm16_vm1, %v900_v47   ;;  %v1332_v10 = vpop.permute.xlu0 %1331   ;;  %v1344_v11 = vpop.permute.xlu1 %1343  }
 0x103   :  { %2334 = vst.msk [vmem:[%s5732_s1 + $0x2d] sm:$0x1] %vm16_vm1, %v920_v48   ;;  %2335 = vst.msk [vmem:[%s5732_s1 + $0x16c] sm:$0x2] %vm16_vm1, %v920_v48  }
 0x104   :  { %2336 = vst.msk [vmem:[%s5732_s1 + $0xab] sm:$0x4] %vm16_vm1, %v920_v48   ;;  %2337 = vst.msk [vmem:[%s5732_s1 + $0x1ea] sm:$0x8] %vm16_vm1, %v920_v48   ;;  %2027 = vrot.lane.b32.xlu0 %v3600_v25, %s2955_s6  ;;  %2039 = vrot.lane.b32.xlu1 %v3600_v25, %s2956_s14 }
 0x105   :  { %2338 = vst.msk [vmem:[%s5732_s1 + $0x129] sm:$0x10] %vm16_vm1, %v920_v48   ;;  %2339 = vst.msk [vmem:[%s5732_s1 + $0x268] sm:$0x20] %vm16_vm1, %v920_v48  }
 0x106   :  { %2340 = vst.msk [vmem:[%s5732_s1 + $0x2e] sm:$0x1] %vm16_vm1, %v940_v49   ;;  %2341 = vst.msk [vmem:[%s5732_s1 + $0x16d] sm:$0x2] %vm16_vm1, %v940_v49   ;;  %v1356_v12 = vpop.permute.xlu0 %1355   ;;  %v1368_v13 = vpop.permute.xlu1 %1367  }
 0x107   :  { %2342 = vst.msk [vmem:[%s5732_s1 + $0xac] sm:$0x4] %vm16_vm1, %v940_v49   ;;  %2343 = vst.msk [vmem:[%s5732_s1 + $0x1eb] sm:$0x8] %vm16_vm1, %v940_v49  }
 0x108   :  { %2344 = vst.msk [vmem:[%s5732_s1 + $0x12a] sm:$0x10] %vm16_vm1, %v940_v49   ;;  %2345 = vst.msk [vmem:[%s5732_s1 + $0x269] sm:$0x20] %vm16_vm1, %v940_v49   ;;  %2051 = vrot.lane.b32.xlu0 %v3600_v25, %s2957_s23 }
 0x109   :  { %2346 = vst.msk [vmem:[%s5732_s1 + $0x2f] sm:$0x1] %vm16_vm1, %v960_v50   ;;  %2347 = vst.msk [vmem:[%s5732_s1 + $0x16e] sm:$0x2] %vm16_vm1, %v960_v50  }
 0x10a   :  { %2348 = vst.msk [vmem:[%s5732_s1 + $0xad] sm:$0x4] %vm16_vm1, %v960_v50   ;;  %2349 = vst.msk [vmem:[%s5732_s1 + $0x1ec] sm:$0x8] %vm16_vm1, %v960_v50   ;;  %v1380_v14 = vpop.permute.xlu0 %1379   ;;  %v1392_v15 = vpop.permute.xlu1 %1391  }
 0x10b   :  { %2350 = vst.msk [vmem:[%s5732_s1 + $0x12b] sm:$0x10] %vm16_vm1, %v960_v50   ;;  %2351 = vst.msk [vmem:[%s5732_s1 + $0x26a] sm:$0x20] %vm16_vm1, %v960_v50  }
 0x10c   :  { %2352 = vst.msk [vmem:[%s5732_s1 + $0x30] sm:$0x1] %vm16_vm1, %v980_v51   ;;  %2353 = vst.msk [vmem:[%s5732_s1 + $0x16f] sm:$0x2] %vm16_vm1, %v980_v51  }
 0x10d   :  { %2354 = vst.msk [vmem:[%s5732_s1 + $0xae] sm:$0x4] %vm16_vm1, %v980_v51   ;;  %2355 = vst.msk [vmem:[%s5732_s1 + $0x1ed] sm:$0x8] %vm16_vm1, %v980_v51  }
 0x10e   :  { %2356 = vst.msk [vmem:[%s5732_s1 + $0x12c] sm:$0x10] %vm16_vm1, %v980_v51   ;;  %2357 = vst.msk [vmem:[%s5732_s1 + $0x26b] sm:$0x20] %vm16_vm1, %v980_v51   ;;  %v1404_v16 = vpop.permute.xlu0 %1403   ;;  %v1416_v17 = vpop.permute.xlu1 %1415  }
 0x10f   :  { %2358 = vst.msk [vmem:[%s5732_s1 + $0x31] sm:$0x1] %vm16_vm1, %v1000_v52   ;;  %2359 = vst.msk [vmem:[%s5732_s1 + $0x170] sm:$0x2] %vm16_vm1, %v1000_v52  }
 0x110   :  { %2360 = vst.msk [vmem:[%s5732_s1 + $0xaf] sm:$0x4] %vm16_vm1, %v1000_v52   ;;  %2361 = vst.msk [vmem:[%s5732_s1 + $0x1ee] sm:$0x8] %vm16_vm1, %v1000_v52  }
 0x111   :  { %2362 = vst.msk [vmem:[%s5732_s1 + $0x12d] sm:$0x10] %vm16_vm1, %v1000_v52   ;;  %2363 = vst.msk [vmem:[%s5732_s1 + $0x26c] sm:$0x20] %vm16_vm1, %v1000_v52  }
 0x112   :  { %2364 = vst.msk [vmem:[%s5732_s1 + $0x32] sm:$0x1] %vm16_vm1, %v1020_v53   ;;  %2365 = vst.msk [vmem:[%s5732_s1 + $0x171] sm:$0x2] %vm16_vm1, %v1020_v53   ;;  %v1428_v18 = vpop.permute.xlu0 %1427   ;;  %v1440_v19 = vpop.permute.xlu1 %1439  }
 0x113   :  { %2366 = vst.msk [vmem:[%s5732_s1 + $0xb0] sm:$0x4] %vm16_vm1, %v1020_v53   ;;  %2367 = vst.msk [vmem:[%s5732_s1 + $0x1ef] sm:$0x8] %vm16_vm1, %v1020_v53  }
 0x114   :  { %2368 = vst.msk [vmem:[%s5732_s1 + $0x12e] sm:$0x10] %vm16_vm1, %v1020_v53   ;;  %2369 = vst.msk [vmem:[%s5732_s1 + $0x26d] sm:$0x20] %vm16_vm1, %v1020_v53  }
 0x115   :  { %2370 = vst.msk [vmem:[%s5732_s1 + $0x33] sm:$0x1] %vm16_vm1, %v1040_v54   ;;  %2371 = vst.msk [vmem:[%s5732_s1 + $0x172] sm:$0x2] %vm16_vm1, %v1040_v54  }
 0x116   :  { %2372 = vst.msk [vmem:[%s5732_s1 + $0xb1] sm:$0x4] %vm16_vm1, %v1040_v54   ;;  %2373 = vst.msk [vmem:[%s5732_s1 + $0x1f0] sm:$0x8] %vm16_vm1, %v1040_v54   ;;  %v1452_v20 = vpop.permute.xlu0 %1451   ;;  %v1464_v21 = vpop.permute.xlu1 %1463  }
 0x117   :  { %2374 = vst.msk [vmem:[%s5732_s1 + $0x12f] sm:$0x10] %vm16_vm1, %v1040_v54   ;;  %2375 = vst.msk [vmem:[%s5732_s1 + $0x26e] sm:$0x20] %vm16_vm1, %v1040_v54  }
 0x118   :  { %2376 = vst.msk [vmem:[%s5732_s1 + $0x34] sm:$0x1] %vm16_vm1, %v1060_v55   ;;  %2377 = vst.msk [vmem:[%s5732_s1 + $0x173] sm:$0x2] %vm16_vm1, %v1060_v55  }
 0x119   :  { %2378 = vst.msk [vmem:[%s5732_s1 + $0xb2] sm:$0x4] %vm16_vm1, %v1060_v55   ;;  %2379 = vst.msk [vmem:[%s5732_s1 + $0x1f1] sm:$0x8] %vm16_vm1, %v1060_v55  }
 0x11a   :  { %2380 = vst.msk [vmem:[%s5732_s1 + $0x130] sm:$0x10] %vm16_vm1, %v1060_v55   ;;  %2381 = vst.msk [vmem:[%s5732_s1 + $0x26f] sm:$0x20] %vm16_vm1, %v1060_v55   ;;  %v1476_v22 = vpop.permute.xlu0 %1475   ;;  %v1488_v23 = vpop.permute.xlu1 %1487  }
 0x11b   :  { %2382 = vst.msk [vmem:[%s5732_s1 + $0x35] sm:$0x1] %vm16_vm1, %v1080_v56   ;;  %2383 = vst.msk [vmem:[%s5732_s1 + $0x174] sm:$0x2] %vm16_vm1, %v1080_v56  }
 0x11c   :  { %2384 = vst.msk [vmem:[%s5732_s1 + $0xb3] sm:$0x4] %vm16_vm1, %v1080_v56   ;;  %2385 = vst.msk [vmem:[%s5732_s1 + $0x1f2] sm:$0x8] %vm16_vm1, %v1080_v56  }
 0x11d   :  { %2386 = vst.msk [vmem:[%s5732_s1 + $0x131] sm:$0x10] %vm16_vm1, %v1080_v56   ;;  %2387 = vst.msk [vmem:[%s5732_s1 + $0x270] sm:$0x20] %vm16_vm1, %v1080_v56  }
 0x11e   :  { %2388 = vst.msk [vmem:[%s5732_s1 + $0x36] sm:$0x1] %vm16_vm1, %v1100_v57   ;;  %2389 = vst.msk [vmem:[%s5732_s1 + $0x175] sm:$0x2] %vm16_vm1, %v1100_v57   ;;  %v1500_v24 = vpop.permute.xlu0 %1499   ;;  %v1512_v25 = vpop.permute.xlu1 %1511  }
 0x11f   :  { %2390 = vst.msk [vmem:[%s5732_s1 + $0xb4] sm:$0x4] %vm16_vm1, %v1100_v57   ;;  %2391 = vst.msk [vmem:[%s5732_s1 + $0x1f3] sm:$0x8] %vm16_vm1, %v1100_v57  }
 0x120   :  { %2392 = vst.msk [vmem:[%s5732_s1 + $0x132] sm:$0x10] %vm16_vm1, %v1100_v57   ;;  %2393 = vst.msk [vmem:[%s5732_s1 + $0x271] sm:$0x20] %vm16_vm1, %v1100_v57  }
 0x121   :  { %2394 = vst.msk [vmem:[%s5732_s1 + $0x37] sm:$0x1] %vm16_vm1, %v1120_v58   ;;  %2395 = vst.msk [vmem:[%s5732_s1 + $0x176] sm:$0x2] %vm16_vm1, %v1120_v58  }
 0x122   :  { %2396 = vst.msk [vmem:[%s5732_s1 + $0xb5] sm:$0x4] %vm16_vm1, %v1120_v58   ;;  %2397 = vst.msk [vmem:[%s5732_s1 + $0x1f4] sm:$0x8] %vm16_vm1, %v1120_v58   ;;  %v1524_v26 = vpop.permute.xlu0 %1523   ;;  %v1536_v3 = vpop.permute.xlu1 %1535  }
 0x123   :  { %2398 = vst.msk [vmem:[%s5732_s1 + $0x133] sm:$0x10] %vm16_vm1, %v1120_v58   ;;  %2399 = vst.msk [vmem:[%s5732_s1 + $0x272] sm:$0x20] %vm16_vm1, %v1120_v58  }
 0x124   :  { %2400 = vst.msk [vmem:[%s5732_s1 + $0x38] sm:$0x1] %vm16_vm1, %v1140_v59   ;;  %2401 = vst.msk [vmem:[%s5732_s1 + $0x177] sm:$0x2] %vm16_vm1, %v1140_v59  }
 0x125   :  { %2402 = vst.msk [vmem:[%s5732_s1 + $0xb6] sm:$0x4] %vm16_vm1, %v1140_v59   ;;  %2403 = vst.msk [vmem:[%s5732_s1 + $0x1f5] sm:$0x8] %vm16_vm1, %v1140_v59  }
 0x126   :  { %2404 = vst.msk [vmem:[%s5732_s1 + $0x134] sm:$0x10] %vm16_vm1, %v1140_v59   ;;  %2405 = vst.msk [vmem:[%s5732_s1 + $0x273] sm:$0x20] %vm16_vm1, %v1140_v59   ;;  %v1548_v27 = vpop.permute.xlu0 %1547   ;;  %v1560_v28 = vpop.permute.xlu1 %1559  }
 0x127   :  { %2406 = vst.msk [vmem:[%s5732_s1 + $0x39] sm:$0x1] %vm16_vm1, %v1160_v60   ;;  %2407 = vst.msk [vmem:[%s5732_s1 + $0x178] sm:$0x2] %vm16_vm1, %v1160_v60  }
 0x128   :  { %2408 = vst.msk [vmem:[%s5732_s1 + $0xb7] sm:$0x4] %vm16_vm1, %v1160_v60   ;;  %2409 = vst.msk [vmem:[%s5732_s1 + $0x1f6] sm:$0x8] %vm16_vm1, %v1160_v60  }
 0x129   :  { %2410 = vst.msk [vmem:[%s5732_s1 + $0x135] sm:$0x10] %vm16_vm1, %v1160_v60   ;;  %2411 = vst.msk [vmem:[%s5732_s1 + $0x274] sm:$0x20] %vm16_vm1, %v1160_v60  }
 0x12a   :  { %2412 = vst.msk [vmem:[%s5732_s1 + $0x3a] sm:$0x1] %vm16_vm1, %v1180_v61   ;;  %2413 = vst.msk [vmem:[%s5732_s1 + $0x179] sm:$0x2] %vm16_vm1, %v1180_v61   ;;  %v1572_v29 = vpop.permute.xlu0 %1571   ;;  %v1584_v30 = vpop.permute.xlu1 %1583  }
 0x12b   :  { %2414 = vst.msk [vmem:[%s5732_s1 + $0xb8] sm:$0x4] %vm16_vm1, %v1180_v61   ;;  %2415 = vst.msk [vmem:[%s5732_s1 + $0x1f7] sm:$0x8] %vm16_vm1, %v1180_v61  }
 0x12c   :  { %2416 = vst.msk [vmem:[%s5732_s1 + $0x136] sm:$0x10] %vm16_vm1, %v1180_v61   ;;  %2417 = vst.msk [vmem:[%s5732_s1 + $0x275] sm:$0x20] %vm16_vm1, %v1180_v61  }
 0x12d   :  { %2418 = vst.msk [vmem:[%s5732_s1 + $0x3b] sm:$0x1] %vm16_vm1, %v1200_v62   ;;  %2419 = vst.msk [vmem:[%s5732_s1 + $0x17a] sm:$0x2] %vm16_vm1, %v1200_v62  }
 0x12e   :  { %2420 = vst.msk [vmem:[%s5732_s1 + $0xb9] sm:$0x4] %vm16_vm1, %v1200_v62   ;;  %2421 = vst.msk [vmem:[%s5732_s1 + $0x1f8] sm:$0x8] %vm16_vm1, %v1200_v62   ;;  %v1596_v31 = vpop.permute.xlu0 %1595   ;;  %v1608_v32 = vpop.permute.xlu1 %1607  }
 0x12f   :  { %2422 = vst.msk [vmem:[%s5732_s1 + $0x137] sm:$0x10] %vm16_vm1, %v1200_v62   ;;  %2423 = vst.msk [vmem:[%s5732_s1 + $0x276] sm:$0x20] %vm16_vm1, %v1200_v62  }
 0x130   :  { %2424 = vst.msk [vmem:[%s5732_s1 + $0x3c] sm:$0x1] %vm16_vm1, %v1220_v63   ;;  %2425 = vst.msk [vmem:[%s5732_s1 + $0x17b] sm:$0x2] %vm16_vm1, %v1220_v63  }
 0x131   :  { %2426 = vst.msk [vmem:[%s5732_s1 + $0xba] sm:$0x4] %vm16_vm1, %v1220_v63   ;;  %2427 = vst.msk [vmem:[%s5732_s1 + $0x1f9] sm:$0x8] %vm16_vm1, %v1220_v63  }
 0x132   :  { %2428 = vst.msk [vmem:[%s5732_s1 + $0x138] sm:$0x10] %vm16_vm1, %v1220_v63   ;;  %2429 = vst.msk [vmem:[%s5732_s1 + $0x277] sm:$0x20] %vm16_vm1, %v1220_v63   ;;  %v1620_v33 = vpop.permute.xlu0 %1619   ;;  %v1632_v34 = vpop.permute.xlu1 %1631  }
 0x133   :  { %2430 = vst.msk [vmem:[%s5732_s1 + $0x3d] sm:$0x1] %vm16_vm1, %v1240_v0   ;;  %2431 = vst.msk [vmem:[%s5732_s1 + $0x17c] sm:$0x2] %vm16_vm1, %v1240_v0  }
 0x134   :  { %2432 = vst.msk [vmem:[%s5732_s1 + $0xbb] sm:$0x4] %vm16_vm1, %v1240_v0   ;;  %2433 = vst.msk [vmem:[%s5732_s1 + $0x1fa] sm:$0x8] %vm16_vm1, %v1240_v0  }
 0x135   :  { %2434 = vst.msk [vmem:[%s5732_s1 + $0x139] sm:$0x10] %vm16_vm1, %v1240_v0   ;;  %2435 = vst.msk [vmem:[%s5732_s1 + $0x278] sm:$0x20] %vm16_vm1, %v1240_v0  }
 0x136   :  { %2436 = vst.msk [vmem:[%s5732_s1 + $0x3e] sm:$0x1] %vm16_vm1, %v1260_v1   ;;  %2437 = vst.msk [vmem:[%s5732_s1 + $0x17d] sm:$0x2] %vm16_vm1, %v1260_v1   ;;  %v1644_v35 = vpop.permute.xlu0 %1643   ;;  %v1656_v36 = vpop.permute.xlu1 %1655  }
 0x137   :  { %2438 = vst.msk [vmem:[%s5732_s1 + $0xbc] sm:$0x4] %vm16_vm1, %v1260_v1   ;;  %2439 = vst.msk [vmem:[%s5732_s1 + $0x1fb] sm:$0x8] %vm16_vm1, %v1260_v1  }
 0x138   :  { %2440 = vst.msk [vmem:[%s5732_s1 + $0x13a] sm:$0x10] %vm16_vm1, %v1260_v1   ;;  %2441 = vst.msk [vmem:[%s5732_s1 + $0x279] sm:$0x20] %vm16_vm1, %v1260_v1  }
 0x139   :  { %2442 = vst.msk [vmem:[%s5732_s1 + $0x3f] sm:$0x1] %vm16_vm1, %v1280_v2   ;;  %2443 = vst.msk [vmem:[%s5732_s1 + $0x17e] sm:$0x2] %vm16_vm1, %v1280_v2  }
 0x13a   :  { %2444 = vst.msk [vmem:[%s5732_s1 + $0xbd] sm:$0x4] %vm16_vm1, %v1280_v2   ;;  %2445 = vst.msk [vmem:[%s5732_s1 + $0x1fc] sm:$0x8] %vm16_vm1, %v1280_v2   ;;  %v1668_v37 = vpop.permute.xlu0 %1667   ;;  %v1680_v38 = vpop.permute.xlu1 %1679  }
 0x13b   :  { %2446 = vst.msk [vmem:[%s5732_s1 + $0x13b] sm:$0x10] %vm16_vm1, %v1280_v2   ;;  %2447 = vst.msk [vmem:[%s5732_s1 + $0x27a] sm:$0x20] %vm16_vm1, %v1280_v2  }
 0x13c   :  { %17 = vst.msk [vmem:[%s5732_s1] sm:$0x1] %vm16_vm1, %v15_v4   ;;  %2065 = vst.msk [vmem:[%s5732_s1 + $0x13f] sm:$0x2] %vm16_vm1, %v15_v4  }
 0x13d   :  { %2068 = vst.msk [vmem:[%s5732_s1 + $0x100] sm:$0x1] %vm16_vm1, %v28_v6   ;;  %2069 = vst.msk [vmem:[%s5732_s1 + $0x23f] sm:$0x2] %vm16_vm1, %v28_v6  }
 0x13e   :  { %2448 = vst.msk [vmem:[%s5732_s1 + $0x40] sm:$0x1] %vm16_vm1, %v1296_v7   ;;  %2449 = vst.msk [vmem:[%s5732_s1 + $0x17f] sm:$0x2] %vm16_vm1, %v1296_v7   ;;  %v1692_v39 = vpop.permute.xlu0 %1691   ;;  %v1704_v40 = vpop.permute.xlu1 %1703  }
 0x13f   :  { %2450 = vst.msk [vmem:[%s5732_s1 + $0xbe] sm:$0x4] %vm16_vm1, %v1296_v7   ;;  %2451 = vst.msk [vmem:[%s5732_s1 + $0x1fd] sm:$0x8] %vm16_vm1, %v1296_v7  }
 0x140   :  { %2452 = vst.msk [vmem:[%s5732_s1 + $0x41] sm:$0x1] %vm16_vm1, %v1308_v8   ;;  %2453 = vst.msk [vmem:[%s5732_s1 + $0x180] sm:$0x2] %vm16_vm1, %v1308_v8  }
 0x141   :  { %2454 = vst.msk [vmem:[%s5732_s1 + $0xbf] sm:$0x4] %vm16_vm1, %v1308_v8   ;;  %2455 = vst.msk [vmem:[%s5732_s1 + $0x1fe] sm:$0x8] %vm16_vm1, %v1308_v8  }
 0x142   :  { %2456 = vst.msk [vmem:[%s5732_s1 + $0x42] sm:$0x1] %vm16_vm1, %v1320_v9   ;;  %2457 = vst.msk [vmem:[%s5732_s1 + $0x181] sm:$0x2] %vm16_vm1, %v1320_v9   ;;  %v1716_v41 = vpop.permute.xlu0 %1715   ;;  %v1728_v42 = vpop.permute.xlu1 %1727  }
 0x143   :  { %2458 = vst.msk [vmem:[%s5732_s1 + $0xc0] sm:$0x4] %vm16_vm1, %v1320_v9   ;;  %2459 = vst.msk [vmem:[%s5732_s1 + $0x1ff] sm:$0x8] %vm16_vm1, %v1320_v9  }
 0x144   :  { %2460 = vst.msk [vmem:[%s5732_s1 + $0x43] sm:$0x1] %vm16_vm1, %v1332_v10   ;;  %2461 = vst.msk [vmem:[%s5732_s1 + $0x182] sm:$0x2] %vm16_vm1, %v1332_v10  }
 0x145   :  { %2462 = vst.msk [vmem:[%s5732_s1 + $0xc1] sm:$0x4] %vm16_vm1, %v1332_v10   ;;  %2463 = vst.msk [vmem:[%s5732_s1 + $0x200] sm:$0x8] %vm16_vm1, %v1332_v10  }
 0x146   :  { %2464 = vst.msk [vmem:[%s5732_s1 + $0x44] sm:$0x1] %vm16_vm1, %v1344_v11   ;;  %2465 = vst.msk [vmem:[%s5732_s1 + $0x183] sm:$0x2] %vm16_vm1, %v1344_v11   ;;  %v1740_v43 = vpop.permute.xlu0 %1739   ;;  %v1752_v44 = vpop.permute.xlu1 %1751  }
 0x147   :  { %2466 = vst.msk [vmem:[%s5732_s1 + $0xc2] sm:$0x4] %vm16_vm1, %v1344_v11   ;;  %2467 = vst.msk [vmem:[%s5732_s1 + $0x201] sm:$0x8] %vm16_vm1, %v1344_v11  }
 0x148   :  { %2468 = vst.msk [vmem:[%s5732_s1 + $0x45] sm:$0x1] %vm16_vm1, %v1356_v12   ;;  %2469 = vst.msk [vmem:[%s5732_s1 + $0x184] sm:$0x2] %vm16_vm1, %v1356_v12  }
 0x149   :  { %2470 = vst.msk [vmem:[%s5732_s1 + $0xc3] sm:$0x4] %vm16_vm1, %v1356_v12   ;;  %2471 = vst.msk [vmem:[%s5732_s1 + $0x202] sm:$0x8] %vm16_vm1, %v1356_v12  }
 0x14a   :  { %2472 = vst.msk [vmem:[%s5732_s1 + $0x46] sm:$0x1] %vm16_vm1, %v1368_v13   ;;  %2473 = vst.msk [vmem:[%s5732_s1 + $0x185] sm:$0x2] %vm16_vm1, %v1368_v13   ;;  %v1764_v45 = vpop.permute.xlu0 %1763   ;;  %v1776_v46 = vpop.permute.xlu1 %1775  }
 0x14b   :  { %2474 = vst.msk [vmem:[%s5732_s1 + $0xc4] sm:$0x4] %vm16_vm1, %v1368_v13   ;;  %2475 = vst.msk [vmem:[%s5732_s1 + $0x203] sm:$0x8] %vm16_vm1, %v1368_v13  }
 0x14c   :  { %2476 = vst.msk [vmem:[%s5732_s1 + $0x47] sm:$0x1] %vm16_vm1, %v1380_v14   ;;  %2477 = vst.msk [vmem:[%s5732_s1 + $0x186] sm:$0x2] %vm16_vm1, %v1380_v14  }
 0x14d   :  { %2478 = vst.msk [vmem:[%s5732_s1 + $0xc5] sm:$0x4] %vm16_vm1, %v1380_v14   ;;  %2479 = vst.msk [vmem:[%s5732_s1 + $0x204] sm:$0x8] %vm16_vm1, %v1380_v14  }
 0x14e   :  { %2480 = vst.msk [vmem:[%s5732_s1 + $0x48] sm:$0x1] %vm16_vm1, %v1392_v15   ;;  %2481 = vst.msk [vmem:[%s5732_s1 + $0x187] sm:$0x2] %vm16_vm1, %v1392_v15   ;;  %v1788_v47 = vpop.permute.xlu0 %1787   ;;  %v1800_v48 = vpop.permute.xlu1 %1799  }
 0x14f   :  { %2482 = vst.msk [vmem:[%s5732_s1 + $0xc6] sm:$0x4] %vm16_vm1, %v1392_v15   ;;  %2483 = vst.msk [vmem:[%s5732_s1 + $0x205] sm:$0x8] %vm16_vm1, %v1392_v15  }
 0x150   :  { %2484 = vst.msk [vmem:[%s5732_s1 + $0x49] sm:$0x1] %vm16_vm1, %v1404_v16   ;;  %2485 = vst.msk [vmem:[%s5732_s1 + $0x188] sm:$0x2] %vm16_vm1, %v1404_v16  }
 0x151   :  { %2486 = vst.msk [vmem:[%s5732_s1 + $0xc7] sm:$0x4] %vm16_vm1, %v1404_v16   ;;  %2487 = vst.msk [vmem:[%s5732_s1 + $0x206] sm:$0x8] %vm16_vm1, %v1404_v16  }
 0x152   :  { %2488 = vst.msk [vmem:[%s5732_s1 + $0x4a] sm:$0x1] %vm16_vm1, %v1416_v17   ;;  %2489 = vst.msk [vmem:[%s5732_s1 + $0x189] sm:$0x2] %vm16_vm1, %v1416_v17   ;;  %v1812_v49 = vpop.permute.xlu0 %1811   ;;  %v1824_v50 = vpop.permute.xlu1 %1823  }
 0x153   :  { %2490 = vst.msk [vmem:[%s5732_s1 + $0xc8] sm:$0x4] %vm16_vm1, %v1416_v17   ;;  %2491 = vst.msk [vmem:[%s5732_s1 + $0x207] sm:$0x8] %vm16_vm1, %v1416_v17  }
 0x154   :  { %2492 = vst.msk [vmem:[%s5732_s1 + $0x4b] sm:$0x1] %vm16_vm1, %v1428_v18   ;;  %2493 = vst.msk [vmem:[%s5732_s1 + $0x18a] sm:$0x2] %vm16_vm1, %v1428_v18  }
 0x155   :  { %2494 = vst.msk [vmem:[%s5732_s1 + $0xc9] sm:$0x4] %vm16_vm1, %v1428_v18   ;;  %2495 = vst.msk [vmem:[%s5732_s1 + $0x208] sm:$0x8] %vm16_vm1, %v1428_v18  }
 0x156   :  { %2496 = vst.msk [vmem:[%s5732_s1 + $0x4c] sm:$0x1] %vm16_vm1, %v1440_v19   ;;  %2497 = vst.msk [vmem:[%s5732_s1 + $0x18b] sm:$0x2] %vm16_vm1, %v1440_v19   ;;  %v1836_v51 = vpop.permute.xlu0 %1835   ;;  %v1848_v52 = vpop.permute.xlu1 %1847  }
 0x157   :  { %2498 = vst.msk [vmem:[%s5732_s1 + $0xca] sm:$0x4] %vm16_vm1, %v1440_v19   ;;  %2499 = vst.msk [vmem:[%s5732_s1 + $0x209] sm:$0x8] %vm16_vm1, %v1440_v19  }
 0x158   :  { %2500 = vst.msk [vmem:[%s5732_s1 + $0x4d] sm:$0x1] %vm16_vm1, %v1452_v20   ;;  %2501 = vst.msk [vmem:[%s5732_s1 + $0x18c] sm:$0x2] %vm16_vm1, %v1452_v20  }
 0x159   :  { %2502 = vst.msk [vmem:[%s5732_s1 + $0xcb] sm:$0x4] %vm16_vm1, %v1452_v20   ;;  %2503 = vst.msk [vmem:[%s5732_s1 + $0x20a] sm:$0x8] %vm16_vm1, %v1452_v20  }
 0x15a   :  { %2504 = vst.msk [vmem:[%s5732_s1 + $0x4e] sm:$0x1] %vm16_vm1, %v1464_v21   ;;  %2505 = vst.msk [vmem:[%s5732_s1 + $0x18d] sm:$0x2] %vm16_vm1, %v1464_v21   ;;  %v1860_v53 = vpop.permute.xlu0 %1859   ;;  %v1872_v54 = vpop.permute.xlu1 %1871  }
 0x15b   :  { %2506 = vst.msk [vmem:[%s5732_s1 + $0xcc] sm:$0x4] %vm16_vm1, %v1464_v21   ;;  %2507 = vst.msk [vmem:[%s5732_s1 + $0x20b] sm:$0x8] %vm16_vm1, %v1464_v21  }
 0x15c   :  { %2508 = vst.msk [vmem:[%s5732_s1 + $0x4f] sm:$0x1] %vm16_vm1, %v1476_v22   ;;  %2509 = vst.msk [vmem:[%s5732_s1 + $0x18e] sm:$0x2] %vm16_vm1, %v1476_v22  }
 0x15d   :  { %2510 = vst.msk [vmem:[%s5732_s1 + $0xcd] sm:$0x4] %vm16_vm1, %v1476_v22   ;;  %2511 = vst.msk [vmem:[%s5732_s1 + $0x20c] sm:$0x8] %vm16_vm1, %v1476_v22  }
 0x15e   :  { %2512 = vst.msk [vmem:[%s5732_s1 + $0x50] sm:$0x1] %vm16_vm1, %v1488_v23   ;;  %2513 = vst.msk [vmem:[%s5732_s1 + $0x18f] sm:$0x2] %vm16_vm1, %v1488_v23   ;;  %v1884_v55 = vpop.permute.xlu0 %1883   ;;  %v1896_v56 = vpop.permute.xlu1 %1895  }
 0x15f   :  { %2514 = vst.msk [vmem:[%s5732_s1 + $0xce] sm:$0x4] %vm16_vm1, %v1488_v23   ;;  %2515 = vst.msk [vmem:[%s5732_s1 + $0x20d] sm:$0x8] %vm16_vm1, %v1488_v23  }
 0x160   :  { %2516 = vst.msk [vmem:[%s5732_s1 + $0x51] sm:$0x1] %vm16_vm1, %v1500_v24   ;;  %2517 = vst.msk [vmem:[%s5732_s1 + $0x190] sm:$0x2] %vm16_vm1, %v1500_v24  }
 0x161   :  { %2518 = vst.msk [vmem:[%s5732_s1 + $0xcf] sm:$0x4] %vm16_vm1, %v1500_v24   ;;  %2519 = vst.msk [vmem:[%s5732_s1 + $0x20e] sm:$0x8] %vm16_vm1, %v1500_v24  }
 0x162   :  { %2520 = vst.msk [vmem:[%s5732_s1 + $0x52] sm:$0x1] %vm16_vm1, %v1512_v25   ;;  %2521 = vst.msk [vmem:[%s5732_s1 + $0x191] sm:$0x2] %vm16_vm1, %v1512_v25   ;;  %v1908_v57 = vpop.permute.xlu0 %1907   ;;  %v1920_v58 = vpop.permute.xlu1 %1919  }
 0x163   :  { %2522 = vst.msk [vmem:[%s5732_s1 + $0xd0] sm:$0x4] %vm16_vm1, %v1512_v25   ;;  %2523 = vst.msk [vmem:[%s5732_s1 + $0x20f] sm:$0x8] %vm16_vm1, %v1512_v25  }
 0x164   :  { %2524 = vst.msk [vmem:[%s5732_s1 + $0x53] sm:$0x1] %vm16_vm1, %v1524_v26   ;;  %2525 = vst.msk [vmem:[%s5732_s1 + $0x192] sm:$0x2] %vm16_vm1, %v1524_v26  }
 0x165   :  { %2526 = vst.msk [vmem:[%s5732_s1 + $0xd1] sm:$0x4] %vm16_vm1, %v1524_v26   ;;  %2527 = vst.msk [vmem:[%s5732_s1 + $0x210] sm:$0x8] %vm16_vm1, %v1524_v26  }
 0x166   :  { %2528 = vst.msk [vmem:[%s5732_s1 + $0x54] sm:$0x1] %vm16_vm1, %v1536_v3   ;;  %2529 = vst.msk [vmem:[%s5732_s1 + $0x193] sm:$0x2] %vm16_vm1, %v1536_v3   ;;  %v1932_v59 = vpop.permute.xlu0 %1931   ;;  %v1944_v60 = vpop.permute.xlu1 %1943  }
 0x167   :  { %2530 = vst.msk [vmem:[%s5732_s1 + $0xd2] sm:$0x4] %vm16_vm1, %v1536_v3   ;;  %2531 = vst.msk [vmem:[%s5732_s1 + $0x211] sm:$0x8] %vm16_vm1, %v1536_v3  }
 0x168   :  { %2532 = vst.msk [vmem:[%s5732_s1 + $0x55] sm:$0x1] %vm16_vm1, %v1548_v27   ;;  %2533 = vst.msk [vmem:[%s5732_s1 + $0x194] sm:$0x2] %vm16_vm1, %v1548_v27  }
 0x169   :  { %2534 = vst.msk [vmem:[%s5732_s1 + $0xd3] sm:$0x4] %vm16_vm1, %v1548_v27   ;;  %2535 = vst.msk [vmem:[%s5732_s1 + $0x212] sm:$0x8] %vm16_vm1, %v1548_v27  }
 0x16a   :  { %2536 = vst.msk [vmem:[%s5732_s1 + $0x56] sm:$0x1] %vm16_vm1, %v1560_v28   ;;  %2537 = vst.msk [vmem:[%s5732_s1 + $0x195] sm:$0x2] %vm16_vm1, %v1560_v28   ;;  %v1956_v61 = vpop.permute.xlu0 %1955   ;;  %v1968_v62 = vpop.permute.xlu1 %1967  }
 0x16b   :  { %2538 = vst.msk [vmem:[%s5732_s1 + $0xd4] sm:$0x4] %vm16_vm1, %v1560_v28   ;;  %2539 = vst.msk [vmem:[%s5732_s1 + $0x213] sm:$0x8] %vm16_vm1, %v1560_v28  }
 0x16c   :  { %2540 = vst.msk [vmem:[%s5732_s1 + $0x57] sm:$0x1] %vm16_vm1, %v1572_v29   ;;  %2541 = vst.msk [vmem:[%s5732_s1 + $0x196] sm:$0x2] %vm16_vm1, %v1572_v29  }
 0x16d   :  { %2542 = vst.msk [vmem:[%s5732_s1 + $0xd5] sm:$0x4] %vm16_vm1, %v1572_v29   ;;  %2543 = vst.msk [vmem:[%s5732_s1 + $0x214] sm:$0x8] %vm16_vm1, %v1572_v29  }
 0x16e   :  { %2544 = vst.msk [vmem:[%s5732_s1 + $0x58] sm:$0x1] %vm16_vm1, %v1584_v30   ;;  %2545 = vst.msk [vmem:[%s5732_s1 + $0x197] sm:$0x2] %vm16_vm1, %v1584_v30   ;;  %v1980_v63 = vpop.permute.xlu0 %1979   ;;  %v1992_v0 = vpop.permute.xlu1 %1991  }
 0x16f   :  { %2546 = vst.msk [vmem:[%s5732_s1 + $0xd6] sm:$0x4] %vm16_vm1, %v1584_v30   ;;  %2547 = vst.msk [vmem:[%s5732_s1 + $0x215] sm:$0x8] %vm16_vm1, %v1584_v30  }
 0x170   :  { %2548 = vst.msk [vmem:[%s5732_s1 + $0x59] sm:$0x1] %vm16_vm1, %v1596_v31   ;;  %2549 = vst.msk [vmem:[%s5732_s1 + $0x198] sm:$0x2] %vm16_vm1, %v1596_v31  }
 0x171   :  { %2550 = vst.msk [vmem:[%s5732_s1 + $0xd7] sm:$0x4] %vm16_vm1, %v1596_v31   ;;  %2551 = vst.msk [vmem:[%s5732_s1 + $0x216] sm:$0x8] %vm16_vm1, %v1596_v31  }
 0x172   :  { %2552 = vst.msk [vmem:[%s5732_s1 + $0x5a] sm:$0x1] %vm16_vm1, %v1608_v32   ;;  %2553 = vst.msk [vmem:[%s5732_s1 + $0x199] sm:$0x2] %vm16_vm1, %v1608_v32   ;;  %v2004_v1 = vpop.permute.xlu0 %2003   ;;  %v2016_v2 = vpop.permute.xlu1 %2015  }
 0x173   :  { %2554 = vst.msk [vmem:[%s5732_s1 + $0xd8] sm:$0x4] %vm16_vm1, %v1608_v32   ;;  %2555 = vst.msk [vmem:[%s5732_s1 + $0x217] sm:$0x8] %vm16_vm1, %v1608_v32  }
 0x174   :  { %2556 = vst.msk [vmem:[%s5732_s1 + $0x5b] sm:$0x1] %vm16_vm1, %v1620_v33   ;;  %2557 = vst.msk [vmem:[%s5732_s1 + $0x19a] sm:$0x2] %vm16_vm1, %v1620_v33  }
 0x175   :  { %2558 = vst.msk [vmem:[%s5732_s1 + $0xd9] sm:$0x4] %vm16_vm1, %v1620_v33   ;;  %2559 = vst.msk [vmem:[%s5732_s1 + $0x218] sm:$0x8] %vm16_vm1, %v1620_v33  }
 0x176   :  { %2560 = vst.msk [vmem:[%s5732_s1 + $0x5c] sm:$0x1] %vm16_vm1, %v1632_v34   ;;  %2561 = vst.msk [vmem:[%s5732_s1 + $0x19b] sm:$0x2] %vm16_vm1, %v1632_v34   ;;  %v2028_v4 = vpop.permute.xlu0 %2027   ;;  %v2040_v5 = vpop.permute.xlu1 %2039  }
 0x177   :  { %2562 = vst.msk [vmem:[%s5732_s1 + $0xda] sm:$0x4] %vm16_vm1, %v1632_v34   ;;  %2563 = vst.msk [vmem:[%s5732_s1 + $0x219] sm:$0x8] %vm16_vm1, %v1632_v34  }
 0x178   :  { %2564 = vst.msk [vmem:[%s5732_s1 + $0x5d] sm:$0x1] %vm16_vm1, %v1644_v35   ;;  %2565 = vst.msk [vmem:[%s5732_s1 + $0x19c] sm:$0x2] %vm16_vm1, %v1644_v35  }
 0x179   :  { %2566 = vst.msk [vmem:[%s5732_s1 + $0xdb] sm:$0x4] %vm16_vm1, %v1644_v35   ;;  %2567 = vst.msk [vmem:[%s5732_s1 + $0x21a] sm:$0x8] %vm16_vm1, %v1644_v35  }
 0x17a   :  { %2568 = vst.msk [vmem:[%s5732_s1 + $0x5e] sm:$0x1] %vm16_vm1, %v1656_v36   ;;  %2569 = vst.msk [vmem:[%s5732_s1 + $0x19d] sm:$0x2] %vm16_vm1, %v1656_v36   ;;  %v2052_v6 = vpop.permute.xlu0 %2051  }
 0x17b   :  { %2570 = vst.msk [vmem:[%s5732_s1 + $0xdc] sm:$0x4] %vm16_vm1, %v1656_v36   ;;  %2571 = vst.msk [vmem:[%s5732_s1 + $0x21b] sm:$0x8] %vm16_vm1, %v1656_v36  }
 0x17c   :  { %2572 = vst.msk [vmem:[%s5732_s1 + $0x5f] sm:$0x1] %vm16_vm1, %v1668_v37   ;;  %2573 = vst.msk [vmem:[%s5732_s1 + $0x19e] sm:$0x2] %vm16_vm1, %v1668_v37  }
 0x17d   :  { %2574 = vst.msk [vmem:[%s5732_s1 + $0xdd] sm:$0x4] %vm16_vm1, %v1668_v37   ;;  %2575 = vst.msk [vmem:[%s5732_s1 + $0x21c] sm:$0x8] %vm16_vm1, %v1668_v37  }
 0x17e   :  { %2576 = vst.msk [vmem:[%s5732_s1 + $0x60] sm:$0x1] %vm16_vm1, %v1680_v38   ;;  %2577 = vst.msk [vmem:[%s5732_s1 + $0x19f] sm:$0x2] %vm16_vm1, %v1680_v38  }
 0x17f   :  { %2578 = vst.msk [vmem:[%s5732_s1 + $0xde] sm:$0x4] %vm16_vm1, %v1680_v38   ;;  %2579 = vst.msk [vmem:[%s5732_s1 + $0x21d] sm:$0x8] %vm16_vm1, %v1680_v38  }
 0x180   :  { %2580 = vst.msk [vmem:[%s5732_s1 + $0x61] sm:$0x1] %vm16_vm1, %v1692_v39   ;;  %2581 = vst.msk [vmem:[%s5732_s1 + $0x1a0] sm:$0x2] %vm16_vm1, %v1692_v39  }
 0x181   :  { %2582 = vst.msk [vmem:[%s5732_s1 + $0xdf] sm:$0x4] %vm16_vm1, %v1692_v39   ;;  %2583 = vst.msk [vmem:[%s5732_s1 + $0x21e] sm:$0x8] %vm16_vm1, %v1692_v39  }
 0x182   :  { %2584 = vst.msk [vmem:[%s5732_s1 + $0x62] sm:$0x1] %vm16_vm1, %v1704_v40   ;;  %2585 = vst.msk [vmem:[%s5732_s1 + $0x1a1] sm:$0x2] %vm16_vm1, %v1704_v40  }
 0x183   :  { %2586 = vst.msk [vmem:[%s5732_s1 + $0xe0] sm:$0x4] %vm16_vm1, %v1704_v40   ;;  %2587 = vst.msk [vmem:[%s5732_s1 + $0x21f] sm:$0x8] %vm16_vm1, %v1704_v40  }
 0x184   :  { %2588 = vst.msk [vmem:[%s5732_s1 + $0x63] sm:$0x1] %vm16_vm1, %v1716_v41   ;;  %2589 = vst.msk [vmem:[%s5732_s1 + $0x1a2] sm:$0x2] %vm16_vm1, %v1716_v41  }
 0x185   :  { %2590 = vst.msk [vmem:[%s5732_s1 + $0xe1] sm:$0x4] %vm16_vm1, %v1716_v41   ;;  %2591 = vst.msk [vmem:[%s5732_s1 + $0x220] sm:$0x8] %vm16_vm1, %v1716_v41  }
 0x186   :  { %2592 = vst.msk [vmem:[%s5732_s1 + $0x64] sm:$0x1] %vm16_vm1, %v1728_v42   ;;  %2593 = vst.msk [vmem:[%s5732_s1 + $0x1a3] sm:$0x2] %vm16_vm1, %v1728_v42  }
 0x187   :  { %2594 = vst.msk [vmem:[%s5732_s1 + $0xe2] sm:$0x4] %vm16_vm1, %v1728_v42   ;;  %2595 = vst.msk [vmem:[%s5732_s1 + $0x221] sm:$0x8] %vm16_vm1, %v1728_v42  }
 0x188   :  { %2596 = vst.msk [vmem:[%s5732_s1 + $0x65] sm:$0x1] %vm16_vm1, %v1740_v43   ;;  %2597 = vst.msk [vmem:[%s5732_s1 + $0x1a4] sm:$0x2] %vm16_vm1, %v1740_v43  }
 0x189   :  { %2598 = vst.msk [vmem:[%s5732_s1 + $0xe3] sm:$0x4] %vm16_vm1, %v1740_v43   ;;  %2599 = vst.msk [vmem:[%s5732_s1 + $0x222] sm:$0x8] %vm16_vm1, %v1740_v43  }
 0x18a   :  { %2600 = vst.msk [vmem:[%s5732_s1 + $0x66] sm:$0x1] %vm16_vm1, %v1752_v44   ;;  %2601 = vst.msk [vmem:[%s5732_s1 + $0x1a5] sm:$0x2] %vm16_vm1, %v1752_v44  }
 0x18b   :  { %2602 = vst.msk [vmem:[%s5732_s1 + $0xe4] sm:$0x4] %vm16_vm1, %v1752_v44   ;;  %2603 = vst.msk [vmem:[%s5732_s1 + $0x223] sm:$0x8] %vm16_vm1, %v1752_v44  }
 0x18c   :  { %2604 = vst.msk [vmem:[%s5732_s1 + $0x67] sm:$0x1] %vm16_vm1, %v1764_v45   ;;  %2605 = vst.msk [vmem:[%s5732_s1 + $0x1a6] sm:$0x2] %vm16_vm1, %v1764_v45  }
 0x18d   :  { %2606 = vst.msk [vmem:[%s5732_s1 + $0xe5] sm:$0x4] %vm16_vm1, %v1764_v45   ;;  %2607 = vst.msk [vmem:[%s5732_s1 + $0x224] sm:$0x8] %vm16_vm1, %v1764_v45  }
 0x18e   :  { %2608 = vst.msk [vmem:[%s5732_s1 + $0x68] sm:$0x1] %vm16_vm1, %v1776_v46   ;;  %2609 = vst.msk [vmem:[%s5732_s1 + $0x1a7] sm:$0x2] %vm16_vm1, %v1776_v46  }
 0x18f   :  { %2610 = vst.msk [vmem:[%s5732_s1 + $0xe6] sm:$0x4] %vm16_vm1, %v1776_v46   ;;  %2611 = vst.msk [vmem:[%s5732_s1 + $0x225] sm:$0x8] %vm16_vm1, %v1776_v46  }
 0x190   :  { %2612 = vst.msk [vmem:[%s5732_s1 + $0x69] sm:$0x1] %vm16_vm1, %v1788_v47   ;;  %2613 = vst.msk [vmem:[%s5732_s1 + $0x1a8] sm:$0x2] %vm16_vm1, %v1788_v47  }
 0x191   :  { %2614 = vst.msk [vmem:[%s5732_s1 + $0xe7] sm:$0x4] %vm16_vm1, %v1788_v47   ;;  %2615 = vst.msk [vmem:[%s5732_s1 + $0x226] sm:$0x8] %vm16_vm1, %v1788_v47  }
 0x192   :  { %2616 = vst.msk [vmem:[%s5732_s1 + $0x6a] sm:$0x1] %vm16_vm1, %v1800_v48   ;;  %2617 = vst.msk [vmem:[%s5732_s1 + $0x1a9] sm:$0x2] %vm16_vm1, %v1800_v48  }
 0x193   :  { %2618 = vst.msk [vmem:[%s5732_s1 + $0xe8] sm:$0x4] %vm16_vm1, %v1800_v48   ;;  %2619 = vst.msk [vmem:[%s5732_s1 + $0x227] sm:$0x8] %vm16_vm1, %v1800_v48  }
 0x194   :  { %2620 = vst.msk [vmem:[%s5732_s1 + $0x6b] sm:$0x1] %vm16_vm1, %v1812_v49   ;;  %2621 = vst.msk [vmem:[%s5732_s1 + $0x1aa] sm:$0x2] %vm16_vm1, %v1812_v49  }
 0x195   :  { %2622 = vst.msk [vmem:[%s5732_s1 + $0xe9] sm:$0x4] %vm16_vm1, %v1812_v49   ;;  %2623 = vst.msk [vmem:[%s5732_s1 + $0x228] sm:$0x8] %vm16_vm1, %v1812_v49  }
 0x196   :  { %2624 = vst.msk [vmem:[%s5732_s1 + $0x6c] sm:$0x1] %vm16_vm1, %v1824_v50   ;;  %2625 = vst.msk [vmem:[%s5732_s1 + $0x1ab] sm:$0x2] %vm16_vm1, %v1824_v50  }
 0x197   :  { %2626 = vst.msk [vmem:[%s5732_s1 + $0xea] sm:$0x4] %vm16_vm1, %v1824_v50   ;;  %2627 = vst.msk [vmem:[%s5732_s1 + $0x229] sm:$0x8] %vm16_vm1, %v1824_v50  }
 0x198   :  { %2628 = vst.msk [vmem:[%s5732_s1 + $0x6d] sm:$0x1] %vm16_vm1, %v1836_v51   ;;  %2629 = vst.msk [vmem:[%s5732_s1 + $0x1ac] sm:$0x2] %vm16_vm1, %v1836_v51  }
 0x199   :  { %2630 = vst.msk [vmem:[%s5732_s1 + $0xeb] sm:$0x4] %vm16_vm1, %v1836_v51   ;;  %2631 = vst.msk [vmem:[%s5732_s1 + $0x22a] sm:$0x8] %vm16_vm1, %v1836_v51  }
 0x19a   :  { %2632 = vst.msk [vmem:[%s5732_s1 + $0x6e] sm:$0x1] %vm16_vm1, %v1848_v52   ;;  %2633 = vst.msk [vmem:[%s5732_s1 + $0x1ad] sm:$0x2] %vm16_vm1, %v1848_v52  }
 0x19b   :  { %2634 = vst.msk [vmem:[%s5732_s1 + $0xec] sm:$0x4] %vm16_vm1, %v1848_v52   ;;  %2635 = vst.msk [vmem:[%s5732_s1 + $0x22b] sm:$0x8] %vm16_vm1, %v1848_v52  }
 0x19c   :  { %2636 = vst.msk [vmem:[%s5732_s1 + $0x6f] sm:$0x1] %vm16_vm1, %v1860_v53   ;;  %2637 = vst.msk [vmem:[%s5732_s1 + $0x1ae] sm:$0x2] %vm16_vm1, %v1860_v53  }
 0x19d   :  { %2638 = vst.msk [vmem:[%s5732_s1 + $0xed] sm:$0x4] %vm16_vm1, %v1860_v53   ;;  %2639 = vst.msk [vmem:[%s5732_s1 + $0x22c] sm:$0x8] %vm16_vm1, %v1860_v53  }
 0x19e   :  { %2640 = vst.msk [vmem:[%s5732_s1 + $0x70] sm:$0x1] %vm16_vm1, %v1872_v54   ;;  %2641 = vst.msk [vmem:[%s5732_s1 + $0x1af] sm:$0x2] %vm16_vm1, %v1872_v54  }
 0x19f   :  { %2642 = vst.msk [vmem:[%s5732_s1 + $0xee] sm:$0x4] %vm16_vm1, %v1872_v54   ;;  %2643 = vst.msk [vmem:[%s5732_s1 + $0x22d] sm:$0x8] %vm16_vm1, %v1872_v54  }
 0x1a0   :  { %2644 = vst.msk [vmem:[%s5732_s1 + $0x71] sm:$0x1] %vm16_vm1, %v1884_v55   ;;  %2645 = vst.msk [vmem:[%s5732_s1 + $0x1b0] sm:$0x2] %vm16_vm1, %v1884_v55  }
 0x1a1   :  { %2646 = vst.msk [vmem:[%s5732_s1 + $0xef] sm:$0x4] %vm16_vm1, %v1884_v55   ;;  %2647 = vst.msk [vmem:[%s5732_s1 + $0x22e] sm:$0x8] %vm16_vm1, %v1884_v55  }
 0x1a2   :  { %2648 = vst.msk [vmem:[%s5732_s1 + $0x72] sm:$0x1] %vm16_vm1, %v1896_v56   ;;  %2649 = vst.msk [vmem:[%s5732_s1 + $0x1b1] sm:$0x2] %vm16_vm1, %v1896_v56  }
 0x1a3   :  { %2650 = vst.msk [vmem:[%s5732_s1 + $0xf0] sm:$0x4] %vm16_vm1, %v1896_v56   ;;  %2651 = vst.msk [vmem:[%s5732_s1 + $0x22f] sm:$0x8] %vm16_vm1, %v1896_v56  }
 0x1a4   :  { %2652 = vst.msk [vmem:[%s5732_s1 + $0x73] sm:$0x1] %vm16_vm1, %v1908_v57   ;;  %2653 = vst.msk [vmem:[%s5732_s1 + $0x1b2] sm:$0x2] %vm16_vm1, %v1908_v57  }
 0x1a5   :  { %2654 = vst.msk [vmem:[%s5732_s1 + $0xf1] sm:$0x4] %vm16_vm1, %v1908_v57   ;;  %2655 = vst.msk [vmem:[%s5732_s1 + $0x230] sm:$0x8] %vm16_vm1, %v1908_v57  }
 0x1a6   :  { %2656 = vst.msk [vmem:[%s5732_s1 + $0x74] sm:$0x1] %vm16_vm1, %v1920_v58   ;;  %2657 = vst.msk [vmem:[%s5732_s1 + $0x1b3] sm:$0x2] %vm16_vm1, %v1920_v58  }
 0x1a7   :  { %2658 = vst.msk [vmem:[%s5732_s1 + $0xf2] sm:$0x4] %vm16_vm1, %v1920_v58   ;;  %2659 = vst.msk [vmem:[%s5732_s1 + $0x231] sm:$0x8] %vm16_vm1, %v1920_v58  }
 0x1a8   :  { %2660 = vst.msk [vmem:[%s5732_s1 + $0x75] sm:$0x1] %vm16_vm1, %v1932_v59   ;;  %2661 = vst.msk [vmem:[%s5732_s1 + $0x1b4] sm:$0x2] %vm16_vm1, %v1932_v59  }
 0x1a9   :  { %2662 = vst.msk [vmem:[%s5732_s1 + $0xf3] sm:$0x4] %vm16_vm1, %v1932_v59   ;;  %2663 = vst.msk [vmem:[%s5732_s1 + $0x232] sm:$0x8] %vm16_vm1, %v1932_v59  }
 0x1aa   :  { %2664 = vst.msk [vmem:[%s5732_s1 + $0x76] sm:$0x1] %vm16_vm1, %v1944_v60   ;;  %2665 = vst.msk [vmem:[%s5732_s1 + $0x1b5] sm:$0x2] %vm16_vm1, %v1944_v60  }
 0x1ab   :  { %2666 = vst.msk [vmem:[%s5732_s1 + $0xf4] sm:$0x4] %vm16_vm1, %v1944_v60   ;;  %2667 = vst.msk [vmem:[%s5732_s1 + $0x233] sm:$0x8] %vm16_vm1, %v1944_v60  }
 0x1ac   :  { %2668 = vst.msk [vmem:[%s5732_s1 + $0x77] sm:$0x1] %vm16_vm1, %v1956_v61   ;;  %2669 = vst.msk [vmem:[%s5732_s1 + $0x1b6] sm:$0x2] %vm16_vm1, %v1956_v61  }
 0x1ad   :  { %2670 = vst.msk [vmem:[%s5732_s1 + $0xf5] sm:$0x4] %vm16_vm1, %v1956_v61   ;;  %2671 = vst.msk [vmem:[%s5732_s1 + $0x234] sm:$0x8] %vm16_vm1, %v1956_v61  }
 0x1ae   :  { %2672 = vst.msk [vmem:[%s5732_s1 + $0x78] sm:$0x1] %vm16_vm1, %v1968_v62   ;;  %2673 = vst.msk [vmem:[%s5732_s1 + $0x1b7] sm:$0x2] %vm16_vm1, %v1968_v62  }
 0x1af   :  { %2674 = vst.msk [vmem:[%s5732_s1 + $0xf6] sm:$0x4] %vm16_vm1, %v1968_v62   ;;  %2675 = vst.msk [vmem:[%s5732_s1 + $0x235] sm:$0x8] %vm16_vm1, %v1968_v62  }
 0x1b0   :  { %2676 = vst.msk [vmem:[%s5732_s1 + $0x79] sm:$0x1] %vm16_vm1, %v1980_v63   ;;  %2677 = vst.msk [vmem:[%s5732_s1 + $0x1b8] sm:$0x2] %vm16_vm1, %v1980_v63  }
 0x1b1   :  { %2678 = vst.msk [vmem:[%s5732_s1 + $0xf7] sm:$0x4] %vm16_vm1, %v1980_v63   ;;  %2679 = vst.msk [vmem:[%s5732_s1 + $0x236] sm:$0x8] %vm16_vm1, %v1980_v63  }
 0x1b2   :  { %2680 = vst.msk [vmem:[%s5732_s1 + $0x7a] sm:$0x1] %vm16_vm1, %v1992_v0   ;;  %2681 = vst.msk [vmem:[%s5732_s1 + $0x1b9] sm:$0x2] %vm16_vm1, %v1992_v0  }
 0x1b3   :  { %2682 = vst.msk [vmem:[%s5732_s1 + $0xf8] sm:$0x4] %vm16_vm1, %v1992_v0   ;;  %2683 = vst.msk [vmem:[%s5732_s1 + $0x237] sm:$0x8] %vm16_vm1, %v1992_v0  }
 0x1b4   :  { %2684 = vst.msk [vmem:[%s5732_s1 + $0x7b] sm:$0x1] %vm16_vm1, %v2004_v1   ;;  %2685 = vst.msk [vmem:[%s5732_s1 + $0x1ba] sm:$0x2] %vm16_vm1, %v2004_v1  }
 0x1b5   :  { %2686 = vst.msk [vmem:[%s5732_s1 + $0xf9] sm:$0x4] %vm16_vm1, %v2004_v1   ;;  %2687 = vst.msk [vmem:[%s5732_s1 + $0x238] sm:$0x8] %vm16_vm1, %v2004_v1  }
 0x1b6   :  { %2688 = vst.msk [vmem:[%s5732_s1 + $0x7c] sm:$0x1] %vm16_vm1, %v2016_v2   ;;  %2689 = vst.msk [vmem:[%s5732_s1 + $0x1bb] sm:$0x2] %vm16_vm1, %v2016_v2  }
 0x1b7   :  { %2690 = vst.msk [vmem:[%s5732_s1 + $0xfa] sm:$0x4] %vm16_vm1, %v2016_v2   ;;  %2691 = vst.msk [vmem:[%s5732_s1 + $0x239] sm:$0x8] %vm16_vm1, %v2016_v2  }
 0x1b8   :  { %2692 = vst.msk [vmem:[%s5732_s1 + $0x7d] sm:$0x1] %vm16_vm1, %v2028_v4   ;;  %2693 = vst.msk [vmem:[%s5732_s1 + $0x1bc] sm:$0x2] %vm16_vm1, %v2028_v4  }
 0x1b9   :  { %2694 = vst.msk [vmem:[%s5732_s1 + $0xfb] sm:$0x4] %vm16_vm1, %v2028_v4   ;;  %2695 = vst.msk [vmem:[%s5732_s1 + $0x23a] sm:$0x8] %vm16_vm1, %v2028_v4  }
 0x1ba   :  { %2696 = vst.msk [vmem:[%s5732_s1 + $0x7e] sm:$0x1] %vm16_vm1, %v2040_v5   ;;  %2697 = vst.msk [vmem:[%s5732_s1 + $0x1bd] sm:$0x2] %vm16_vm1, %v2040_v5  }
 0x1bb   :  { %2698 = vst.msk [vmem:[%s5732_s1 + $0xfc] sm:$0x4] %vm16_vm1, %v2040_v5   ;;  %2699 = vst.msk [vmem:[%s5732_s1 + $0x23b] sm:$0x8] %vm16_vm1, %v2040_v5  }
 0x1bc   :  { %2700 = vst.msk [vmem:[%s5732_s1 + $0x7f] sm:$0x1] %vm16_vm1, %v2052_v6   ;;  %2701 = vst.msk [vmem:[%s5732_s1 + $0x1be] sm:$0x2] %vm16_vm1, %v2052_v6  }
 0x1bd   :  { %2702 = vst.msk [vmem:[%s5732_s1 + $0xfd] sm:$0x4] %vm16_vm1, %v2052_v6   ;;  %2703 = vst.msk [vmem:[%s5732_s1 + $0x23c] sm:$0x8] %vm16_vm1, %v2052_v6  }

// kernel: _lambda_.1
= control target key start
LH: loop header
LB: loop body
LE: loop exit
PB: predicated region body
PF: predicated region fallthrough
CT: control target
= control target key end

     0   :  { %vm62_vm0 = vcmask 1043456   ;;  %v2521_v1 = vmov 0   ;;  %vm58_vm1 = vcmask 64512   ;;  %vm357_vm2 = vcmask 48128   ;;  %s2524_s14 = smov 125   ;;  %s3247_s0 = inlined_call_operand.vmem [shape: bf16[8,256], index: 0, kind: input, shape index: {}]   ;;  %s3248_s1 = inlined_call_operand.vmem [shape: bf16[6,8], index: 1, kind: input, shape index: {}]   ;;  %s3249_s2 = inlined_call_operand.vmem [shape: f32[6,1], index: 2, kind: input, shape index: {}]   ;;  %s3250_s5 = inlined_call_operand.vmem [shape: f32[64,1], index: 5, kind: input, shape index: {}]   ;;  %s3251_s3 = inlined_call_operand.vmem [shape: bf16[256,36], index: 3, kind: input, shape index: {}]   ;;  %s3252_s4 = inlined_call_operand.vmem [shape: bf16[64,6], index: 4, kind: input, shape index: {}]   ;;  %s3253_s6 = inlined_call_operand.vmem [shape: bf16[36,4], index: 6, kind: input, shape index: {}]   ;;  %s3254_s7 = inlined_call_operand.vmem [shape: bf16[128,256], index: 7, kind: input, shape index: {}]   ;;  %s3255_s9 = inlined_call_operand.vmem [shape: bf16[640,128], index: 9, kind: input, shape index: {}]   ;;  %s3256_s8 = inlined_call_operand.vmem [shape: f32[128,1], index: 8, kind: input, shape index: {}]   ;;  %s3257_s11 = inlined_call_operand.vmem [shape: bf16[10,640], index: 11, kind: input, shape index: {}]   ;;  %s3258_s10 = inlined_call_operand.vmem [shape: f32[640,1], index: 10, kind: input, shape index: {}]   ;;  %s3259_s12 = inlined_call_operand.vmem [shape: f32[10,1], index: 12, kind: input, shape index: {}]   ;;  %s3260_s13 = inlined_call_operand.vmem [shape: f32[10,1], index: 13, kind: output, shape index: {}]  }
   0x1   :  { %v46_v0 = vld [vmem:[%s3247_s0] sm:$0xff]  ;;  %101 = vmatprep.mubr.bf16.mxu0 %v2521_v1  ;;  %2363 = vset.pattern.permute.xlu0 %v2521_v1  ;;  %v292_v9 = vld [vmem:[%s3250_s5 + $0x18] sm:$0xff]  ;;  %v2429_v11 = vld [vmem:[%s3251_s3 + $0x48] sm:$0xff]   ;;  %vm370_vm3 = vcmask 1042432   ;;  %vm484_vm4 = vcmask 1041408   ;;  %vm471_vm5 = vcmask 293888  }
   0x2   :  { %v47_v2 = vld [vmem:[%s3249_s2] sm:$0x3f]  ;;  %v1921_v3 = vcombine.high %v46_v0, %v46_v0  ;;  %v1920_v4 = vcombine.low %v46_v0, %v46_v0  ;;  %2364 = vset.pattern.permute.xlu1 %v2521_v1  ;;  %v2430_v12 = vld [vmem:[%s3251_s3 + $0x8] sm:$0xff]   ;;  %v2431_v13 = vld [vmem:[%s3251_s3 + $0x50] sm:$0xff]   ;;  %vm2526_vm6 = vmmov 0   ;;  %vm1912_vm7 = vcmask 7168  }
   0x3   :  { %50 = vperm.xlu0 %2363, %v47_v2   ;;  %v45_v5 = vld [vmem:[%s3248_s1] sm:$0x7]  ;;  %v294_v14 = vld [vmem:[%s3250_s5 + $0x28] sm:$0xff]  ;;  %v2432_v15 = vld [vmem:[%s3251_s3 + $0x10] sm:$0xff]   ;;  %vm1914_vm8 = vcmask 1024  }
   0x4   :  { %v289_v6 = vld [vmem:[%s3250_s5] sm:$0xff]  ;;  %1922 = vmatprep.subr.msk.bf16.mxu0 %vm62_vm0, %v1921_v3  ;;  %v64_v7 = vsel %vm62_vm0, %v1920_v4, 0  ;;  %v2433_v16 = vld [vmem:[%s3251_s3 + $0x58] sm:$0xff]   ;;  %v2437_v21 = vld [vmem:[%s3251_s3 + $0x68] sm:$0xff]  }
   0x5   :  { %v2427_v8 = vld [vmem:[%s3251_s3 + $0x40] sm:$0xff]   ;;  %70 = vmatpush1.bf16.msra.mxu0 %v64_v7  ;;  %v296_v17 = vld [vmem:[%s3250_s5 + $0x38] sm:$0xff]  ;;  %v2438_v22 = vld [vmem:[%s3251_s3 + $0x28] sm:$0xff]  }
   0x6   :  { %v2428_v10 = vld [vmem:[%s3251_s3] sm:$0xff]   ;;  %2016 = vmatprep.subr.bf16.mxu1 %v2427_v8  ;;  %v2434_v18 = vld [vmem:[%s3251_s3 + $0x18] sm:$0xff]   ;;  %v2439_v23 = vld [vmem:[%s3251_s3 + $0x70] sm:$0xff]  }
   0x7   :  { %299 = vperm.xlu0 %2363, %v289_v6   ;;  %2017 = vmatpush3.bf16.msra.mxu1 %v2428_v10  ;;  %v2435_v19 = vld [vmem:[%s3251_s3 + $0x60] sm:$0xff]   ;;  %v2440_v24 = vld [vmem:[%s3251_s3 + $0x30] sm:$0xff]   ;;  %v2441_v25 = vld [vmem:[%s3251_s3 + $0x78] sm:$0xff]  }
   0x8   :  { %1923 = vmatmul.mubr.msk.bf16.vlgmr.msra.gmra.mrb[0].mxu0 %vm58_vm1, %v45_v5  ;;  %2018 = vmatprep.subr.bf16.mxu1 %v2429_v11  ;;  %v2436_v20 = vld [vmem:[%s3251_s3 + $0x20] sm:$0xff]   ;;  %v2442_v26 = vld [vmem:[%s3251_s3 + $0x38] sm:$0xff]   ;;  %v290_v37 = vld [vmem:[%s3250_s5 + $0x8] sm:$0xff] }
   0x9   :  { %v2443_v36 = vld [vmem:[%s3252_s4] sm:$0xff]   ;;  %304 = vperm.xlu1 %2364, %v290_v37   ;;  %v291_v38 = vld [vmem:[%s3250_s5 + $0x10] sm:$0xff]  ;;  %v2444_v49 = vld [vmem:[%s3252_s4 + $0x8] sm:$0xff]  }
   0xa   :  { %2217 = vmatprep.mubr.msk.bf16.mxu0 %vm357_vm2, %v2443_v36  ;;  %v293_v39 = vld [vmem:[%s3250_s5 + $0x20] sm:$0xff]  ;;  %v295_v40 = vld [vmem:[%s3250_s5 + $0x30] sm:$0xff]  ;;  %v2446_v51 = vld [vmem:[%s3252_s4 + $0x18] sm:$0xff]  }
   0xb   :  { %314 = vperm.xlu0 %2363, %v292_v9   ;;  %2019 = vmatpush3.bf16.msra.mxu1 %v2430_v12  ;;  %v2447_v47 = vld [vmem:[%s3253_s6] sm:$0xff]   ;;  %v2445_v50 = vld [vmem:[%s3252_s4 + $0x10] sm:$0xff]   ;;  %v2448_v52 = vld [vmem:[%s3253_s6 + $0x8] sm:$0xff]   ;;  %s2522_s4 = smov 126  }
   0xc   :  { %2020 = vmatprep.subr.bf16.mxu1 %v2431_v13  ;;  %v2449_v53 = vld [vmem:[%s3253_s6 + $0x10] ss:$0 sps:$4 sm:$0x33]   ;;  %s2523_s6 = smov 127  }
   0xd   :  { %309 = vperm.xlu1 %2364, %v291_v38   ;;  %v486_v54 = vsel %vm484_vm4, %v2449_v53, 0 }
   0xf   :  { %324 = vperm.xlu0 %2363, %v294_v14   ;;  %2021 = vmatpush3.bf16.msra.mxu1 %v2432_v15 }
  0x10   :  { %2022 = vmatprep.subr.bf16.mxu1 %v2433_v16 }
  0x11   :  { %319 = vperm.xlu1 %2364, %v293_v39  }
  0x13   :  { %334 = vperm.xlu0 %2363, %v296_v17   ;;  %2023 = vmatpush3.bf16.msra.mxu1 %v2434_v18 }
  0x14   :  { %2024 = vmatprep.subr.bf16.mxu1 %v2435_v19 }
  0x15   :  { %329 = vperm.xlu1 %2364, %v295_v40  }
  0x17   :  { %2025 = vmatpush3.bf16.msra.mxu1 %v2436_v20 }
  0x18   :  { %2026 = vmatprep.subr.bf16.mxu1 %v2437_v21 }
  0x1b   :  { %2027 = vmatpush3.bf16.msra.mxu1 %v2438_v22 }
  0x1c   :  { %2028 = vmatprep.subr.bf16.mxu1 %v2439_v23 }
  0x1f   :  { %2029 = vmatpush3.bf16.msra.mxu1 %v2440_v24 }
  0x20   :  { %2030 = vmatprep.subr.bf16.mxu1 %v2441_v25 }
  0x23   :  { %2031 = vmatpush3.bf16.msra.mxu1 %v2442_v26 }
  0x82   :  { %v51_v27 = vpop.permute.xlu0 %50 }
  0x86   :  { %v300_v56 = vpop.permute.xlu0 %299 }
  0x88   :  { %v305_v55 = vpop.permute.xlu1 %304 }
  0x8a   :  { %v315_v58 = vpop.permute.xlu0 %314 }
  0x8c   :  { %v310_v57 = vpop.permute.xlu1 %309 }
  0x8e   :  { %v325_v3 = vpop.permute.xlu0 %324 }
  0x90   :  { %v320_v62 = vpop.permute.xlu1 %319 }
  0x92   :  { %v335_v15 = vpop.permute.xlu0 %334 }
  0x94   :  { %v330_v11 = vpop.permute.xlu1 %329 }
  0xdb   :  { %v103_v28 = vpop.f32.mrb[0].mxu0 }
  0xdc   :  { %v104_v29 = vadd.f32 %v103_v28, %v51_v27  ;;  %v105_v30 = vpop.f32.mrb[1].mxu0 }
  0xdd   :  { %v107_v31 = vpop.f32.mrb[2].mxu0  ;;  %v106_v32 = vadd.f32 %v105_v30, %v51_v27 }
  0xde   :  { %v108_v33 = vpop.f32.mrb[3].mxu0  ;;  %v110_v35 = vpack.c.bf16 %v104_v29, %v104_v29 }
  0xdf   :  { %v111_v34 = vpack.c.bf16 %v106_v32, %v106_v32 }
  0xe1   :  { %272 = vmatprep.mubr.bf16.mxu1 %v111_v34 }
  0xe2   :  { %273 = vmatmul.mubr.bf16.vlgmr.msra.gmra.mrb[0].mxu1 %v110_v35 }
 0x1b5   :  { %v2032_v41 = vpop.f32.mrb[0].mxu1 }
 0x1b6   :  { %v2033_v42 = vpop.f32.mrb[1].mxu1 }
 0x1b7   :  { %v2034_v43 = vadd.f32 %v2033_v42, %v2032_v41  ;;  %v2035_v44 = vpop.f32.mrb[2].mxu1 }
 0x1b8   :  { %v2036_v45 = vpop.f32.mrb[3].mxu1 }
 0x1b9   :  { %v288_v46 = vpack.c.bf16 %v2034_v43, %v2034_v43  ;;  %v2452_v43 = vld [vmem:[%s3254_s7 + $0x4] ss:$8 sps:$4 sm:$0xff]  }
 0x1bb   :  { %v372_v48 = vsel %vm370_vm3, %v288_v46, 0  ;;  %2355 = vmatprep.subr.msk.bf16.mxu0 %vm370_vm3, %v288_v46 }
 0x1bc   :  { %2216 = vmatpush3.bf16.msra.mxu0 %v372_v48 }
 0x1bd   :  { %2225 = vmatprep.subr.bf16.mxu0 %v2447_v47 }
 0x1bf   :  { %2218 = vmatmul.mubr.msk.bf16.vlgmr.msra.gmra.mrb[4].mxu0 %vm357_vm2, %v2444_v49 }
 0x1c0   :  { %2221 = vmatprep.mubr.msk.bf16.mxu0 %vm357_vm2, %v2445_v50  ;;  %2226 = vmatpush3.bf16.msra.mxu0 %v2447_v47 }
 0x1c1   :  { %2227 = vmatprep.subr.bf16.mxu0 %v2448_v52 }
 0x1c4   :  { %2228 = vmatpush3.bf16.msra.mxu0 %v2448_v52 }
 0x1c5   :  { %2356 = vmatprep.subr.msk.bf16.mxu0 %vm484_vm4, %v2449_v53 }
 0x1c7   :  { %2222 = vmatmul.mubr.msk.bf16.gmra.mrb[8].mxu0 %vm357_vm2, %v2446_v51 }
 0x1c8   :  { %2230 = vmatpush3.bf16.msra.mxu0 %v486_v54 }
 0x292   :  { %v2219_v59 = vpop.f32.mrb[4].mxu0 }
 0x293   :  { %v417_v60 = vadd.f32 %v2219_v59, %v310_v57  ;;  %v408_v61 = vpop.f32.mrb[5].mxu0 }
 0x294   :  { %v409_v63 = vadd.f32 %v408_v61, %v300_v56  ;;  %v2220_v0 = vpop.f32.mrb[6].mxu0 }
 0x295   :  { %v420_v1 = vadd.f32 %v2220_v0, %v315_v58  ;;  %v411_v2 = vpop.f32.mrb[7].mxu0  ;;  %v441_v5 = vmax.f32 %v417_v60, 0.0 }
 0x296   :  { %v412_v4 = vadd.f32 %v411_v2, %v305_v55  ;;  %v439_v7 = vmax.f32 %v409_v63, 0.0 }
 0x297   :  { %v442_v6 = vmax.f32 %v420_v1, 0.0 }
 0x298   :  { %v440_v8 = vmax.f32 %v412_v4, 0.0 }
 0x299   :  { %v448_v9 = vpack.c.bf16 %v442_v6, %v441_v5 }
 0x29a   :  { %v447_v10 = vpack.c.bf16 %v440_v8, %v439_v7  ;;  %v2223_v12 = vpop.f32.mrb[8].mxu0 }
 0x29b   :  { %v433_v13 = vadd.f32 %v2223_v12, %v330_v11  ;;  %v424_v14 = vpop.f32.mrb[9].mxu0 }
 0x29c   :  { %v425_v16 = vadd.f32 %v424_v14, %v320_v62  ;;  %v2224_v17 = vpop.f32.mrb[10].mxu0  ;;  %2231 = vmatprep.mubr.msk.bf16.mxu0 %vm471_vm5, %v447_v10 }
 0x29d   :  { %v436_v18 = vadd.f32 %v2224_v17, %v335_v15  ;;  %v427_v19 = vpop.f32.mrb[11].mxu0  ;;  %2232 = vmatmul.mubr.msk.bf16.vlgmr.msra.gmra.mrb[12].mxu0 %vm471_vm5, %v448_v9  ;;  %v445_v21 = vmax.f32 %v433_v13, 0.0 }
 0x29e   :  { %v428_v20 = vadd.f32 %v427_v19, %v325_v3  ;;  %v443_v23 = vmax.f32 %v425_v16, 0.0 }
 0x29f   :  { %v446_v22 = vmax.f32 %v436_v18, 0.0 }
 0x2a0   :  { %v444_v24 = vmax.f32 %v428_v20, 0.0 }
 0x2a1   :  { %v450_v25 = vpack.c.bf16 %v446_v22, %v445_v21 }
 0x2a2   :  { %v449_v26 = vpack.c.bf16 %v444_v24, %v443_v23 }
 0x2a4   :  { %2235 = vmatprep.mubr.msk.bf16.mxu0 %vm471_vm5, %v449_v26 }
 0x2a5   :  { %2236 = vmatmul.mubr.msk.bf16.gmra.mrb[16].mxu0 %vm471_vm5, %v450_v25 }
 0x2a6   :  { %793 = vmatprep.mubr.bf16.mxu0 %v2452_v43  ;;  %v2474_v43 = vld [vmem:[%s3255_s9] sm:$0xff]  }
 0x2a7   :  { %2255 = vmatprep.mubr.bf16.mxu1 %v2474_v43 }
 0x370   :  { %v2233_v27 = vpop.f32.mrb[12].mxu0 }
 0x371   :  { %v522_v28 = vpop.f32.mrb[13].mxu0 }
 0x372   :  { %v2234_v29 = vpop.f32.mrb[14].mxu0 }
 0x373   :  { %v650_v30 = vpack.c.bf16 %v2234_v29, %v2233_v27  ;;  %v525_v31 = vpop.f32.mrb[15].mxu0  ;;  %v2370_v32 = vpack.i.bf16 %v2234_v29, %v2233_v27  ;;  %v2453_v29 = vld [vmem:[%s3254_s7 + $0x14] ss:$8 sps:$4 sm:$0xff]  }
 0x374   :  { %v649_v33 = vpack.c.bf16 %v525_v31, %v522_v28  ;;  %v2365_v34 = vpack.i.bf16 %v525_v31, %v522_v28  ;;  %v2450_v28 = vld [vmem:[%s3254_s7] ss:$8 sps:$4 sm:$0xff]   ;;  %v2456_v31 = vld [vmem:[%s3254_s7 + $0x24] ss:$8 sps:$4 sm:$0xff]  }
 0x375   :  { %2371 = vrot.lane.b32.xlu0 %v2370_v32, %s2522_s4 }
 0x376   :  { %2366 = vrot.lane.b32.xlu1 %v2365_v34, %s2522_s4 }
 0x378   :  { %v2237_v35 = vpop.f32.mrb[16].mxu0 }
 0x379   :  { %v538_v36 = vpop.f32.mrb[17].mxu0 }
 0x37a   :  { %v2238_v37 = vpop.f32.mrb[18].mxu0 }
 0x37b   :  { %v652_v38 = vpack.c.bf16 %v2238_v37, %v2237_v35  ;;  %v541_v39 = vpop.f32.mrb[19].mxu0  ;;  %v2380_v40 = vpack.i.bf16 %v2238_v37, %v2237_v35  ;;  %v2462_v35 = vld [vmem:[%s3254_s7 + $0x44] ss:$8 sps:$4 sm:$0xff]   ;;  %v2465_v37 = vld [vmem:[%s3254_s7 + $0x54] ss:$8 sps:$4 sm:$0xff]  }
 0x37c   :  { %v651_v41 = vpack.c.bf16 %v541_v39, %v538_v36  ;;  %v2375_v42 = vpack.i.bf16 %v541_v39, %v538_v36  ;;  %v2464_v36 = vld [vmem:[%s3254_s7 + $0x40] ss:$8 sps:$4 sm:$0xff]   ;;  %v2468_v39 = vld [vmem:[%s3254_s7 + $0x64] ss:$8 sps:$4 sm:$0xff]  }
 0x37d   :  { %2381 = vrot.lane.b32.xlu0 %v2380_v40, %s2522_s4 }
 0x37e   :  { %2376 = vrot.lane.b32.xlu1 %v2375_v42, %s2522_s4 }
 0x381   :  { %2391 = vrot.lane.b32.xlu0 %v2365_v34, %s2523_s6 }
 0x382   :  { %2386 = vrot.lane.b32.xlu1 %v2365_v34, %s2524_s14  ;;  %v2461_v34 = vld [vmem:[%s3254_s7 + $0x30] ss:$8 sps:$4 sm:$0xff]  }
 0x385   :  { %2401 = vrot.lane.b32.xlu0 %v2370_v32, %s2523_s6 }
 0x386   :  { %2396 = vrot.lane.b32.xlu1 %v2370_v32, %s2524_s14  ;;  %v2458_v32 = vld [vmem:[%s3254_s7 + $0x20] ss:$8 sps:$4 sm:$0xff]  }
 0x389   :  { %2411 = vrot.lane.b32.xlu0 %v2375_v42, %s2523_s6 }
 0x38a   :  { %2406 = vrot.lane.b32.xlu1 %v2375_v42, %s2524_s14  ;;  %v2473_v42 = vld [vmem:[%s3254_s7 + $0x70] ss:$8 sps:$4 sm:$0xff]  }
 0x38d   :  { %2421 = vrot.lane.b32.xlu0 %v2380_v40, %s2523_s6 }
 0x38e   :  { %2416 = vrot.lane.b32.xlu1 %v2380_v40, %s2524_s14  ;;  %v2470_v40 = vld [vmem:[%s3254_s7 + $0x60] ss:$8 sps:$4 sm:$0xff]  }
 0x3e7   :  { %v2372_v44 = vpop.permute.xlu0 %2371 }
 0x3e8   :  { %v2367_v45 = vpop.permute.xlu1 %2366  ;;  %v2374_v46 = vunpack.i.h.bf16 %v2372_v44  ;;  %v2373_v47 = vunpack.i.l.bf16 %v2372_v44 }
 0x3e9   :  { %v2369_v48 = vunpack.i.h.bf16 %v2367_v45  ;;  %v2368_v49 = vunpack.i.l.bf16 %v2367_v45  ;;  %v665_v45 = vld [vmem:[%s3256_s8] sm:$0xff] }
 0x3ea   :  { %v658_v51 = vpack.c.bf16 %v2374_v46, %v2373_v47 }
 0x3eb   :  { %v657_v50 = vpack.c.bf16 %v2369_v48, %v2368_v49  ;;  %v666_v49 = vld [vmem:[%s3256_s8 + $0x8] sm:$0xff] }
 0x3ed   :  { %2050 = vmatprep.subr.bf16.mxu0 %v657_v50 }
 0x3ee   :  { %2051 = vmatpush3.bf16.msra.mxu0 %v649_v33  ;;  %v2459_v33 = vld [vmem:[%s3254_s7 + $0x34] ss:$8 sps:$4 sm:$0xff]  }
 0x3ef   :  { %2052 = vmatprep.subr.bf16.mxu0 %v658_v51  ;;  %v2382_v52 = vpop.permute.xlu0 %2381 }
 0x3f0   :  { %v2377_v53 = vpop.permute.xlu1 %2376  ;;  %v2384_v54 = vunpack.i.h.bf16 %v2382_v52  ;;  %v2383_v55 = vunpack.i.l.bf16 %v2382_v52 }
 0x3f1   :  { %v2379_v56 = vunpack.i.h.bf16 %v2377_v53  ;;  %v2378_v57 = vunpack.i.l.bf16 %v2377_v53 }
 0x3f2   :  { %2053 = vmatpush3.bf16.msra.mxu0 %v650_v30  ;;  %v660_v61 = vpack.c.bf16 %v2384_v54, %v2383_v55  ;;  %v2455_v30 = vld [vmem:[%s3254_s7 + $0x10] ss:$8 sps:$4 sm:$0xff]  }
 0x3f3   :  { %v659_v58 = vpack.c.bf16 %v2379_v56, %v2378_v57  ;;  %v2392_v59 = vpop.permute.xlu0 %2391  ;;  %v667_v57 = vld [vmem:[%s3256_s8 + $0x10] sm:$0xff] }
 0x3f4   :  { %v2387_v60 = vpop.permute.xlu1 %2386  ;;  %v2394_v1 = vunpack.i.h.bf16 %v2392_v59  ;;  %v2393_v2 = vunpack.i.l.bf16 %v2392_v59 }
 0x3f5   :  { %v2389_v62 = vunpack.i.h.bf16 %v2387_v60  ;;  %v2388_v63 = vunpack.i.l.bf16 %v2387_v60  ;;  %2054 = vmatprep.subr.bf16.mxu0 %v659_v58 }
 0x3f6   :  { %2055 = vmatpush3.bf16.msra.mxu0 %v651_v41  ;;  %v653_v8 = vpack.c.bf16 %v2394_v1, %v2393_v2  ;;  %v2471_v41 = vld [vmem:[%s3254_s7 + $0x74] ss:$8 sps:$4 sm:$0xff]  }
 0x3f7   :  { %v2402_v0 = vpop.permute.xlu0 %2401  ;;  %2056 = vmatprep.subr.bf16.mxu0 %v660_v61  ;;  %v661_v4 = vpack.c.bf16 %v2389_v62, %v2388_v63  ;;  %v668_v62 = vld [vmem:[%s3256_s8 + $0x18] sm:$0xff] }
 0x3f8   :  { %v2397_v3 = vpop.permute.xlu1 %2396  ;;  %v2404_v9 = vunpack.i.h.bf16 %v2402_v0  ;;  %v2403_v10 = vunpack.i.l.bf16 %v2402_v0 }
 0x3f9   :  { %v2399_v5 = vunpack.i.h.bf16 %v2397_v3  ;;  %v2398_v6 = vunpack.i.l.bf16 %v2397_v3 }
 0x3fa   :  { %2057 = vmatpush3.bf16.msra.mxu0 %v652_v38  ;;  %v654_v15 = vpack.c.bf16 %v2404_v9, %v2403_v10  ;;  %v2467_v38 = vld [vmem:[%s3254_s7 + $0x50] ss:$8 sps:$4 sm:$0xff]  }
 0x3fb   :  { %v2412_v7 = vpop.permute.xlu0 %2411  ;;  %2058 = vmatprep.subr.bf16.mxu0 %v661_v4  ;;  %v662_v12 = vpack.c.bf16 %v2399_v5, %v2398_v6  ;;  %v669_v6 = vld [vmem:[%s3256_s8 + $0x20] sm:$0xff] }
 0x3fc   :  { %v2407_v11 = vpop.permute.xlu1 %2406  ;;  %v2414_v16 = vunpack.i.h.bf16 %v2412_v7  ;;  %v2413_v17 = vunpack.i.l.bf16 %v2412_v7 }
 0x3fd   :  { %v2409_v13 = vunpack.i.h.bf16 %v2407_v11  ;;  %v2408_v14 = vunpack.i.l.bf16 %v2407_v11  ;;  %v670_v11 = vld [vmem:[%s3256_s8 + $0x28] sm:$0xff] }
 0x3fe   :  { %2059 = vmatpush3.bf16.msra.mxu0 %v653_v8  ;;  %v655_v23 = vpack.c.bf16 %v2414_v16, %v2413_v17 }
 0x3ff   :  { %2060 = vmatprep.subr.bf16.mxu0 %v662_v12  ;;  %v663_v19 = vpack.c.bf16 %v2409_v13, %v2408_v14  ;;  %v2422_v20 = vpop.permute.xlu0 %2421 }
 0x400   :  { %v2417_v18 = vpop.permute.xlu1 %2416  ;;  %v2424_v24 = vunpack.i.h.bf16 %v2422_v20  ;;  %v2423_v25 = vunpack.i.l.bf16 %v2422_v20 }
 0x401   :  { %v2419_v21 = vunpack.i.h.bf16 %v2417_v18  ;;  %v2418_v22 = vunpack.i.l.bf16 %v2417_v18 }
 0x402   :  { %2061 = vmatpush3.bf16.msra.mxu0 %v654_v15  ;;  %v656_v27 = vpack.c.bf16 %v2424_v24, %v2423_v25  ;;  %v672_v24 = vld [vmem:[%s3256_s8 + $0x38] sm:$0xff] }
 0x403   :  { %2062 = vmatprep.subr.bf16.mxu0 %v663_v19  ;;  %v664_v26 = vpack.c.bf16 %v2419_v21, %v2418_v22  ;;  %v671_v19 = vld [vmem:[%s3256_s8 + $0x30] sm:$0xff] }
 0x406   :  { %2063 = vmatpush3.bf16.msra.mxu0 %v655_v23 }
 0x407   :  { %2064 = vmatprep.subr.bf16.mxu0 %v664_v26 }
 0x40a   :  { %2065 = vmatpush3.bf16.msra.mxu0 %v656_v27 }
 0x40d   :  { %794 = vmatmul.mubr.bf16.vlgmr.msra.gmra.mrb[20].mxu0 %v2450_v28 }
 0x40e   :  { %801 = vmatprep.mubr.bf16.mxu0 %v2453_v29 }
 0x415   :  { %802 = vmatmul.mubr.bf16.gmra.mrb[24].mxu0 %v2455_v30 }
 0x416   :  { %809 = vmatprep.mubr.bf16.mxu0 %v2456_v31 }
 0x41d   :  { %810 = vmatmul.mubr.bf16.gmra.mrb[28].mxu0 %v2458_v32  ;;  %v673_v32 = vld [vmem:[%s3256_s8 + $0x40] sm:$0xff] }
 0x41e   :  { %817 = vmatprep.mubr.bf16.mxu0 %v2459_v33 }
 0x425   :  { %818 = vmatmul.mubr.bf16.gmra.mrb[32].mxu0 %v2461_v34 }
 0x426   :  { %825 = vmatprep.mubr.bf16.mxu0 %v2462_v35 }
 0x42d   :  { %826 = vmatmul.mubr.bf16.gmra.mrb[36].mxu0 %v2464_v36 }
 0x42e   :  { %833 = vmatprep.mubr.bf16.mxu0 %v2465_v37  ;;  %v674_v37 = vld [vmem:[%s3256_s8 + $0x48] sm:$0xff] }
 0x435   :  { %834 = vmatmul.mubr.bf16.gmra.mrb[40].mxu0 %v2467_v38 }
 0x436   :  { %841 = vmatprep.mubr.bf16.mxu0 %v2468_v39 }
 0x43d   :  { %842 = vmatmul.mubr.bf16.gmra.mrb[44].mxu0 %v2470_v40 }
 0x43e   :  { %849 = vmatprep.mubr.bf16.mxu0 %v2471_v41 }
 0x445   :  { %850 = vmatmul.mubr.bf16.gmra.mrb[48].mxu0 %v2473_v42 }
 0x4e0   :  { %v2066_v44 = vpop.f32.mrb[20].mxu0 }
 0x4e1   :  { %v2067_v46 = vpop.f32.mrb[21].mxu0 }
 0x4e2   :  { %v2068_v47 = vadd.f32 %v2067_v46, %v2066_v44  ;;  %v2069_v48 = vpop.f32.mrb[22].mxu0 }
 0x4e3   :  { %v2070_v50 = vpop.f32.mrb[23].mxu0 }
 0x4e4   :  { %v796_v51 = vadd.f32 %v2068_v47, %v665_v45  ;;  %v2071_v52 = vadd.f32 %v2070_v50, %v2069_v48  ;;  %v675_v45 = vld [vmem:[%s3256_s8 + $0x50] sm:$0xff]  ;;  %v676_v50 = vld [vmem:[%s3256_s8 + $0x58] sm:$0xff] }
 0x4e6   :  { %v799_v53 = vadd.f32 %v2071_v52, %v666_v49  ;;  %v858_v54 = vmax.f32 %v796_v51, 0.0 }
 0x4e8   :  { %v859_v55 = vmax.f32 %v799_v53, 0.0  ;;  %v2072_v56 = vpop.f32.mrb[24].mxu0 }
 0x4e9   :  { %v2073_v58 = vpop.f32.mrb[25].mxu0 }
 0x4ea   :  { %v2074_v59 = vadd.f32 %v2073_v58, %v2072_v56  ;;  %v2075_v60 = vpop.f32.mrb[26].mxu0  ;;  %v954_v61 = vpack.c.bf16 %v859_v55, %v858_v54  ;;  %v677_v58 = vld [vmem:[%s3256_s8 + $0x60] sm:$0xff] }
 0x4eb   :  { %v2076_v63 = vpop.f32.mrb[27].mxu0 }
 0x4ec   :  { %v804_v0 = vadd.f32 %v2074_v59, %v667_v57  ;;  %v2077_v1 = vadd.f32 %v2076_v63, %v2075_v60  ;;  %2239 = vmatprep.subr.bf16.mxu1 %v954_v61  ;;  %v678_v63 = vld [vmem:[%s3256_s8 + $0x68] sm:$0xff] }
 0x4ed   :  { %2240 = vmatpush3.bf16.msra.mxu1 %v954_v61 }
 0x4ee   :  { %v807_v2 = vadd.f32 %v2077_v1, %v668_v62  ;;  %v860_v3 = vmax.f32 %v804_v0, 0.0 }
 0x4f0   :  { %v861_v4 = vmax.f32 %v807_v2, 0.0  ;;  %v2078_v5 = vpop.f32.mrb[28].mxu0 }
 0x4f1   :  { %v2079_v7 = vpop.f32.mrb[29].mxu0 }
 0x4f2   :  { %v2080_v8 = vadd.f32 %v2079_v7, %v2078_v5  ;;  %v2081_v9 = vpop.f32.mrb[30].mxu0  ;;  %v955_v10 = vpack.c.bf16 %v861_v4, %v860_v3  ;;  %v679_v7 = vld [vmem:[%s3256_s8 + $0x70] sm:$0xff] }
 0x4f3   :  { %v2082_v12 = vpop.f32.mrb[31].mxu0 }
 0x4f4   :  { %v812_v13 = vadd.f32 %v2080_v8, %v669_v6  ;;  %v2083_v14 = vadd.f32 %v2082_v12, %v2081_v9  ;;  %2241 = vmatprep.subr.bf16.mxu1 %v955_v10  ;;  %v680_v12 = vld [vmem:[%s3256_s8 + $0x78] sm:$0xff] }
 0x4f5   :  { %2242 = vmatpush3.bf16.msra.mxu1 %v955_v10 }
 0x4f6   :  { %v815_v15 = vadd.f32 %v2083_v14, %v670_v11  ;;  %v862_v16 = vmax.f32 %v812_v13, 0.0 }
 0x4f8   :  { %v863_v17 = vmax.f32 %v815_v15, 0.0  ;;  %v2084_v18 = vpop.f32.mrb[32].mxu0 }
 0x4f9   :  { %v2085_v20 = vpop.f32.mrb[33].mxu0 }
 0x4fa   :  { %v2086_v21 = vadd.f32 %v2085_v20, %v2084_v18  ;;  %v2087_v22 = vpop.f32.mrb[34].mxu0  ;;  %v956_v23 = vpack.c.bf16 %v863_v17, %v862_v16  ;;  %v2475_v20 = vld [vmem:[%s3255_s9 + $0x8] sm:$0xff]  }
 0x4fb   :  { %v2088_v25 = vpop.f32.mrb[35].mxu0 }
 0x4fc   :  { %v820_v26 = vadd.f32 %v2086_v21, %v671_v19  ;;  %v2089_v27 = vadd.f32 %v2088_v25, %v2087_v22  ;;  %2243 = vmatprep.subr.bf16.mxu1 %v956_v23  ;;  %v2476_v21 = vld [vmem:[%s3255_s9 + $0x10] sm:$0xff]   ;;  %v2477_v22 = vld [vmem:[%s3255_s9 + $0x18] sm:$0xff]  }
 0x4fd   :  { %2244 = vmatpush3.bf16.msra.mxu1 %v956_v23  ;;  %v2478_v23 = vld [vmem:[%s3255_s9 + $0x20] sm:$0xff]   ;;  %v2480_v25 = vld [vmem:[%s3255_s9 + $0x30] sm:$0xff]  }
 0x4fe   :  { %v823_v28 = vadd.f32 %v2089_v27, %v672_v24  ;;  %v864_v29 = vmax.f32 %v820_v26, 0.0  ;;  %v2479_v24 = vld [vmem:[%s3255_s9 + $0x28] sm:$0xff]   ;;  %v2481_v26 = vld [vmem:[%s3255_s9 + $0x38] sm:$0xff]   ;;  %v2482_v27 = vld [vmem:[%s3255_s9 + $0x40] sm:$0xff]  }
 0x500   :  { %v865_v30 = vmax.f32 %v823_v28, 0.0  ;;  %v2090_v31 = vpop.f32.mrb[36].mxu0  ;;  %v2483_v28 = vld [vmem:[%s3255_s9 + $0x48] sm:$0xff]  }
 0x501   :  { %v2091_v33 = vpop.f32.mrb[37].mxu0 }
 0x502   :  { %v2092_v34 = vadd.f32 %v2091_v33, %v2090_v31  ;;  %v2093_v35 = vpop.f32.mrb[38].mxu0  ;;  %v957_v36 = vpack.c.bf16 %v865_v30, %v864_v29  ;;  %v2484_v29 = vld [vmem:[%s3255_s9 + $0x50] sm:$0xff]   ;;  %v2485_v30 = vld [vmem:[%s3255_s9 + $0x58] sm:$0xff]   ;;  %v2486_v31 = vld [vmem:[%s3255_s9 + $0x60] sm:$0xff]  }
 0x503   :  { %v2094_v38 = vpop.f32.mrb[39].mxu0  ;;  %v2488_v33 = vld [vmem:[%s3255_s9 + $0x70] sm:$0xff]  }
 0x504   :  { %v828_v39 = vadd.f32 %v2092_v34, %v673_v32  ;;  %v2095_v40 = vadd.f32 %v2094_v38, %v2093_v35  ;;  %2245 = vmatprep.subr.bf16.mxu1 %v957_v36  ;;  %v2487_v32 = vld [vmem:[%s3255_s9 + $0x68] sm:$0xff]   ;;  %v2489_v34 = vld [vmem:[%s3255_s9 + $0x78] sm:$0xff]   ;;  %v2490_v35 = vld [vmem:[%s3255_s9 + $0x80] sm:$0xff]  }
 0x505   :  { %2246 = vmatpush3.bf16.msra.mxu1 %v957_v36  ;;  %v2491_v36 = vld [vmem:[%s3255_s9 + $0x88] sm:$0xff]   ;;  %v2493_v38 = vld [vmem:[%s3255_s9 + $0x98] sm:$0xff]  }
 0x506   :  { %v831_v41 = vadd.f32 %v2095_v40, %v674_v37  ;;  %v866_v42 = vmax.f32 %v828_v39, 0.0  ;;  %v2492_v37 = vld [vmem:[%s3255_s9 + $0x90] sm:$0xff]   ;;  %v2494_v39 = vld [vmem:[%s3255_s9 + $0xa0] sm:$0xff]   ;;  %v2495_v40 = vld [vmem:[%s3255_s9 + $0xa8] sm:$0xff]  }
 0x508   :  { %v867_v43 = vmax.f32 %v831_v41, 0.0  ;;  %v2096_v44 = vpop.f32.mrb[40].mxu0  ;;  %v2496_v41 = vld [vmem:[%s3255_s9 + $0xb0] sm:$0xff]  }
 0x509   :  { %v2097_v46 = vpop.f32.mrb[41].mxu0 }
 0x50a   :  { %v2098_v47 = vadd.f32 %v2097_v46, %v2096_v44  ;;  %v2099_v48 = vpop.f32.mrb[42].mxu0  ;;  %v958_v49 = vpack.c.bf16 %v867_v43, %v866_v42  ;;  %v2497_v42 = vld [vmem:[%s3255_s9 + $0xb8] sm:$0xff]   ;;  %v2498_v43 = vld [vmem:[%s3255_s9 + $0xc0] sm:$0xff]   ;;  %v2499_v44 = vld [vmem:[%s3255_s9 + $0xc8] sm:$0xff]  }
 0x50b   :  { %v2100_v51 = vpop.f32.mrb[43].mxu0  ;;  %v2501_v46 = vld [vmem:[%s3255_s9 + $0xd8] sm:$0xff]  }
 0x50c   :  { %v836_v52 = vadd.f32 %v2098_v47, %v675_v45  ;;  %v2101_v53 = vadd.f32 %v2100_v51, %v2099_v48  ;;  %2247 = vmatprep.subr.bf16.mxu1 %v958_v49  ;;  %v2500_v45 = vld [vmem:[%s3255_s9 + $0xd0] sm:$0xff]   ;;  %v2502_v47 = vld [vmem:[%s3255_s9 + $0xe0] sm:$0xff]   ;;  %v2503_v48 = vld [vmem:[%s3255_s9 + $0xe8] sm:$0xff]  }
 0x50d   :  { %2248 = vmatpush3.bf16.msra.mxu1 %v958_v49  ;;  %v2504_v49 = vld [vmem:[%s3255_s9 + $0xf0] sm:$0xff]   ;;  %v2506_v51 = vld [vmem:[%s3255_s9 + $0x100] sm:$0xff]  }
 0x50e   :  { %v839_v54 = vadd.f32 %v2101_v53, %v676_v50  ;;  %v868_v55 = vmax.f32 %v836_v52, 0.0  ;;  %v2505_v50 = vld [vmem:[%s3255_s9 + $0xf8] sm:$0xff]   ;;  %v2507_v52 = vld [vmem:[%s3255_s9 + $0x108] sm:$0xff]   ;;  %v2508_v53 = vld [vmem:[%s3255_s9 + $0x110] sm:$0xff]  }
 0x510   :  { %v869_v56 = vmax.f32 %v839_v54, 0.0  ;;  %v2102_v57 = vpop.f32.mrb[44].mxu0  ;;  %v2509_v54 = vld [vmem:[%s3255_s9 + $0x118] sm:$0xff]  }
 0x511   :  { %v2103_v59 = vpop.f32.mrb[45].mxu0 }
 0x512   :  { %v2104_v60 = vadd.f32 %v2103_v59, %v2102_v57  ;;  %v2105_v61 = vpop.f32.mrb[46].mxu0  ;;  %v959_v62 = vpack.c.bf16 %v869_v56, %v868_v55  ;;  %v2510_v55 = vld [vmem:[%s3255_s9 + $0x120] sm:$0xff]   ;;  %v2511_v56 = vld [vmem:[%s3255_s9 + $0x128] sm:$0xff]   ;;  %v2512_v57 = vld [vmem:[%s3255_s9 + $0x130] sm:$0xff]  }
 0x513   :  { %v2106_v0 = vpop.f32.mrb[47].mxu0  ;;  %v2516_v59 = vld [vmem:[%s3257_s11 + $0x4] ss:$20 sps:$4 sm:$0x1f]  }
 0x514   :  { %v844_v1 = vadd.f32 %v2104_v60, %v677_v58  ;;  %v2107_v2 = vadd.f32 %v2106_v0, %v2105_v61  ;;  %2249 = vmatprep.subr.bf16.mxu1 %v959_v62  ;;  %v2513_v58 = vld [vmem:[%s3255_s9 + $0x138] sm:$0xff]   ;;  %1821 = vmatprep.mubr.bf16.mxu0 %v2516_v59  ;;  %v964_v60 = vld [vmem:[%s3258_s10 + $0x10] sm:$0xff]  ;;  %v962_v61 = vld [vmem:[%s3258_s10] sm:$0xff] }
 0x515   :  { %2250 = vmatpush3.bf16.msra.mxu1 %v959_v62 }
 0x516   :  { %v847_v3 = vadd.f32 %v2107_v2, %v678_v63  ;;  %v870_v4 = vmax.f32 %v844_v1, 0.0  ;;  %v965_v63 = vld [vmem:[%s3258_s10 + $0x18] sm:$0xff]  ;;  %v963_v2 = vld [vmem:[%s3258_s10 + $0x8] sm:$0xff] }
 0x518   :  { %v871_v5 = vmax.f32 %v847_v3, 0.0  ;;  %v2108_v6 = vpop.f32.mrb[48].mxu0 }
 0x519   :  { %v2109_v8 = vpop.f32.mrb[49].mxu0 }
 0x51a   :  { %v2110_v9 = vadd.f32 %v2109_v8, %v2108_v6  ;;  %v2111_v10 = vpop.f32.mrb[50].mxu0  ;;  %v960_v11 = vpack.c.bf16 %v871_v5, %v870_v4 }
 0x51b   :  { %v2112_v13 = vpop.f32.mrb[51].mxu0 }
 0x51c   :  { %v852_v14 = vadd.f32 %v2110_v9, %v679_v7  ;;  %v2113_v15 = vadd.f32 %v2112_v13, %v2111_v10  ;;  %2251 = vmatprep.subr.bf16.mxu1 %v960_v11 }
 0x51d   :  { %2252 = vmatpush3.bf16.msra.mxu1 %v960_v11 }
 0x51e   :  { %v855_v16 = vadd.f32 %v2113_v15, %v680_v12  ;;  %v872_v17 = vmax.f32 %v852_v14, 0.0  ;;  %v968_v12 = vld [vmem:[%s3258_s10 + $0x30] sm:$0xff]  ;;  %v966_v14 = vld [vmem:[%s3258_s10 + $0x20] sm:$0xff] }
 0x520   :  { %v873_v18 = vmax.f32 %v855_v16, 0.0 }
 0x522   :  { %v961_v19 = vpack.c.bf16 %v873_v18, %v872_v17  ;;  %v969_v17 = vld [vmem:[%s3258_s10 + $0x38] sm:$0xff] }
 0x524   :  { %2253 = vmatprep.subr.bf16.mxu1 %v961_v19 }
 0x525   :  { %2254 = vmatpush3.bf16.msra.mxu1 %v961_v19 }
 0x528   :  { %2256 = vmatmul.mubr.bf16.vlgmr.msra.gmra.mrb[4].mxu1 %v2475_v20  ;;  %v967_v20 = vld [vmem:[%s3258_s10 + $0x28] sm:$0xff] }
 0x529   :  { %2259 = vmatprep.mubr.bf16.mxu1 %v2476_v21 }
 0x530   :  { %2260 = vmatmul.mubr.bf16.gmra.mrb[8].mxu1 %v2477_v22 }
 0x531   :  { %2263 = vmatprep.mubr.bf16.mxu1 %v2478_v23 }
 0x538   :  { %2264 = vmatmul.mubr.bf16.gmra.mrb[12].mxu1 %v2479_v24 }
 0x539   :  { %2267 = vmatprep.mubr.bf16.mxu1 %v2480_v25 }
 0x540   :  { %2268 = vmatmul.mubr.bf16.gmra.mrb[16].mxu1 %v2481_v26 }
 0x541   :  { %2271 = vmatprep.mubr.bf16.mxu1 %v2482_v27 }
 0x548   :  { %2272 = vmatmul.mubr.bf16.gmra.mrb[20].mxu1 %v2483_v28 }
 0x549   :  { %2275 = vmatprep.mubr.bf16.mxu1 %v2484_v29 }
 0x550   :  { %2276 = vmatmul.mubr.bf16.gmra.mrb[24].mxu1 %v2485_v30  ;;  %v972_v30 = vld [vmem:[%s3258_s10 + $0x50] sm:$0xff] }
 0x551   :  { %2279 = vmatprep.mubr.bf16.mxu1 %v2486_v31 }
 0x558   :  { %2280 = vmatmul.mubr.bf16.gmra.mrb[28].mxu1 %v2487_v32  ;;  %v970_v32 = vld [vmem:[%s3258_s10 + $0x40] sm:$0xff] }
 0x559   :  { %2283 = vmatprep.mubr.bf16.mxu1 %v2488_v33 }
 0x560   :  { %2284 = vmatmul.mubr.bf16.gmra.mrb[32].mxu1 %v2489_v34 }
 0x561   :  { %2287 = vmatprep.mubr.bf16.mxu1 %v2490_v35  ;;  %v973_v35 = vld [vmem:[%s3258_s10 + $0x58] sm:$0xff] }
 0x568   :  { %2288 = vmatmul.mubr.bf16.gmra.mrb[36].mxu1 %v2491_v36 }
 0x569   :  { %2291 = vmatprep.mubr.bf16.mxu1 %v2492_v37 }
 0x570   :  { %2292 = vmatmul.mubr.bf16.gmra.mrb[40].mxu1 %v2493_v38  ;;  %v971_v38 = vld [vmem:[%s3258_s10 + $0x48] sm:$0xff] }
 0x571   :  { %2295 = vmatprep.mubr.bf16.mxu1 %v2494_v39 }
 0x578   :  { %2296 = vmatmul.mubr.bf16.gmra.mrb[44].mxu1 %v2495_v40 }
 0x579   :  { %2299 = vmatprep.mubr.bf16.mxu1 %v2496_v41 }
 0x580   :  { %2300 = vmatmul.mubr.bf16.gmra.mrb[48].mxu1 %v2497_v42 }
 0x581   :  { %2303 = vmatprep.mubr.bf16.mxu1 %v2498_v43 }
 0x588   :  { %2304 = vmatmul.mubr.bf16.gmra.mrb[52].mxu1 %v2499_v44 }
 0x589   :  { %2307 = vmatprep.mubr.bf16.mxu1 %v2500_v45 }
 0x590   :  { %2308 = vmatmul.mubr.bf16.gmra.mrb[56].mxu1 %v2501_v46 }
 0x591   :  { %2311 = vmatprep.mubr.bf16.mxu1 %v2502_v47 }
 0x598   :  { %2312 = vmatmul.mubr.bf16.gmra.mrb[60].mxu1 %v2503_v48  ;;  %v976_v48 = vld [vmem:[%s3258_s10 + $0x70] sm:$0xff] }
 0x599   :  { %2315 = vmatprep.mubr.bf16.mxu1 %v2504_v49 }
 0x5a0   :  { %2316 = vmatmul.mubr.bf16.gmra.mrb[64].mxu1 %v2505_v50  ;;  %v974_v50 = vld [vmem:[%s3258_s10 + $0x60] sm:$0xff] }
 0x5a1   :  { %2319 = vmatprep.mubr.bf16.mxu1 %v2506_v51 }
 0x5a8   :  { %2320 = vmatmul.mubr.bf16.gmra.mrb[68].mxu1 %v2507_v52 }
 0x5a9   :  { %2323 = vmatprep.mubr.bf16.mxu1 %v2508_v53  ;;  %v977_v53 = vld [vmem:[%s3258_s10 + $0x78] sm:$0xff] }
 0x5b0   :  { %2324 = vmatmul.mubr.bf16.gmra.mrb[72].mxu1 %v2509_v54 }
 0x5b1   :  { %2327 = vmatprep.mubr.bf16.mxu1 %v2510_v55 }
 0x5b8   :  { %2328 = vmatmul.mubr.bf16.gmra.mrb[76].mxu1 %v2511_v56  ;;  %v975_v56 = vld [vmem:[%s3258_s10 + $0x68] sm:$0xff] }
 0x5b9   :  { %2331 = vmatprep.mubr.bf16.mxu1 %v2512_v57 }
 0x5c0   :  { %2332 = vmatmul.mubr.bf16.gmra.mrb[80].mxu1 %v2513_v58 }
 0x5fb   :  { %v2257_v62 = vpop.f32.mrb[4].mxu1 }
 0x5fc   :  { %v1325_v0 = vadd.f32 %v2257_v62, %v964_v60  ;;  %v1316_v1 = vpop.f32.mrb[5].mxu1 }
 0x5fd   :  { %v1317_v3 = vadd.f32 %v1316_v1, %v962_v61  ;;  %v2258_v4 = vpop.f32.mrb[6].mxu1 }
 0x5fe   :  { %v1328_v5 = vadd.f32 %v2258_v4, %v965_v63  ;;  %v1319_v6 = vpop.f32.mrb[7].mxu1  ;;  %v1637_v8 = vmax.f32 %v1325_v0, 0.0  ;;  %v978_v4 = vld [vmem:[%s3258_s10 + $0x80] sm:$0xff] }
 0x5ff   :  { %v1320_v7 = vadd.f32 %v1319_v6, %v963_v2  ;;  %v1635_v10 = vmax.f32 %v1317_v3, 0.0  ;;  %v980_v2 = vld [vmem:[%s3258_s10 + $0x90] sm:$0xff] }
 0x600   :  { %v1638_v9 = vmax.f32 %v1328_v5, 0.0 }
 0x601   :  { %v1636_v11 = vmax.f32 %v1320_v7, 0.0  ;;  %v981_v7 = vld [vmem:[%s3258_s10 + $0x98] sm:$0xff] }
 0x602   :  { %v2941_v13 = vpack.c.bf16 %v1638_v9, %v1637_v8 }
 0x603   :  { %v2946_v15 = vpack.c.bf16 %v1636_v11, %v1635_v10  ;;  %v2261_v16 = vpop.f32.mrb[8].mxu1  ;;  %v979_v10 = vld [vmem:[%s3258_s10 + $0x88] sm:$0xff] }
 0x604   :  { %v1341_v18 = vadd.f32 %v2261_v16, %v968_v12  ;;  %v1332_v19 = vpop.f32.mrb[9].mxu1 }
 0x605   :  { %v1333_v21 = vadd.f32 %v1332_v19, %v966_v14  ;;  %v2262_v22 = vpop.f32.mrb[10].mxu1 }
 0x606   :  { %v1344_v23 = vadd.f32 %v2262_v22, %v969_v17  ;;  %v1335_v24 = vpop.f32.mrb[11].mxu1  ;;  %v1641_v26 = vmax.f32 %v1341_v18, 0.0  ;;  %v984_v22 = vld [vmem:[%s3258_s10 + $0xb0] sm:$0xff] }
 0x607   :  { %v1336_v25 = vadd.f32 %v1335_v24, %v967_v20  ;;  %v1639_v28 = vmax.f32 %v1333_v21, 0.0  ;;  %v982_v24 = vld [vmem:[%s3258_s10 + $0xa0] sm:$0xff] }
 0x608   :  { %v1642_v27 = vmax.f32 %v1344_v23, 0.0 }
 0x609   :  { %v1640_v29 = vmax.f32 %v1336_v25, 0.0 }
 0x60a   :  { %v2957_v31 = vpack.c.bf16 %v1642_v27, %v1641_v26  ;;  %v985_v27 = vld [vmem:[%s3258_s10 + $0xb8] sm:$0xff] }
 0x60b   :  { %v2962_v33 = vpack.c.bf16 %v1640_v29, %v1639_v28  ;;  %v2265_v34 = vpop.f32.mrb[12].mxu1 }
 0x60c   :  { %v1357_v36 = vadd.f32 %v2265_v34, %v972_v30  ;;  %v1348_v37 = vpop.f32.mrb[13].mxu1  ;;  %v983_v30 = vld [vmem:[%s3258_s10 + $0xa8] sm:$0xff] }
 0x60d   :  { %v1349_v39 = vadd.f32 %v1348_v37, %v970_v32  ;;  %v2266_v40 = vpop.f32.mrb[14].mxu1 }
 0x60e   :  { %v1360_v41 = vadd.f32 %v2266_v40, %v973_v35  ;;  %v1351_v42 = vpop.f32.mrb[15].mxu1  ;;  %v1645_v44 = vmax.f32 %v1357_v36, 0.0 }
 0x60f   :  { %v1352_v43 = vadd.f32 %v1351_v42, %v971_v38  ;;  %v1643_v46 = vmax.f32 %v1349_v39, 0.0  ;;  %v988_v42 = vld [vmem:[%s3258_s10 + $0xd0] sm:$0xff] }
 0x610   :  { %v1646_v45 = vmax.f32 %v1360_v41, 0.0 }
 0x611   :  { %v1644_v47 = vmax.f32 %v1352_v43, 0.0 }
 0x612   :  { %v2973_v49 = vpack.c.bf16 %v1646_v45, %v1645_v44  ;;  %v986_v44 = vld [vmem:[%s3258_s10 + $0xc0] sm:$0xff] }
 0x613   :  { %v2978_v51 = vpack.c.bf16 %v1644_v47, %v1643_v46  ;;  %v2269_v52 = vpop.f32.mrb[16].mxu1 }
 0x614   :  { %v1373_v54 = vadd.f32 %v2269_v52, %v976_v48  ;;  %v1364_v55 = vpop.f32.mrb[17].mxu1 }
 0x615   :  { %v1365_v57 = vadd.f32 %v1364_v55, %v974_v50  ;;  %v2270_v58 = vpop.f32.mrb[18].mxu1  ;;  %v987_v50 = vld [vmem:[%s3258_s10 + $0xc8] sm:$0xff] }
 0x616   :  { %v1376_v59 = vadd.f32 %v2270_v58, %v977_v53  ;;  %v1367_v60 = vpop.f32.mrb[19].mxu1  ;;  %v1649_v62 = vmax.f32 %v1373_v54, 0.0 }
 0x617   :  { %v1368_v61 = vadd.f32 %v1367_v60, %v975_v56  ;;  %v1647_v0 = vmax.f32 %v1365_v57, 0.0  ;;  %v992_v60 = vld [vmem:[%s3258_s10 + $0xf0] sm:$0xff] }
 0x618   :  { %v1650_v63 = vmax.f32 %v1376_v59, 0.0 }
 0x619   :  { %v1648_v1 = vmax.f32 %v1368_v61, 0.0 }
 0x61a   :  { %v2989_v3 = vpack.c.bf16 %v1650_v63, %v1649_v62  ;;  %v990_v62 = vld [vmem:[%s3258_s10 + $0xe0] sm:$0xff] }
 0x61b   :  { %v2994_v5 = vpack.c.bf16 %v1648_v1, %v1647_v0  ;;  %v2273_v6 = vpop.f32.mrb[20].mxu1 }
 0x61c   :  { %v1389_v8 = vadd.f32 %v2273_v6, %v980_v2  ;;  %v1380_v9 = vpop.f32.mrb[21].mxu1 }
 0x61d   :  { %v1381_v11 = vadd.f32 %v1380_v9, %v978_v4  ;;  %v2274_v12 = vpop.f32.mrb[22].mxu1  ;;  %v991_v4 = vld [vmem:[%s3258_s10 + $0xe8] sm:$0xff] }
 0x61e   :  { %v1392_v14 = vadd.f32 %v2274_v12, %v981_v7  ;;  %v1383_v16 = vpop.f32.mrb[23].mxu1  ;;  %v1653_v18 = vmax.f32 %v1389_v8, 0.0 }
 0x61f   :  { %v1384_v17 = vadd.f32 %v1383_v16, %v979_v10  ;;  %v1651_v20 = vmax.f32 %v1381_v11, 0.0  ;;  %v996_v16 = vld [vmem:[%s3258_s10 + $0x110] sm:$0xff] }
 0x620   :  { %v1654_v19 = vmax.f32 %v1392_v14, 0.0 }
 0x621   :  { %v1652_v21 = vmax.f32 %v1384_v17, 0.0 }
 0x622   :  { %v1730_v23 = vpack.c.bf16 %v1654_v19, %v1653_v18  ;;  %v994_v18 = vld [vmem:[%s3258_s10 + $0x100] sm:$0xff] }
 0x623   :  { %v1729_v25 = vpack.c.bf16 %v1652_v21, %v1651_v20  ;;  %v2277_v26 = vpop.f32.mrb[24].mxu1 }
 0x624   :  { %v1405_v28 = vadd.f32 %v2277_v26, %v984_v22  ;;  %v1396_v29 = vpop.f32.mrb[25].mxu1 }
 0x625   :  { %v1397_v32 = vadd.f32 %v1396_v29, %v982_v24  ;;  %v2278_v34 = vpop.f32.mrb[26].mxu1  ;;  %2162 = vmatprep.subr.bf16.mxu0 %v1729_v25 }
 0x626   :  { %v1408_v35 = vadd.f32 %v2278_v34, %v985_v27  ;;  %v1399_v36 = vpop.f32.mrb[27].mxu1  ;;  %2163 = vmatpush3.bf16.msra.mxu0 %v2946_v15  ;;  %v1657_v38 = vmax.f32 %v1405_v28, 0.0  ;;  %v989_v15 = vld [vmem:[%s3258_s10 + $0xd8] sm:$0xff]  ;;  %v1000_v34 = vld [vmem:[%s3258_s10 + $0x130] sm:$0xff] }
 0x627   :  { %v1400_v37 = vadd.f32 %v1399_v36, %v983_v30  ;;  %2164 = vmatprep.subr.bf16.mxu0 %v1730_v23  ;;  %v1655_v40 = vmax.f32 %v1397_v32, 0.0  ;;  %v995_v23 = vld [vmem:[%s3258_s10 + $0x108] sm:$0xff] }
 0x628   :  { %v1658_v39 = vmax.f32 %v1408_v35, 0.0  ;;  %v2514_v35 = vld [vmem:[%s3257_s11] ss:$20 sps:$4 sm:$0x1f]  }
 0x629   :  { %v1656_v41 = vmax.f32 %v1400_v37, 0.0  ;;  %v2519_v37 = vld [vmem:[%s3257_s11 + $0xc] ss:$20 sps:$4 sm:$0x1f]  }
 0x62a   :  { %v1732_v43 = vpack.c.bf16 %v1658_v39, %v1657_v38  ;;  %2165 = vmatpush3.bf16.msra.mxu0 %v2941_v13 }
 0x62b   :  { %v1731_v45 = vpack.c.bf16 %v1656_v41, %v1655_v40  ;;  %v2281_v46 = vpop.f32.mrb[28].mxu1  ;;  %v1001_v40 = vld [vmem:[%s3258_s10 + $0x138] sm:$0xff] }
 0x62c   :  { %v1421_v47 = vadd.f32 %v2281_v46, %v988_v42  ;;  %v1412_v48 = vpop.f32.mrb[29].mxu1 }
 0x62d   :  { %v1413_v52 = vadd.f32 %v1412_v48, %v986_v44  ;;  %v2282_v53 = vpop.f32.mrb[30].mxu1  ;;  %2166 = vmatprep.subr.bf16.mxu0 %v1731_v45 }
 0x62e   :  { %v1424_v13 = vadd.f32 %v2282_v53, %v989_v15  ;;  %v1415_v54 = vpop.f32.mrb[31].mxu1  ;;  %2167 = vmatpush3.bf16.msra.mxu0 %v2962_v33  ;;  %v1661_v56 = vmax.f32 %v1421_v47, 0.0  ;;  %v993_v33 = vld [vmem:[%s3258_s10 + $0xf8] sm:$0xff]  ;;  %v1004_v53 = vld [vmem:[%s3258_s10 + $0x150] sm:$0xff] }
 0x62f   :  { %v1416_v55 = vadd.f32 %v1415_v54, %v987_v50  ;;  %2168 = vmatprep.subr.bf16.mxu0 %v1732_v43  ;;  %v1659_v58 = vmax.f32 %v1413_v52, 0.0  ;;  %v1002_v54 = vld [vmem:[%s3258_s10 + $0x140] sm:$0xff] }
 0x630   :  { %v1662_v57 = vmax.f32 %v1424_v13, 0.0 }
 0x631   :  { %v1660_v59 = vmax.f32 %v1416_v55, 0.0 }
 0x632   :  { %v1734_v61 = vpack.c.bf16 %v1662_v57, %v1661_v56  ;;  %2169 = vmatpush3.bf16.msra.mxu0 %v2957_v31  ;;  %v1005_v57 = vld [vmem:[%s3258_s10 + $0x158] sm:$0xff] }
 0x633   :  { %v1733_v63 = vpack.c.bf16 %v1660_v59, %v1659_v58  ;;  %v2285_v0 = vpop.f32.mrb[32].mxu1 }
 0x634   :  { %v1437_v1 = vadd.f32 %v2285_v0, %v992_v60  ;;  %v1428_v2 = vpop.f32.mrb[33].mxu1  ;;  %v1003_v60 = vld [vmem:[%s3258_s10 + $0x148] sm:$0xff] }
 0x635   :  { %v1429_v6 = vadd.f32 %v1428_v2, %v990_v62  ;;  %v2286_v7 = vpop.f32.mrb[34].mxu1  ;;  %2170 = vmatprep.subr.bf16.mxu0 %v1733_v63 }
 0x636   :  { %v1440_v31 = vadd.f32 %v2286_v7, %v993_v33  ;;  %v1431_v8 = vpop.f32.mrb[35].mxu1  ;;  %2171 = vmatpush3.bf16.msra.mxu0 %v2978_v51  ;;  %v1665_v10 = vmax.f32 %v1437_v1, 0.0  ;;  %v997_v51 = vld [vmem:[%s3258_s10 + $0x118] sm:$0xff]  ;;  %v1008_v7 = vld [vmem:[%s3258_s10 + $0x170] sm:$0xff] }
 0x637   :  { %v1432_v9 = vadd.f32 %v1431_v8, %v991_v4  ;;  %2172 = vmatprep.subr.bf16.mxu0 %v1734_v61  ;;  %v1663_v12 = vmax.f32 %v1429_v6, 0.0  ;;  %v1006_v8 = vld [vmem:[%s3258_s10 + $0x160] sm:$0xff] }
 0x638   :  { %v1666_v11 = vmax.f32 %v1440_v31, 0.0 }
 0x639   :  { %v1664_v14 = vmax.f32 %v1432_v9, 0.0 }
 0x63a   :  { %v1736_v17 = vpack.c.bf16 %v1666_v11, %v1665_v10  ;;  %2173 = vmatpush3.bf16.msra.mxu0 %v2973_v49  ;;  %v1009_v11 = vld [vmem:[%s3258_s10 + $0x178] sm:$0xff] }
 0x63b   :  { %v1735_v19 = vpack.c.bf16 %v1664_v14, %v1663_v12  ;;  %v2289_v20 = vpop.f32.mrb[36].mxu1 }
 0x63c   :  { %v1453_v21 = vadd.f32 %v2289_v20, %v996_v16  ;;  %v1444_v22 = vpop.f32.mrb[37].mxu1  ;;  %v1007_v16 = vld [vmem:[%s3258_s10 + $0x168] sm:$0xff] }
 0x63d   :  { %2174 = vmatprep.subr.bf16.mxu0 %v1735_v19  ;;  %v1445_v24 = vadd.f32 %v1444_v22, %v994_v18  ;;  %v2290_v25 = vpop.f32.mrb[38].mxu1 }
 0x63e   :  { %2175 = vmatpush3.bf16.msra.mxu0 %v2994_v5  ;;  %v1456_v49 = vadd.f32 %v2290_v25, %v997_v51  ;;  %v1447_v26 = vpop.f32.mrb[39].mxu1  ;;  %v1669_v28 = vmax.f32 %v1453_v21, 0.0  ;;  %v998_v5 = vld [vmem:[%s3258_s10 + $0x120] sm:$0xff]  ;;  %v1012_v25 = vld [vmem:[%s3258_s10 + $0x190] sm:$0xff] }
 0x63f   :  { %2176 = vmatprep.subr.bf16.mxu0 %v1736_v17  ;;  %v1448_v27 = vadd.f32 %v1447_v26, %v995_v23  ;;  %v1667_v30 = vmax.f32 %v1445_v24, 0.0  ;;  %v1010_v26 = vld [vmem:[%s3258_s10 + $0x180] sm:$0xff] }
 0x640   :  { %v1670_v29 = vmax.f32 %v1456_v49, 0.0 }
 0x641   :  { %v1668_v32 = vmax.f32 %v1448_v27, 0.0 }
 0x642   :  { %v3063_v36 = vpack.c.bf16 %v1670_v29, %v1669_v28  ;;  %2177 = vmatpush3.bf16.msra.mxu0 %v2989_v3  ;;  %v999_v3 = vld [vmem:[%s3258_s10 + $0x128] sm:$0xff]  ;;  %v1013_v29 = vld [vmem:[%s3258_s10 + $0x198] sm:$0xff] }
 0x643   :  { %v3072_v38 = vpack.c.bf16 %v1668_v32, %v1667_v30  ;;  %v2293_v39 = vpop.f32.mrb[40].mxu1 }
 0x644   :  { %v1469_v41 = vadd.f32 %v2293_v39, %v1000_v34  ;;  %v1460_v42 = vpop.f32.mrb[41].mxu1  ;;  %v1011_v34 = vld [vmem:[%s3258_s10 + $0x188] sm:$0xff] }
 0x645   :  { %v1461_v43 = vadd.f32 %v1460_v42, %v998_v5  ;;  %v2294_v44 = vpop.f32.mrb[42].mxu1  ;;  %1822 = vmatmul.mubr.bf16.vlgmr.msra.gmra.mrb[52].mxu0 %v2514_v35 }
 0x646   :  { %v1472_v45 = vadd.f32 %v2294_v44, %v1001_v40  ;;  %v1463_v46 = vpop.f32.mrb[43].mxu1  ;;  %1862 = vmatprep.mubr.bf16.mxu0 %v2519_v37  ;;  %v1673_v47 = vmax.f32 %v1469_v41, 0.0  ;;  %v1016_v44 = vld [vmem:[%s3258_s10 + $0x1b0] sm:$0xff] }
 0x647   :  { %v1464_v15 = vadd.f32 %v1463_v46, %v999_v3  ;;  %v1671_v50 = vmax.f32 %v1461_v43, 0.0  ;;  %v1014_v46 = vld [vmem:[%s3258_s10 + $0x1a0] sm:$0xff] }
 0x648   :  { %v1674_v48 = vmax.f32 %v1472_v45, 0.0 }
 0x649   :  { %v1672_v52 = vmax.f32 %v1464_v15, 0.0 }
 0x64a   :  { %v3083_v13 = vpack.c.bf16 %v1674_v48, %v1673_v47  ;;  %v1017_v48 = vld [vmem:[%s3258_s10 + $0x1b8] sm:$0xff] }
 0x64b   :  { %v3088_v55 = vpack.c.bf16 %v1672_v52, %v1671_v50  ;;  %v2297_v56 = vpop.f32.mrb[44].mxu1 }
 0x64c   :  { %v1485_v58 = vadd.f32 %v2297_v56, %v1004_v53  ;;  %v1476_v59 = vpop.f32.mrb[45].mxu1  ;;  %v1015_v53 = vld [vmem:[%s3258_s10 + $0x1a8] sm:$0xff] }
 0x64d   :  { %v1477_v61 = vadd.f32 %v1476_v59, %v1002_v54  ;;  %v2298_v62 = vpop.f32.mrb[46].mxu1 }
 0x64e   :  { %v1488_v63 = vadd.f32 %v2298_v62, %v1005_v57  ;;  %v1479_v0 = vpop.f32.mrb[47].mxu1  ;;  %v1677_v1 = vmax.f32 %v1485_v58, 0.0 }
 0x64f   :  { %v1480_v33 = vadd.f32 %v1479_v0, %v1003_v60  ;;  %v1675_v4 = vmax.f32 %v1477_v61, 0.0  ;;  %v1020_v0 = vld [vmem:[%s3258_s10 + $0x1d0] sm:$0xff] }
 0x650   :  { %v1678_v2 = vmax.f32 %v1488_v63, 0.0 }
 0x651   :  { %v1676_v6 = vmax.f32 %v1480_v33, 0.0 }
 0x652   :  { %v3099_v31 = vpack.c.bf16 %v1678_v2, %v1677_v1  ;;  %v1018_v1 = vld [vmem:[%s3258_s10 + $0x1c0] sm:$0xff] }
 0x653   :  { %v3104_v9 = vpack.c.bf16 %v1676_v6, %v1675_v4  ;;  %v2301_v10 = vpop.f32.mrb[48].mxu1 }
 0x654   :  { %v1501_v12 = vadd.f32 %v2301_v10, %v1008_v7  ;;  %v1492_v14 = vpop.f32.mrb[49].mxu1 }
 0x655   :  { %v1493_v17 = vadd.f32 %v1492_v14, %v1006_v8  ;;  %v2302_v18 = vpop.f32.mrb[50].mxu1  ;;  %v1019_v8 = vld [vmem:[%s3258_s10 + $0x1c8] sm:$0xff] }
 0x656   :  { %v1504_v19 = vadd.f32 %v2302_v18, %v1009_v11  ;;  %v1495_v20 = vpop.f32.mrb[51].mxu1  ;;  %v1681_v21 = vmax.f32 %v1501_v12, 0.0 }
 0x657   :  { %v1496_v51 = vadd.f32 %v1495_v20, %v1007_v16  ;;  %v1679_v23 = vmax.f32 %v1493_v17, 0.0  ;;  %v1024_v20 = vld [vmem:[%s3258_s10 + $0x1f0] sm:$0xff] }
 0x658   :  { %v1682_v22 = vmax.f32 %v1504_v19, 0.0 }
 0x659   :  { %v1680_v24 = vmax.f32 %v1496_v51, 0.0 }
 0x65a   :  { %v3115_v49 = vpack.c.bf16 %v1682_v22, %v1681_v21  ;;  %v1022_v21 = vld [vmem:[%s3258_s10 + $0x1e0] sm:$0xff] }
 0x65b   :  { %v3120_v27 = vpack.c.bf16 %v1680_v24, %v1679_v23  ;;  %v2305_v28 = vpop.f32.mrb[52].mxu1 }
 0x65c   :  { %v1517_v30 = vadd.f32 %v2305_v28, %v1012_v25  ;;  %v1508_v32 = vpop.f32.mrb[53].mxu1 }
 0x65d   :  { %v1509_v35 = vadd.f32 %v1508_v32, %v1010_v26  ;;  %v2306_v5 = vpop.f32.mrb[54].mxu1  ;;  %v1023_v26 = vld [vmem:[%s3258_s10 + $0x1e8] sm:$0xff] }
 0x65e   :  { %v1520_v37 = vadd.f32 %v2306_v5, %v1013_v29  ;;  %v1511_v39 = vpop.f32.mrb[55].mxu1  ;;  %v1685_v41 = vmax.f32 %v1517_v30, 0.0 }
 0x65f   :  { %v1512_v40 = vadd.f32 %v1511_v39, %v1011_v34  ;;  %v1683_v3 = vmax.f32 %v1509_v35, 0.0  ;;  %v1028_v39 = vld [vmem:[%s3258_s10 + $0x210] sm:$0xff] }
 0x660   :  { %v1686_v42 = vmax.f32 %v1520_v37, 0.0 }
 0x661   :  { %v1684_v43 = vmax.f32 %v1512_v40, 0.0 }
 0x662   :  { %v1746_v45 = vpack.c.bf16 %v1686_v42, %v1685_v41  ;;  %v1026_v41 = vld [vmem:[%s3258_s10 + $0x200] sm:$0xff] }
 0x663   :  { %v1745_v15 = vpack.c.bf16 %v1684_v43, %v1683_v3  ;;  %v2309_v47 = vpop.f32.mrb[56].mxu1 }
 0x664   :  { %v1533_v50 = vadd.f32 %v2309_v47, %v1016_v44  ;;  %v1524_v52 = vpop.f32.mrb[57].mxu1 }
 0x665   :  { %v1525_v54 = vadd.f32 %v1524_v52, %v1014_v46  ;;  %v2310_v56 = vpop.f32.mrb[58].mxu1  ;;  %2184 = vmatprep.subr.bf16.mxu0 %v1745_v15 }
 0x666   :  { %v1536_v57 = vadd.f32 %v2310_v56, %v1017_v48  ;;  %v1527_v58 = vpop.f32.mrb[59].mxu1  ;;  %2185 = vmatpush3.bf16.msra.mxu0 %v3072_v38  ;;  %v1689_v60 = vmax.f32 %v1533_v50, 0.0  ;;  %v1021_v38 = vld [vmem:[%s3258_s10 + $0x1d8] sm:$0xff]  ;;  %v1032_v56 = vld [vmem:[%s3258_s10 + $0x230] sm:$0xff] }
 0x667   :  { %v1528_v59 = vadd.f32 %v1527_v58, %v1015_v53  ;;  %2186 = vmatprep.subr.bf16.mxu0 %v1746_v45  ;;  %v1687_v62 = vmax.f32 %v1525_v54, 0.0  ;;  %v1027_v45 = vld [vmem:[%s3258_s10 + $0x208] sm:$0xff] }
 0x668   :  { %v1690_v61 = vmax.f32 %v1536_v57, 0.0  ;;  %v2517_v57 = vld [vmem:[%s3257_s11 + $0x8] ss:$20 sps:$4 sm:$0x1f]  }
 0x669   :  { %v1688_v63 = vmax.f32 %v1528_v59, 0.0 }
 0x66a   :  { %v1748_v33 = vpack.c.bf16 %v1690_v61, %v1689_v60  ;;  %2187 = vmatpush3.bf16.msra.mxu0 %v3063_v36  ;;  %v2525_v61 = vmov 0.0  }
 0x66b   :  { %v1747_v2 = vpack.c.bf16 %v1688_v63, %v1687_v62  ;;  %v2313_v4 = vpop.f32.mrb[60].mxu1  ;;  %v1033_v62 = vld [vmem:[%s3258_s10 + $0x238] sm:$0xff] }
 0x66c   :  { %v1549_v6 = vadd.f32 %v2313_v4, %v1020_v0  ;;  %v1540_v7 = vpop.f32.mrb[61].mxu1 }
 0x66d   :  { %v1541_v10 = vadd.f32 %v1540_v7, %v1018_v1  ;;  %v2314_v11 = vpop.f32.mrb[62].mxu1  ;;  %2188 = vmatprep.subr.bf16.mxu0 %v1747_v2 }
 0x66e   :  { %v1552_v36 = vadd.f32 %v2314_v11, %v1021_v38  ;;  %v1543_v12 = vpop.f32.mrb[63].mxu1  ;;  %2189 = vmatpush3.bf16.msra.mxu0 %v3088_v55  ;;  %v1693_v16 = vmax.f32 %v1549_v6, 0.0  ;;  %v1025_v55 = vld [vmem:[%s3258_s10 + $0x1f8] sm:$0xff]  ;;  %v1036_v11 = vld [vmem:[%s3258_s10 + $0x250] sm:$0xff] }
 0x66f   :  { %v1544_v14 = vadd.f32 %v1543_v12, %v1019_v8  ;;  %2190 = vmatprep.subr.bf16.mxu0 %v1748_v33  ;;  %v1691_v18 = vmax.f32 %v1541_v10, 0.0  ;;  %v1031_v33 = vld [vmem:[%s3258_s10 + $0x228] sm:$0xff]  ;;  %v1034_v12 = vld [vmem:[%s3258_s10 + $0x240] sm:$0xff] }
 0x670   :  { %v1694_v17 = vmax.f32 %v1552_v36, 0.0 }
 0x671   :  { %v1692_v19 = vmax.f32 %v1544_v14, 0.0 }
 0x672   :  { %v1750_v51 = vpack.c.bf16 %v1694_v17, %v1693_v16  ;;  %2191 = vmatpush3.bf16.msra.mxu0 %v3083_v13  ;;  %v1037_v17 = vld [vmem:[%s3258_s10 + $0x258] sm:$0xff] }
 0x673   :  { %v1749_v22 = vpack.c.bf16 %v1692_v19, %v1691_v18  ;;  %v2317_v23 = vpop.f32.mrb[64].mxu1 }
 0x674   :  { %v1565_v24 = vadd.f32 %v2317_v23, %v1024_v20  ;;  %v1556_v25 = vpop.f32.mrb[65].mxu1  ;;  %v1035_v20 = vld [vmem:[%s3258_s10 + $0x248] sm:$0xff] }
 0x675   :  { %v1557_v28 = vadd.f32 %v1556_v25, %v1022_v21  ;;  %v2318_v29 = vpop.f32.mrb[66].mxu1  ;;  %2192 = vmatprep.subr.bf16.mxu0 %v1749_v22 }
 0x676   :  { %v1568_v13 = vadd.f32 %v2318_v29, %v1025_v55  ;;  %v1559_v30 = vpop.f32.mrb[67].mxu1  ;;  %2193 = vmatpush3.bf16.msra.mxu0 %v3104_v9  ;;  %v1697_v34 = vmax.f32 %v1565_v24, 0.0  ;;  %v1029_v9 = vld [vmem:[%s3258_s10 + $0x218] sm:$0xff]  ;;  %v1040_v29 = vld [vmem:[%s3258_s10 + $0x270] sm:$0xff] }
 0x677   :  { %v1560_v32 = vadd.f32 %v1559_v30, %v1023_v26  ;;  %2194 = vmatprep.subr.bf16.mxu0 %v1750_v51  ;;  %v1695_v5 = vmax.f32 %v1557_v28, 0.0  ;;  %v1038_v30 = vld [vmem:[%s3258_s10 + $0x260] sm:$0xff] }
 0x678   :  { %v1698_v35 = vmax.f32 %v1568_v13, 0.0 }
 0x679   :  { %v1696_v37 = vmax.f32 %v1560_v32, 0.0 }
 0x67a   :  { %v1752_v40 = vpack.c.bf16 %v1698_v35, %v1697_v34  ;;  %2195 = vmatpush3.bf16.msra.mxu0 %v3099_v31  ;;  %v1041_v35 = vld [vmem:[%s3258_s10 + $0x278] sm:$0xff] }
 0x67b   :  { %v1751_v42 = vpack.c.bf16 %v1696_v37, %v1695_v5  ;;  %v2321_v3 = vpop.f32.mrb[68].mxu1 }
 0x67c   :  { %v1581_v43 = vadd.f32 %v2321_v3, %v1028_v39  ;;  %v1572_v44 = vpop.f32.mrb[69].mxu1  ;;  %v1039_v39 = vld [vmem:[%s3258_s10 + $0x268] sm:$0xff] }
 0x67d   :  { %v1573_v46 = vadd.f32 %v1572_v44, %v1026_v41  ;;  %2196 = vmatprep.subr.bf16.mxu0 %v1751_v42  ;;  %v2322_v15 = vpop.f32.mrb[70].mxu1 }
 0x67e   :  { %v1701_v31 = vmax.f32 %v1581_v43, 0.0  ;;  %v1584_v47 = vadd.f32 %v2322_v15, %v1029_v9  ;;  %2197 = vmatpush3.bf16.msra.mxu0 %v3120_v27  ;;  %v1575_v48 = vpop.f32.mrb[71].mxu1  ;;  %v1030_v27 = vld [vmem:[%s3258_s10 + $0x220] sm:$0xff] }
 0x67f   :  { %v1576_v50 = vadd.f32 %v1575_v48, %v1027_v45  ;;  %2198 = vmatprep.subr.bf16.mxu0 %v1752_v40  ;;  %v1699_v53 = vmax.f32 %v1573_v46, 0.0 }
 0x680   :  { %v1702_v52 = vmax.f32 %v1584_v47, 0.0  ;;  %v2520_v47 = vld [vmem:[%s3257_s11 + $0x10] ss:$20 sps:$4 sm:$0x1f]  }
 0x681   :  { %v1700_v54 = vmax.f32 %v1576_v50, 0.0 }
 0x682   :  { %v1754_v58 = vpack.c.bf16 %v1702_v52, %v1701_v31  ;;  %2199 = vmatpush3.bf16.msra.mxu0 %v3115_v49 }
 0x683   :  { %v1753_v59 = vpack.c.bf16 %v1700_v54, %v1699_v53  ;;  %v2325_v60 = vpop.f32.mrb[72].mxu1  ;;  %2335 = vmatprep.subr.bf16.mxu0 %v2525_v61 }
 0x684   :  { %v1597_v63 = vadd.f32 %v2325_v60, %v1032_v56  ;;  %v1588_v0 = vpop.f32.mrb[73].mxu1 }
 0x685   :  { %v1589_v49 = vadd.f32 %v1588_v0, %v1030_v27  ;;  %1863 = vmatmul.mubr.bf16.vlgmr.msra.gmra.mrb[56].mxu0 %v2517_v57  ;;  %v2326_v1 = vpop.f32.mrb[74].mxu1  ;;  %v1761_v57 = vld [vmem:[%s3259_s12] sm:$0xff]  ;;  %v1762_v27 = vld [vmem:[%s3259_s12 + $0x8] sm:$0x3] }
 0x686   :  { %v1705_v2 = vmax.f32 %v1597_v63, 0.0  ;;  %v1600_v4 = vadd.f32 %v2326_v1, %v1033_v62  ;;  %2336 = vmatpush3.bf16.msra.mxu0 %v1753_v59  ;;  %v1591_v38 = vpop.f32.mrb[75].mxu1  ;;  %2351 = vmatprep.mubr.msk.bf16.mxu0 %vm2526_vm6, %v2525_v61 }
 0x687   :  { %v1592_v6 = vadd.f32 %v1591_v38, %v1031_v33  ;;  %2337 = vmatprep.subr.bf16.mxu0 %v2525_v61  ;;  %v1703_v8 = vmax.f32 %v1589_v49, 0.0 }
 0x688   :  { %v1706_v7 = vmax.f32 %v1600_v4, 0.0 }
 0x689   :  { %v1704_v10 = vmax.f32 %v1592_v6, 0.0 }
 0x68a   :  { %v1756_v36 = vpack.c.bf16 %v1706_v7, %v1705_v2  ;;  %2338 = vmatpush3.bf16.msra.mxu0 %v1754_v58 }
 0x68b   :  { %v1755_v14 = vpack.c.bf16 %v1704_v10, %v1703_v8  ;;  %v2329_v16 = vpop.f32.mrb[76].mxu1  ;;  %2339 = vmatprep.subr.bf16.mxu0 %v2525_v61 }
 0x68c   :  { %v1613_v18 = vadd.f32 %v2329_v16, %v1036_v11  ;;  %v1604_v19 = vpop.f32.mrb[77].mxu1 }
 0x68d   :  { %v1605_v51 = vadd.f32 %v1604_v19, %v1034_v12  ;;  %v2330_v21 = vpop.f32.mrb[78].mxu1 }
 0x68e   :  { %v1709_v22 = vmax.f32 %v1613_v18, 0.0  ;;  %v1616_v23 = vadd.f32 %v2330_v21, %v1037_v17  ;;  %2340 = vmatpush3.bf16.msra.mxu0 %v1755_v14  ;;  %v1607_v55 = vpop.f32.mrb[79].mxu1 }
 0x68f   :  { %v1608_v24 = vadd.f32 %v1607_v55, %v1035_v20  ;;  %2341 = vmatprep.subr.bf16.mxu0 %v2525_v61  ;;  %v1707_v26 = vmax.f32 %v1605_v51, 0.0 }
 0x690   :  { %v1710_v25 = vmax.f32 %v1616_v23, 0.0 }
 0x691   :  { %v1708_v28 = vmax.f32 %v1608_v24, 0.0 }
 0x692   :  { %v1758_v13 = vpack.c.bf16 %v1710_v25, %v1709_v22  ;;  %2342 = vmatpush3.bf16.msra.mxu0 %v1756_v36 }
 0x693   :  { %v1757_v32 = vpack.c.bf16 %v1708_v28, %v1707_v26  ;;  %v2333_v34 = vpop.f32.mrb[80].mxu1  ;;  %2343 = vmatprep.subr.bf16.mxu0 %v2525_v61 }
 0x694   :  { %v1629_v5 = vadd.f32 %v2333_v34, %v1040_v29  ;;  %v1620_v37 = vpop.f32.mrb[81].mxu1 }
 0x695   :  { %v1621_v40 = vadd.f32 %v1620_v37, %v1038_v30  ;;  %v2334_v41 = vpop.f32.mrb[82].mxu1 }
 0x696   :  { %v1713_v42 = vmax.f32 %v1629_v5, 0.0  ;;  %v1632_v3 = vadd.f32 %v2334_v41, %v1041_v35  ;;  %2344 = vmatpush3.bf16.msra.mxu0 %v1757_v32  ;;  %v1623_v9 = vpop.f32.mrb[83].mxu1 }
 0x697   :  { %v1624_v43 = vadd.f32 %v1623_v9, %v1039_v39  ;;  %2345 = vmatprep.subr.bf16.mxu0 %v2525_v61  ;;  %v1711_v45 = vmax.f32 %v1621_v40, 0.0 }
 0x698   :  { %v1714_v44 = vmax.f32 %v1632_v3, 0.0 }
 0x699   :  { %v1712_v46 = vmax.f32 %v1624_v43, 0.0 }
 0x69a   :  { %v1760_v15 = vpack.c.bf16 %v1714_v44, %v1713_v42  ;;  %2346 = vmatpush3.bf16.msra.mxu0 %v1758_v13 }
 0x69b   :  { %v1759_v31 = vpack.c.bf16 %v1712_v46, %v1711_v45  ;;  %2347 = vmatprep.subr.bf16.mxu0 %v2525_v61 }
 0x69e   :  { %2348 = vmatpush3.bf16.msra.mxu0 %v1759_v31 }
 0x69f   :  { %2349 = vmatprep.subr.bf16.mxu0 %v2525_v61 }
 0x6a2   :  { %2350 = vmatpush3.bf16.msra.mxu0 %v1760_v15 }
 0x6a5   :  { %2352 = vmatmul.mubr.bf16.vlgmr.msra.gmra.mrb[60].mxu0 %v2520_v47 }
 0x718   :  { %v2178_v48 = vpop.f32.mrb[52].mxu0 }
 0x719   :  { %v2179_v50 = vpop.f32.mrb[53].mxu0 }
 0x71a   :  { %v2180_v52 = vadd.f32 %v2179_v50, %v2178_v48  ;;  %v2181_v53 = vpop.f32.mrb[54].mxu0 }
 0x71b   :  { %v2182_v54 = vpop.f32.mrb[55].mxu0 }
 0x71c   :  { %v2183_v56 = vadd.f32 %v2182_v54, %v2181_v53  ;;  %v1824_v60 = vadd.f32 %v2180_v52, %v1761_v57 }
 0x71e   :  { %v1827_v0 = vadd.f32 %v2183_v56, %v1762_v27 }
 0x758   :  { %v2200_v58 = vpop.f32.mrb[56].mxu0 }
 0x759   :  { %v2201_v59 = vpop.f32.mrb[57].mxu0 }
 0x75a   :  { %v2202_v61 = vadd.f32 %v2201_v59, %v2200_v58  ;;  %v2203_v62 = vpop.f32.mrb[58].mxu0 }
 0x75b   :  { %v2204_v63 = vpop.f32.mrb[59].mxu0 }
 0x75c   :  { %v2205_v33 = vadd.f32 %v2204_v63, %v2203_v62  ;;  %v1865_v49 = vadd.f32 %v2202_v61, %v1824_v60 }
 0x75e   :  { %v1868_v1 = vadd.f32 %v2205_v33, %v1827_v0 }
 0x778   :  { %v1905_v2 = vpop.f32.mrb[60].mxu0 }
 0x779   :  { %v1906_v4 = vadd.f32 %v1905_v2, %v1865_v49  ;;  %v2353_v38 = vpop.f32.mrb[61].mxu0 }
 0x77a   :  { %v1908_v6 = vpop.f32.mrb[62].mxu0 }
 0x77b   :  { %1913 = vst.msk [vmem:[%s3260_s13] sm:$0xff] %vm1912_vm7, %v1906_v4  ;;  %v1909_v7 = vadd.f32 %v1908_v6, %v1868_v1  ;;  %v2354_v8 = vpop.f32.mrb[63].mxu0 }
 0x77d   :  { %1915 = vst.msk [vmem:[%s3260_s13 + $0x8] sm:$0x3] %vm1914_vm8, %v1909_v7 }

</bundles_post_ra>
